<compile_context>
chip_gen: v5e
topology: v5e:2x2
jax: 0.10.0
libtpu: 0.0.40
codegen_flags: <defaults>
</compile_context>

<pallas_src>
import functools
import math

import jax
import jax.numpy as jnp
from jax import lax
from jax.experimental import pallas as pl
from jax.experimental.pallas import tpu as pltpu

BN_EPS = 1e-5
_INV_SQRT2 = 1.0 / math.sqrt(2.0)


def _gelu_exact(x):
    # nn.GELU(approximate='none'): 0.5 * x * (1 + erf(x / sqrt(2)))
    return 0.5 * x * (1.0 + lax.erf(x * _INV_SQRT2))


def _vmem_limit_bytes():
    # Size the scoped-VMEM request against the actual chip (64 MiB on v7x,
    # 128 MiB on v5e/v6e) and leave headroom.
    try:
        cap = pltpu.get_tpu_info().vmem_capacity_bytes
    except Exception:
        cap = 64 << 20
    return int(min(cap * 3 // 4, 96 << 20))


def _pick_row_tile(n_rows, bytes_per_row, tile_bytes):
    """Largest divisor of n_rows that is a multiple of 8 and fits tile_bytes."""
    upper = max(8, min(n_rows, tile_bytes // max(1, bytes_per_row)))
    best = None
    i = 1
    while i * i <= n_rows:
        if n_rows % i == 0:
            for c in (i, n_rows // i):
                if c <= upper and c % 8 == 0 and (best is None or c > best):
                    best = c
        i += 1
    return best if best is not None else n_rows   # full extent is always legal


def _parallel_factor(n):
    # Split the leading ("parallel") grid axis across the (up to 2) TensorCores.
    return 2 if (n % 2 == 0 and n >= 2) else 1


# ---------------------------------------------------------------------------
# Pass 1: proj1 = Conv3d kernel (3,1,1) as one matmul on temporally-im2col'd
# input, + conv bias, + per-channel BN1 partial statistics.
# ---------------------------------------------------------------------------
def _stage1_kernel(x_ref, w_ref, b_ref, y_ref, stats_ref):
    # x_ref: (tm, 3*Cin) bf16 ; w_ref: (3*Cin, Cmid) bf16 ; b_ref: (1, Cmid) f32
    # y_ref: (tm, Cmid) bf16 (pre-BN)
    # stats_ref: (2, Cmid) f32 accumulator (rows: sum, sum-of-squares)
    @pl.when(pl.program_id(1) == 0)
    def _init():
        stats_ref[...] = jnp.zeros_like(stats_ref)

    y = jnp.dot(x_ref[...], w_ref[...], preferred_element_type=jnp.float32)
    y = y + b_ref[...]
    y_ref[...] = y.astype(y_ref.dtype)
    stats_ref[0:1, :] += jnp.sum(y, axis=0, keepdims=True)
    stats_ref[1:2, :] += jnp.sum(y * y, axis=0, keepdims=True)


# ---------------------------------------------------------------------------
# Pass 2: BN1 normalize + GELU fused with proj2 = Conv3d kernel (1,3,3),
# + conv bias, + per-channel BN2 partial statistics.  One (b, t) plane per step.
# ---------------------------------------------------------------------------
def _stage2_kernel(a_ref, sc_ref, sh_ref, w2_ref, b2_ref, y_ref, stats_ref,
                   zp_ref):
    # a_ref : (H, W, Cmid) bf16  (stage-1 pre-BN output plane)
    # sc/sh : (1, Cmid) f32 folded BN1 scale/shift
    # w2_ref: (9, Cmid, Cout) bf16 ; b2_ref: (1, Cout) f32
    # y_ref : (H, W, Cout) bf16 (pre-BN2) ; stats_ref: (2, Cout) f32
    # zp_ref: VMEM scratch (H+2, W+2, Cmid) f32 — zero-halo plane
    H, W, Cmid = a_ref.shape
    Cout = w2_ref.shape[-1]

    @pl.when(pl.program_id(1) == 0)
    def _init():
        stats_ref[...] = jnp.zeros_like(stats_ref)

    sc = sc_ref[...].reshape(1, 1, Cmid)
    sh = sh_ref[...].reshape(1, 1, Cmid)
    z = _gelu_exact(a_ref[...].astype(jnp.float32) * sc + sh)   # BN1 + GELU (f32)

    # Build the 1-pixel zero halo inside VMEM (no HBM round trip for padding).
    zp_ref[0:1, :, :] = jnp.zeros((1, W + 2, Cmid), jnp.float32)
    zp_ref[H + 1:H + 2, :, :] = jnp.zeros((1, W + 2, Cmid), jnp.float32)
    zp_ref[:, 0:1, :] = jnp.zeros((H + 2, 1, Cmid), jnp.float32)
    zp_ref[:, W + 1:W + 2, :] = jnp.zeros((H + 2, 1, Cmid), jnp.float32)
    zp_ref[1:H + 1, 1:W + 1, :] = z

    acc = None
    for dw in range(3):
        # One width shift per dw (3 relayouts total instead of 9); the dh taps
        # below are cheap row slices of the flattened view (aligned when W%8==0).
        sw = zp_ref[:, dw:dw + W, :].reshape((H + 2) * W, Cmid)
        for dh in range(3):
            tap = sw[dh * W:(dh + H) * W, :].astype(jnp.bfloat16)
            d = jnp.dot(tap, w2_ref[dh * 3 + dw],
                        preferred_element_type=jnp.float32)
            acc = d if acc is None else acc + d

    y = acc + b2_ref[...]                                       # (H*W, Cout) f32
    y_ref[...] = y.reshape(H, W, Cout).astype(y_ref.dtype)
    stats_ref[0:1, :] += jnp.sum(y, axis=0, keepdims=True)
    stats_ref[1:2, :] += jnp.sum(y * y, axis=0, keepdims=True)


# ---------------------------------------------------------------------------
# Pass 3: apply the final BN2 affine (scale/shift already folded).
# ---------------------------------------------------------------------------
def _stage3_kernel(y_ref, sc_ref, sh_ref, o_ref):
    o_ref[...] = y_ref[...].astype(jnp.float32) * sc_ref[...] + sh_ref[...]


# ---------------------------------------------------------------------------
# Wrapper
# ---------------------------------------------------------------------------
def patch_embed_forward(x_ncdhw, params, *, tile_bytes=4 << 20):
    w1, b1, g1, be1, w2, b2, g2, be2 = params
    B, Cin, T, H, W = x_ncdhw.shape
    Cmid = w1.shape[-1]
    Cout = w2.shape[-1]
    M = B * T * H * W
    BT = B * T
    vmem_limit = _vmem_limit_bytes()

    row = lambda v: v.reshape(1, -1).astype(jnp.float32)

    # ---- glue: NCDHW -> NDHWC (bf16) + temporal im2col (3 taps -> 3*Cin) ----
    x_l = jnp.transpose(x_ncdhw, (0, 2, 3, 4, 1)).astype(jnp.bfloat16)
    zt = jnp.zeros((B, 1, H, W, Cin), jnp.bfloat16)
    xcat = jnp.concatenate(
        [jnp.concatenate([zt, x_l[:, :-1]], axis=1),    # x[t-1]
         x_l,                                           # x[t]
         jnp.concatenate([x_l[:, 1:], zt], axis=1)],    # x[t+1]
        axis=-1).reshape(M, 3 * Cin)
    w1cat = w1.reshape(3 * Cin, Cmid).astype(jnp.bfloat16)

    # ---- pass 1: proj1 + BN1 partial stats --------------------------------
    tm1 = _pick_row_tile(M, (3 * Cin + Cmid) * 2, tile_bytes)
    n1 = M // tm1
    gp1 = _parallel_factor(n1)
    ni1 = n1 // gp1

    y1, st1 = pl.pallas_call(
        _stage1_kernel,
        grid=(gp1, ni1),
        in_specs=[
            pl.BlockSpec((tm1, 3 * Cin), lambda o, i: (o * ni1 + i, 0)),
            pl.BlockSpec((3 * Cin, Cmid), lambda o, i: (0, 0)),
            pl.BlockSpec((1, Cmid), lambda o, i: (0, 0)),
        ],
        out_specs=[
            pl.BlockSpec((tm1, Cmid), lambda o, i: (o * ni1 + i, 0)),
            pl.BlockSpec((None, 2, Cmid), lambda o, i: (o, 0, 0)),
        ],
        out_shape=[
            jax.ShapeDtypeStruct((M, Cmid), jnp.bfloat16),
            jax.ShapeDtypeStruct((gp1, 2, Cmid), jnp.float32),
        ],
        compiler_params=pltpu.CompilerParams(
            dimension_semantics=("parallel", "arbitrary"),
            vmem_limit_bytes=vmem_limit),
    )(xcat, w1cat, row(b1))

    # BN1 finalize (tiny) -> folded scale/shift.
    s1 = jnp.sum(st1, axis=0)
    mean1 = s1[0] / M
    var1 = s1[1] / M - mean1 * mean1
    scale1 = g1.astype(jnp.float32) * lax.rsqrt(var1 + BN_EPS)
    shift1 = be1.astype(jnp.float32) - mean1 * scale1

    # ---- pass 2: BN1+GELU fused with proj2 + BN2 partial stats -------------
    # TODO(synk): add H-tiling with a 1-row halo for very large H*W planes.
    y1p = y1.reshape(BT, H, W, Cmid)
    w2f = w2.reshape(9, Cmid, Cout).astype(jnp.bfloat16)
    gp2 = _parallel_factor(BT)
    ni2 = BT // gp2

    y2, st2 = pl.pallas_call(
        _stage2_kernel,
        grid=(gp2, ni2),
        in_specs=[
            pl.BlockSpec((None, H, W, Cmid), lambda o, i: (o * ni2 + i, 0, 0, 0)),
            pl.BlockSpec((1, Cmid), lambda o, i: (0, 0)),
            pl.BlockSpec((1, Cmid), lambda o, i: (0, 0)),
            pl.BlockSpec((9, Cmid, Cout), lambda o, i: (0, 0, 0)),
            pl.BlockSpec((1, Cout), lambda o, i: (0, 0)),
        ],
        out_specs=[
            pl.BlockSpec((None, H, W, Cout), lambda o, i: (o * ni2 + i, 0, 0, 0)),
            pl.BlockSpec((None, 2, Cout), lambda o, i: (o, 0, 0)),
        ],
        out_shape=[
            jax.ShapeDtypeStruct((BT, H, W, Cout), jnp.bfloat16),
            jax.ShapeDtypeStruct((gp2, 2, Cout), jnp.float32),
        ],
        scratch_shapes=[pltpu.VMEM((H + 2, W + 2, Cmid), jnp.float32)],
        compiler_params=pltpu.CompilerParams(
            dimension_semantics=("parallel", "arbitrary"),
            vmem_limit_bytes=vmem_limit),
    )(y1p, scale1.reshape(1, Cmid), shift1.reshape(1, Cmid), w2f, row(b2))

    # BN2 finalize -> folded scale/shift.
    s2 = jnp.sum(st2, axis=0)
    mean2 = s2[0] / M
    var2 = s2[1] / M - mean2 * mean2
    scale2 = g2.astype(jnp.float32) * lax.rsqrt(var2 + BN_EPS)
    shift2 = be2.astype(jnp.float32) - mean2 * scale2

    # ---- pass 3: apply BN2 affine ------------------------------------------
    y2f = y2.reshape(M, Cout)
    tm3 = _pick_row_tile(M, Cout * (2 + 4), tile_bytes)
    n3 = M // tm3

    out = pl.pallas_call(
        _stage3_kernel,
        grid=(n3,),
        in_specs=[
            pl.BlockSpec((tm3, Cout), lambda i: (i, 0)),
            pl.BlockSpec((1, Cout), lambda i: (0, 0)),
            pl.BlockSpec((1, Cout), lambda i: (0, 0)),
        ],
        out_specs=pl.BlockSpec((tm3, Cout), lambda i: (i, 0)),
        out_shape=jax.ShapeDtypeStruct((M, Cout), jnp.float32),
        compiler_params=pltpu.CompilerParams(
            dimension_semantics=("parallel",),
            vmem_limit_bytes=vmem_limit),
    )(y2f, scale2.reshape(1, Cout), shift2.reshape(1, Cout))

    return out.reshape(B, T, H, W, Cout).transpose(0, 4, 1, 2, 3)  # NCDHW


# ---------------------------------------------------------------------------
# Pure-JAX reference (independent path via lax.conv_general_dilated, f32)
# ---------------------------------------------------------------------------
def patch_embed_ref(x_ncdhw, params):
    w1, b1, g1, be1, w2, b2, g2, be2 = params
    dn = ('NCDHW', 'OIDHW', 'NCDHW')
    cshape = lambda v: v.reshape(1, -1, 1, 1, 1)

    def bn(y, gamma, beta):
        axes = (0, 2, 3, 4)
        m = y.mean(axis=axes, keepdims=True)
        v = ((y - m) ** 2).mean(axis=axes, keepdims=True)
        return (y - m) / jnp.sqrt(v + BN_EPS) * cshape(gamma) + cshape(beta)

    w1_oidhw = jnp.transpose(w1, (2, 1, 0))[:, :, :, None, None]   # (Cmid,Cin,3,1,1)
    w2_oidhw = jnp.transpose(w2, (3, 2, 0, 1))[:, :, None, :, :]   # (Cout,Cmid,1,3,3)

    y = lax.conv_general_dilated(x_ncdhw, w1_oidhw, (1, 1, 1),
                                 [(1, 1), (0, 0), (0, 0)], dimension_numbers=dn)
    y = bn(y + cshape(b1), g1, be1)
    y = jax.nn.gelu(y, approximate=False)
    y = lax.conv_general_dilated(y, w2_oidhw, (1, 1, 1),
                                 [(0, 0), (1, 1), (1, 1)], dimension_numbers=dn)
    return bn(y + cshape(b2), g2, be2)


if __name__ == "__main__":
    # Small deterministic shapes: batch=2, in_chans=4, frames=4, 16x16 spatial,
    # embed_dim=32.  tile_bytes is shrunk so the test exercises multi-step grids
    # (accumulator revisits + parallel outer axis); the default is 4 MiB tiles.
    B, Cin, T, H, W = 2, 4, 4, 16, 16
    embed_dim = 32
    Cmid = embed_dim // 2

    keys = jax.random.split(jax.random.PRNGKey(0), 10)
    x = jax.random.normal(keys[0], (B, Cin, T, H, W), dtype=jnp.float32)

    params = (
        0.3 * jax.random.normal(keys[1], (3, Cin, Cmid), dtype=jnp.float32),        # w1 (kt,Cin,Cmid)
        0.1 * jax.random.normal(keys[2], (Cmid,), dtype=jnp.float32),                # b1
        1.0 + 0.1 * jax.random.normal(keys[3], (Cmid,), dtype=jnp.float32),          # gamma1
        0.1 * jax.random.normal(keys[4], (Cmid,), dtype=jnp.float32),                # beta1
        0.1 * jax.random.normal(keys[5], (3, 3, Cmid, embed_dim), dtype=jnp.float32),# w2 (kh,kw,Cmid,Cout)
        0.1 * jax.random.normal(keys[6], (embed_dim,), dtype=jnp.float32),           # b2
        1.0 + 0.1 * jax.random.normal(keys[7], (embed_dim,), dtype=jnp.float32),     # gamma2
        0.1 * jax.random.normal(keys[8], (embed_dim,), dtype=jnp.float32),           # beta2
    )

    fwd = jax.jit(functools.partial(patch_embed_forward, tile_bytes=32 << 10))
    out = jax.block_until_ready(fwd(x, params))
    ref = jax.block_until_ready(patch_embed_ref(x, params))

    assert out.shape == (B, embed_dim, T, H, W), out.shape
    err = jnp.abs(out - ref)
    max_err = float(jnp.max(err))
    mean_err = float(jnp.mean(err))
    # bf16 storage of x / weights / intermediates => looser tolerance than pure f32.
    assert max_err < 1e-1, f"max mismatch vs reference: {max_err}"
    assert mean_err < 2e-2, f"mean mismatch vs reference: {mean_err}"
    print("KERNEL_OK")
</pallas_src>

<mosaic_0001>
module attributes {stable_mosaic.version = 11 : i64} {
  func.func @_stage1_kernel(%arg0: i32, %arg1: i32, %arg2: memref<512x12xbf16, #tpu.memory_space<vmem>>, %arg3: memref<12x16xbf16, #tpu.memory_space<vmem>>, %arg4: memref<1x16xf32, #tpu.memory_space<vmem>>, %arg5: memref<512x16xbf16, #tpu.memory_space<vmem>>, %arg6: memref<1x2x16xf32, #tpu.memory_space<vmem>>) attributes {dimension_semantics = [#tpu.dimension_semantics<parallel>, #tpu.dimension_semantics<arbitrary>], iteration_bounds = array<i64: 2, 2>, scalar_prefetch = 0 : i64, scratch_operands = 0 : i64, tpu.core_type = #tpu.core_type<tc>, window_params = [{transform_indices = @transform_0, window_bounds = array<i64: 512, 12>}, {pipeline_mode = #tpu.pipeline_mode<synchronous>, transform_indices = @transform_1, window_bounds = array<i64: 12, 16>}, {pipeline_mode = #tpu.pipeline_mode<synchronous>, transform_indices = @transform_2, window_bounds = array<i64: 1, 16>}, {transform_indices = @transform_3, window_bounds = array<i64: 512, 16>}, {transform_indices = @transform_4, window_bounds = array<i64: 1, 2, 16>}]} {
    %c0_i32 = arith.constant 0 : i32
    %0 = arith.cmpi eq, %arg1, %c0_i32 : i32
    %1 = arith.extui %0 : i1 to i32
    %c0_i32_0 = arith.constant 0 : i32
    %2 = arith.cmpi ne, %1, %c0_i32_0 : i32
    scf.if %2 {
      %cst_21 = arith.constant 0.000000e+00 : f32
      %28 = vector.broadcast %cst_21 : f32 to vector<2x16xf32>
      %c0_22 = arith.constant 0 : index
      %c0_23 = arith.constant 0 : index
      %c0_24 = arith.constant 0 : index
      %29 = vector.load %arg6[%c0_22, %c0_23, %c0_24] : memref<1x2x16xf32, #tpu.memory_space<vmem>>, vector<1x2x16xf32>
      %30 = vector.shape_cast %29 : vector<1x2x16xf32> to vector<2x16xf32>
      %31 = vector.shape_cast %28 : vector<2x16xf32> to vector<1x2x16xf32>
      tpu.vector_store %arg6[%c0_22, %c0_23, %c0_24], %31 {strides = array<i32>} : memref<1x2x16xf32, #tpu.memory_space<vmem>>, vector<1x2x16xf32>,
    } else {
    }
    %c0 = arith.constant 0 : index
    %c0_1 = arith.constant 0 : index
    %3 = vector.load %arg2[%c0, %c0_1] : memref<512x12xbf16, #tpu.memory_space<vmem>>, vector<512x12xbf16>
    %c0_2 = arith.constant 0 : index
    %c0_3 = arith.constant 0 : index
    %4 = vector.load %arg3[%c0_2, %c0_3] : memref<12x16xbf16, #tpu.memory_space<vmem>>, vector<12x16xbf16>
    %cst = arith.constant dense<0.000000e+00> : vector<512x16xf32>
    %5 = tpu.matmul %3, %4, %cst {dimension_numbers = #tpu.dot_dimension_numbers<[1], [0], [0], [1], [0, 0, 1, 1], [], []>} : vector<512x12xbf16>, vector<12x16xbf16>, vector<512x16xf32> -> vector<512x16xf32>
    %c0_4 = arith.constant 0 : index
    %c0_5 = arith.constant 0 : index
    %6 = vector.load %arg4[%c0_4, %c0_5] : memref<1x16xf32, #tpu.memory_space<vmem>>, vector<1x16xf32>
    %7 = vector.broadcast %6 : vector<1x16xf32> to vector<512x16xf32>
    %8 = arith.addf %5, %7 : vector<512x16xf32>
    %9 = arith.truncf %8 : vector<512x16xf32> to vector<512x16xbf16>
    %c0_6 = arith.constant 0 : index
    %c0_7 = arith.constant 0 : index
    %10 = vector.load %arg5[%c0_6, %c0_7] : memref<512x16xbf16, #tpu.memory_space<vmem>>, vector<512x16xbf16>
    tpu.vector_store %arg5[%c0_6, %c0_7], %9 {strides = array<i32>} : memref<512x16xbf16, #tpu.memory_space<vmem>>, vector<512x16xbf16>,
    %c0_8 = arith.constant 0 : index
    %c0_9 = arith.constant 0 : index
    %c0_10 = arith.constant 0 : index
    %11 = vector.load %arg6[%c0_8, %c0_9, %c0_10] : memref<1x2x16xf32, #tpu.memory_space<vmem>>, vector<1x1x16xf32>
    %12 = vector.shape_cast %11 : vector<1x1x16xf32> to vector<1x16xf32>
    %cst_11 = arith.constant dense<0.000000e+00> : vector<16xf32>
    %13 = vector.multi_reduction <add>, %8, %cst_11 [0] : vector<512x16xf32> to vector<16xf32>
    %14 = vector.shape_cast %13 : vector<16xf32> to vector<1x16xf32>
    %15 = arith.addf %12, %14 : vector<1x16xf32>
    %c0_12 = arith.constant 0 : index
    %c0_13 = arith.constant 0 : index
    %c0_14 = arith.constant 0 : index
    %16 = vector.load %arg6[%c0_12, %c0_13, %c0_14] : memref<1x2x16xf32, #tpu.memory_space<vmem>>, vector<1x1x16xf32>
    %17 = vector.shape_cast %16 : vector<1x1x16xf32> to vector<1x16xf32>
    %18 = vector.shape_cast %15 : vector<1x16xf32> to vector<1x1x16xf32>
    tpu.vector_store %arg6[%c0_12, %c0_13, %c0_14], %18 {strides = array<i32>} : memref<1x2x16xf32, #tpu.memory_space<vmem>>, vector<1x1x16xf32>,
    %c0_15 = arith.constant 0 : index
    %c1 = arith.constant 1 : index
    %c0_16 = arith.constant 0 : index
    %19 = vector.load %arg6[%c0_15, %c1, %c0_16] : memref<1x2x16xf32, #tpu.memory_space<vmem>>, vector<1x1x16xf32>
    %20 = vector.shape_cast %19 : vector<1x1x16xf32> to vector<1x16xf32>
    %21 = arith.mulf %8, %8 : vector<512x16xf32>
    %cst_17 = arith.constant dense<0.000000e+00> : vector<16xf32>
    %22 = vector.multi_reduction <add>, %21, %cst_17 [0] : vector<512x16xf32> to vector<16xf32>
    %23 = vector.shape_cast %22 : vector<16xf32> to vector<1x16xf32>
    %24 = arith.addf %20, %23 : vector<1x16xf32>
    %c0_18 = arith.constant 0 : index
    %c1_19 = arith.constant 1 : index
    %c0_20 = arith.constant 0 : index
    %25 = vector.load %arg6[%c0_18, %c1_19, %c0_20] : memref<1x2x16xf32, #tpu.memory_space<vmem>>, vector<1x1x16xf32>
    %26 = vector.shape_cast %25 : vector<1x1x16xf32> to vector<1x16xf32>
    %27 = vector.shape_cast %24 : vector<1x16xf32> to vector<1x1x16xf32>
    tpu.vector_store %arg6[%c0_18, %c1_19, %c0_20], %27 {strides = array<i32>} : memref<1x2x16xf32, #tpu.memory_space<vmem>>, vector<1x1x16xf32>,
    return
  }
  func.func @transform_0(%arg0: i32, %arg1: i32) -> (i32, i32) {
    %c2_i32 = arith.constant 2 : i32
    %0 = arith.muli %arg0, %c2_i32 : i32
    %1 = arith.addi %0, %arg1 : i32
    %c0_i32 = arith.constant 0 : i32
    %c0_i32_0 = arith.constant 0 : i32
    return %1, %c0_i32 : i32, i32
  }
  func.func @transform_1(%arg0: i32, %arg1: i32) -> (i32, i32) {
    %c0_i32 = arith.constant 0 : i32
    %c0_i32_0 = arith.constant 0 : i32
    %c0_i32_1 = arith.constant 0 : i32
    return %c0_i32, %c0_i32_0 : i32, i32
  }
  func.func @transform_2(%arg0: i32, %arg1: i32) -> (i32, i32) {
    %c0_i32 = arith.constant 0 : i32
    %c0_i32_0 = arith.constant 0 : i32
    %c0_i32_1 = arith.constant 0 : i32
    return %c0_i32, %c0_i32_0 : i32, i32
  }
  func.func @transform_3(%arg0: i32, %arg1: i32) -> (i32, i32) {
    %c2_i32 = arith.constant 2 : i32
    %0 = arith.muli %arg0, %c2_i32 : i32
    %1 = arith.addi %0, %arg1 : i32
    %c0_i32 = arith.constant 0 : i32
    %c0_i32_0 = arith.constant 0 : i32
    return %1, %c0_i32 : i32, i32
  }
  func.func @transform_4(%arg0: i32, %arg1: i32) -> (i32, i32, i32) {
    %c0_i32 = arith.constant 0 : i32
    %c0_i32_0 = arith.constant 0 : i32
    %c0_i32_1 = arith.constant 0 : i32
    return %arg0, %c0_i32, %c0_i32_0 : i32, i32, i32
  }
}

module attributes {stable_mosaic.version = 11 : i64} {
  func.func @_stage2_kernel(%arg0: i32, %arg1: i32, %arg2: memref<1x16x16x16xbf16, #tpu.memory_space<vmem>>, %arg3: memref<1x16xf32, #tpu.memory_space<vmem>>, %arg4: memref<1x16xf32, #tpu.memory_space<vmem>>, %arg5: memref<9x16x32xbf16, #tpu.memory_space<vmem>>, %arg6: memref<1x32xf32, #tpu.memory_space<vmem>>, %arg7: memref<1x16x16x32xbf16, #tpu.memory_space<vmem>>, %arg8: memref<1x2x32xf32, #tpu.memory_space<vmem>>, %arg9: memref<18x18x16xf32, #tpu.memory_space<vmem>>) attributes {dimension_semantics = [#tpu.dimension_semantics<parallel>, #tpu.dimension_semantics<arbitrary>], iteration_bounds = array<i64: 2, 4>, scalar_prefetch = 0 : i64, scratch_operands = 1 : i64, tpu.core_type = #tpu.core_type<tc>, window_params = [{transform_indices = @transform_0, window_bounds = array<i64: 1, 16, 16, 16>}, {pipeline_mode = #tpu.pipeline_mode<synchronous>, transform_indices = @transform_1, window_bounds = array<i64: 1, 16>}, {pipeline_mode = #tpu.pipeline_mode<synchronous>, transform_indices = @transform_2, window_bounds = array<i64: 1, 16>}, {pipeline_mode = #tpu.pipeline_mode<synchronous>, transform_indices = @transform_3, window_bounds = array<i64: 9, 16, 32>}, {pipeline_mode = #tpu.pipeline_mode<synchronous>, transform_indices = @transform_4, window_bounds = array<i64: 1, 32>}, {transform_indices = @transform_5, window_bounds = array<i64: 1, 16, 16, 32>}, {transform_indices = @transform_6, window_bounds = array<i64: 1, 2, 32>}]} {
    %c0_i32 = arith.constant 0 : i32
    %0 = arith.cmpi eq, %arg1, %c0_i32 : i32
    %1 = arith.extui %0 : i1 to i32
    %c0_i32_0 = arith.constant 0 : i32
    %2 = arith.cmpi ne, %1, %c0_i32_0 : i32
    scf.if %2 {
      %cst_85 = arith.constant 0.000000e+00 : f32
      %115 = vector.broadcast %cst_85 : f32 to vector<2x32xf32>
      %c0_86 = arith.constant 0 : index
      %c0_87 = arith.constant 0 : index
      %c0_88 = arith.constant 0 : index
      %116 = vector.load %arg8[%c0_86, %c0_87, %c0_88] : memref<1x2x32xf32, #tpu.memory_space<vmem>>, vector<1x2x32xf32>
      %117 = vector.shape_cast %116 : vector<1x2x32xf32> to vector<2x32xf32>
      %118 = vector.shape_cast %115 : vector<2x32xf32> to vector<1x2x32xf32>
      tpu.vector_store %arg8[%c0_86, %c0_87, %c0_88], %118 {strides = array<i32>} : memref<1x2x32xf32, #tpu.memory_space<vmem>>, vector<1x2x32xf32>,
    } else {
    }
    %c0 = arith.constant 0 : index
    %c0_1 = arith.constant 0 : index
    %3 = vector.load %arg3[%c0, %c0_1] : memref<1x16xf32, #tpu.memory_space<vmem>>, vector<1x16xf32>
    %4 = vector.shape_cast %3 : vector<1x16xf32> to vector<1x1x16xf32>
    %c0_2 = arith.constant 0 : index
    %c0_3 = arith.constant 0 : index
    %5 = vector.load %arg4[%c0_2, %c0_3] : memref<1x16xf32, #tpu.memory_space<vmem>>, vector<1x16xf32>
    %6 = vector.shape_cast %5 : vector<1x16xf32> to vector<1x1x16xf32>
    %c0_4 = arith.constant 0 : index
    %c0_5 = arith.constant 0 : index
    %c0_6 = arith.constant 0 : index
    %c0_7 = arith.constant 0 : index
    %7 = vector.load %arg2[%c0_4, %c0_5, %c0_6, %c0_7] : memref<1x16x16x16xbf16, #tpu.memory_space<vmem>>, vector<1x16x16x16xbf16>
    %8 = vector.shape_cast %7 : vector<1x16x16x16xbf16> to vector<16x16x16xbf16>
    %9 = arith.extf %8 : vector<16x16x16xbf16> to vector<16x16x16xf32>
    %10 = vector.broadcast %4 : vector<1x1x16xf32> to vector<16x16x16xf32>
    %11 = arith.mulf %9, %10 : vector<16x16x16xf32>
    %12 = vector.broadcast %6 : vector<1x1x16xf32> to vector<16x16x16xf32>
    %13 = arith.addf %11, %12 : vector<16x16x16xf32>
    %cst = arith.constant 5.000000e-01 : f32
    %14 = vector.broadcast %cst : f32 to vector<16x16x16xf32>
    %15 = arith.mulf %14, %13 : vector<16x16x16xf32>
    %cst_8 = arith.constant 0.707106769 : f32
    %16 = vector.broadcast %cst_8 : f32 to vector<16x16x16xf32>
    %17 = arith.mulf %13, %16 : vector<16x16x16xf32>
    %18 = math.erf %17 : vector<16x16x16xf32>
    %cst_9 = arith.constant 1.000000e+00 : f32
    %19 = vector.broadcast %cst_9 : f32 to vector<16x16x16xf32>
    %20 = arith.addf %19, %18 : vector<16x16x16xf32>
    %21 = arith.mulf %15, %20 : vector<16x16x16xf32>
    %cst_10 = arith.constant 0.000000e+00 : f32
    %22 = vector.broadcast %cst_10 : f32 to vector<1x18x16xf32>
    %c0_11 = arith.constant 0 : index
    %c0_12 = arith.constant 0 : index
    %c0_13 = arith.constant 0 : index
    %23 = vector.load %arg9[%c0_11, %c0_12, %c0_13] : memref<18x18x16xf32, #tpu.memory_space<vmem>>, vector<1x18x16xf32>
    tpu.vector_store %arg9[%c0_11, %c0_12, %c0_13], %22 {strides = array<i32>} : memref<18x18x16xf32, #tpu.memory_space<vmem>>, vector<1x18x16xf32>,
    %cst_14 = arith.constant 0.000000e+00 : f32
    %24 = vector.broadcast %cst_14 : f32 to vector<1x18x16xf32>
    %c17 = arith.constant 17 : index
    %c0_15 = arith.constant 0 : index
    %c0_16 = arith.constant 0 : index
    %25 = vector.load %arg9[%c17, %c0_15, %c0_16] : memref<18x18x16xf32, #tpu.memory_space<vmem>>, vector<1x18x16xf32>
    tpu.vector_store %arg9[%c17, %c0_15, %c0_16], %24 {strides = array<i32>} : memref<18x18x16xf32, #tpu.memory_space<vmem>>, vector<1x18x16xf32>,
    %cst_17 = arith.constant 0.000000e+00 : f32
    %26 = vector.broadcast %cst_17 : f32 to vector<18x1x16xf32>
    %c0_18 = arith.constant 0 : index
    %c0_19 = arith.constant 0 : index
    %c0_20 = arith.constant 0 : index
    %27 = vector.load %arg9[%c0_18, %c0_19, %c0_20] : memref<18x18x16xf32, #tpu.memory_space<vmem>>, vector<18x1x16xf32>
    tpu.vector_store %arg9[%c0_18, %c0_19, %c0_20], %26 {strides = array<i32>} : memref<18x18x16xf32, #tpu.memory_space<vmem>>, vector<18x1x16xf32>,
    %cst_21 = arith.constant 0.000000e+00 : f32
    %28 = vector.broadcast %cst_21 : f32 to vector<18x1x16xf32>
    %c0_22 = arith.constant 0 : index
    %c17_23 = arith.constant 17 : index
    %c0_24 = arith.constant 0 : index
    %29 = vector.load %arg9[%c0_22, %c17_23, %c0_24] : memref<18x18x16xf32, #tpu.memory_space<vmem>>, vector<18x1x16xf32>
    tpu.vector_store %arg9[%c0_22, %c17_23, %c0_24], %28 {strides = array<i32>} : memref<18x18x16xf32, #tpu.memory_space<vmem>>, vector<18x1x16xf32>,
    %c1 = arith.constant 1 : index
    %c1_25 = arith.constant 1 : index
    %c0_26 = arith.constant 0 : index
    %30 = vector.load %arg9[%c1, %c1_25, %c0_26] : memref<18x18x16xf32, #tpu.memory_space<vmem>>, vector<16x16x16xf32>
    tpu.vector_store %arg9[%c1, %c1_25, %c0_26], %21 {strides = array<i32>} : memref<18x18x16xf32, #tpu.memory_space<vmem>>, vector<16x16x16xf32>,
    %c0_27 = arith.constant 0 : index
    %c0_28 = arith.constant 0 : index
    %c0_29 = arith.constant 0 : index
    %31 = vector.load %arg9[%c0_27, %c0_28, %c0_29] : memref<18x18x16xf32, #tpu.memory_space<vmem>>, vector<18x16x16xf32>
    %32 = vector.shape_cast %31 : vector<18x16x16xf32> to vector<288x16xf32>
    %33 = vector.extract_strided_slice %32 {offsets = [0, 0], sizes = [256, 16], strides = [1, 1]} : vector<288x16xf32> to vector<256x16xf32>
    %34 = arith.truncf %33 : vector<256x16xf32> to vector<256x16xbf16>
    %c0_30 = arith.constant 0 : index
    %c0_31 = arith.constant 0 : index
    %c0_32 = arith.constant 0 : index
    %35 = vector.load %arg5[%c0_30, %c0_31, %c0_32] : memref<9x16x32xbf16, #tpu.memory_space<vmem>>, vector<1x16x32xbf16>
    %36 = vector.shape_cast %35 : vector<1x16x32xbf16> to vector<16x32xbf16>
    %cst_33 = arith.constant dense<0.000000e+00> : vector<256x32xf32>
    %37 = tpu.matmul %34, %36, %cst_33 {dimension_numbers = #tpu.dot_dimension_numbers<[1], [0], [0], [1], [0, 0, 1, 1], [], []>} : vector<256x16xbf16>, vector<16x32xbf16>, vector<256x32xf32> -> vector<256x32xf32>
    %38 = vector.extract_strided_slice %32 {offsets = [16, 0], sizes = [256, 16], strides = [1, 1]} : vector<288x16xf32> to vector<256x16xf32>
    %39 = arith.truncf %38 : vector<256x16xf32> to vector<256x16xbf16>
    %c3 = arith.constant 3 : index
    %c0_34 = arith.constant 0 : index
    %c0_35 = arith.constant 0 : index
    %40 = vector.load %arg5[%c3, %c0_34, %c0_35] : memref<9x16x32xbf16, #tpu.memory_space<vmem>>, vector<1x16x32xbf16>
    %41 = vector.shape_cast %40 : vector<1x16x32xbf16> to vector<16x32xbf16>
    %cst_36 = arith.constant dense<0.000000e+00> : vector<256x32xf32>
    %42 = tpu.matmul %39, %41, %cst_36 {dimension_numbers = #tpu.dot_dimension_numbers<[1], [0], [0], [1], [0, 0, 1, 1], [], []>} : vector<256x16xbf16>, vector<16x32xbf16>, vector<256x32xf32> -> vector<256x32xf32>
    %43 = arith.addf %37, %42 : vector<256x32xf32>
    %44 = vector.extract_strided_slice %32 {offsets = [32, 0], sizes = [256, 16], strides = [1, 1]} : vector<288x16xf32> to vector<256x16xf32>
    %45 = arith.truncf %44 : vector<256x16xf32> to vector<256x16xbf16>
    %c6 = arith.constant 6 : index
    %c0_37 = arith.constant 0 : index
    %c0_38 = arith.constant 0 : index
    %46 = vector.load %arg5[%c6, %c0_37, %c0_38] : memref<9x16x32xbf16, #tpu.memory_space<vmem>>, vector<1x16x32xbf16>
    %47 = vector.shape_cast %46 : vector<1x16x32xbf16> to vector<16x32xbf16>
    %cst_39 = arith.constant dense<0.000000e+00> : vector<256x32xf32>
    %48 = tpu.matmul %45, %47, %cst_39 {dimension_numbers = #tpu.dot_dimension_numbers<[1], [0], [0], [1], [0, 0, 1, 1], [], []>} : vector<256x16xbf16>, vector<16x32xbf16>, vector<256x32xf32> -> vector<256x32xf32>
    %49 = arith.addf %43, %48 : vector<256x32xf32>
    %c0_40 = arith.constant 0 : index
    %c1_41 = arith.constant 1 : index
    %c0_42 = arith.constant 0 : index
    %50 = vector.load %arg9[%c0_40, %c1_41, %c0_42] : memref<18x18x16xf32, #tpu.memory_space<vmem>>, vector<18x16x16xf32>
    %51 = vector.shape_cast %50 : vector<18x16x16xf32> to vector<288x16xf32>
    %52 = vector.extract_strided_slice %51 {offsets = [0, 0], sizes = [256, 16], strides = [1, 1]} : vector<288x16xf32> to vector<256x16xf32>
    %53 = arith.truncf %52 : vector<256x16xf32> to vector<256x16xbf16>
    %c1_43 = arith.constant 1 : index
    %c0_44 = arith.constant 0 : index
    %c0_45 = arith.constant 0 : index
    %54 = vector.load %arg5[%c1_43, %c0_44, %c0_45] : memref<9x16x32xbf16, #tpu.memory_space<vmem>>, vector<1x16x32xbf16>
    %55 = vector.shape_cast %54 : vector<1x16x32xbf16> to vector<16x32xbf16>
    %cst_46 = arith.constant dense<0.000000e+00> : vector<256x32xf32>
    %56 = tpu.matmul %53, %55, %cst_46 {dimension_numbers = #tpu.dot_dimension_numbers<[1], [0], [0], [1], [0, 0, 1, 1], [], []>} : vector<256x16xbf16>, vector<16x32xbf16>, vector<256x32xf32> -> vector<256x32xf32>
    %57 = arith.addf %49, %56 : vector<256x32xf32>
    %58 = vector.extract_strided_slice %51 {offsets = [16, 0], sizes = [256, 16], strides = [1, 1]} : vector<288x16xf32> to vector<256x16xf32>
    %59 = arith.truncf %58 : vector<256x16xf32> to vector<256x16xbf16>
    %c4 = arith.constant 4 : index
    %c0_47 = arith.constant 0 : index
    %c0_48 = arith.constant 0 : index
    %60 = vector.load %arg5[%c4, %c0_47, %c0_48] : memref<9x16x32xbf16, #tpu.memory_space<vmem>>, vector<1x16x32xbf16>
    %61 = vector.shape_cast %60 : vector<1x16x32xbf16> to vector<16x32xbf16>
    %cst_49 = arith.constant dense<0.000000e+00> : vector<256x32xf32>
    %62 = tpu.matmul %59, %61, %cst_49 {dimension_numbers = #tpu.dot_dimension_numbers<[1], [0], [0], [1], [0, 0, 1, 1], [], []>} : vector<256x16xbf16>, vector<16x32xbf16>, vector<256x32xf32> -> vector<256x32xf32>
    %63 = arith.addf %57, %62 : vector<256x32xf32>
    %64 = vector.extract_strided_slice %51 {offsets = [32, 0], sizes = [256, 16], strides = [1, 1]} : vector<288x16xf32> to vector<256x16xf32>
    %65 = arith.truncf %64 : vector<256x16xf32> to vector<256x16xbf16>
    %c7 = arith.constant 7 : index
    %c0_50 = arith.constant 0 : index
    %c0_51 = arith.constant 0 : index
    %66 = vector.load %arg5[%c7, %c0_50, %c0_51] : memref<9x16x32xbf16, #tpu.memory_space<vmem>>, vector<1x16x32xbf16>
    %67 = vector.shape_cast %66 : vector<1x16x32xbf16> to vector<16x32xbf16>
    %cst_52 = arith.constant dense<0.000000e+00> : vector<256x32xf32>
    %68 = tpu.matmul %65, %67, %cst_52 {dimension_numbers = #tpu.dot_dimension_numbers<[1], [0], [0], [1], [0, 0, 1, 1], [], []>} : vector<256x16xbf16>, vector<16x32xbf16>, vector<256x32xf32> -> vector<256x32xf32>
    %69 = arith.addf %63, %68 : vector<256x32xf32>
    %c0_53 = arith.constant 0 : index
    %c2 = arith.constant 2 : index
    %c0_54 = arith.constant 0 : index
    %70 = vector.load %arg9[%c0_53, %c2, %c0_54] : memref<18x18x16xf32, #tpu.memory_space<vmem>>, vector<18x16x16xf32>
    %71 = vector.shape_cast %70 : vector<18x16x16xf32> to vector<288x16xf32>
    %72 = vector.extract_strided_slice %71 {offsets = [0, 0], sizes = [256, 16], strides = [1, 1]} : vector<288x16xf32> to vector<256x16xf32>
    %73 = arith.truncf %72 : vector<256x16xf32> to vector<256x16xbf16>
    %c2_55 = arith.constant 2 : index
    %c0_56 = arith.constant 0 : index
    %c0_57 = arith.constant 0 : index
    %74 = vector.load %arg5[%c2_55, %c0_56, %c0_57] : memref<9x16x32xbf16, #tpu.memory_space<vmem>>, vector<1x16x32xbf16>
    %75 = vector.shape_cast %74 : vector<1x16x32xbf16> to vector<16x32xbf16>
    %cst_58 = arith.constant dense<0.000000e+00> : vector<256x32xf32>
    %76 = tpu.matmul %73, %75, %cst_58 {dimension_numbers = #tpu.dot_dimension_numbers<[1], [0], [0], [1], [0, 0, 1, 1], [], []>} : vector<256x16xbf16>, vector<16x32xbf16>, vector<256x32xf32> -> vector<256x32xf32>
    %77 = arith.addf %69, %76 : vector<256x32xf32>
    %78 = vector.extract_strided_slice %71 {offsets = [16, 0], sizes = [256, 16], strides = [1, 1]} : vector<288x16xf32> to vector<256x16xf32>
    %79 = arith.truncf %78 : vector<256x16xf32> to vector<256x16xbf16>
    %c5 = arith.constant 5 : index
    %c0_59 = arith.constant 0 : index
    %c0_60 = arith.constant 0 : index
    %80 = vector.load %arg5[%c5, %c0_59, %c0_60] : memref<9x16x32xbf16, #tpu.memory_space<vmem>>, vector<1x16x32xbf16>
    %81 = vector.shape_cast %80 : vector<1x16x32xbf16> to vector<16x32xbf16>
    %cst_61 = arith.constant dense<0.000000e+00> : vector<256x32xf32>
    %82 = tpu.matmul %79, %81, %cst_61 {dimension_numbers = #tpu.dot_dimension_numbers<[1], [0], [0], [1], [0, 0, 1, 1], [], []>} : vector<256x16xbf16>, vector<16x32xbf16>, vector<256x32xf32> -> vector<256x32xf32>
    %83 = arith.addf %77, %82 : vector<256x32xf32>
    %84 = vector.extract_strided_slice %71 {offsets = [32, 0], sizes = [256, 16], strides = [1, 1]} : vector<288x16xf32> to vector<256x16xf32>
    %85 = arith.truncf %84 : vector<256x16xf32> to vector<256x16xbf16>
    %c8 = arith.constant 8 : index
    %c0_62 = arith.constant 0 : index
    %c0_63 = arith.constant 0 : index
    %86 = vector.load %arg5[%c8, %c0_62, %c0_63] : memref<9x16x32xbf16, #tpu.memory_space<vmem>>, vector<1x16x32xbf16>
    %87 = vector.shape_cast %86 : vector<1x16x32xbf16> to vector<16x32xbf16>
    %cst_64 = arith.constant dense<0.000000e+00> : vector<256x32xf32>
    %88 = tpu.matmul %85, %87, %cst_64 {dimension_numbers = #tpu.dot_dimension_numbers<[1], [0], [0], [1], [0, 0, 1, 1], [], []>} : vector<256x16xbf16>, vector<16x32xbf16>, vector<256x32xf32> -> vector<256x32xf32>
    %89 = arith.addf %83, %88 : vector<256x32xf32>
    %c0_65 = arith.constant 0 : index
    %c0_66 = arith.constant 0 : index
    %90 = vector.load %arg6[%c0_65, %c0_66] : memref<1x32xf32, #tpu.memory_space<vmem>>, vector<1x32xf32>
    %91 = vector.broadcast %90 : vector<1x32xf32> to vector<256x32xf32>
    %92 = arith.addf %89, %91 : vector<256x32xf32>
    %93 = vector.shape_cast %92 : vector<256x32xf32> to vector<16x16x32xf32>
    %94 = arith.truncf %93 : vector<16x16x32xf32> to vector<16x16x32xbf16>
    %c0_67 = arith.constant 0 : index
    %c0_68 = arith.constant 0 : index
    %c0_69 = arith.constant 0 : index
    %c0_70 = arith.constant 0 : index
    %95 = vector.load %arg7[%c0_67, %c0_68, %c0_69, %c0_70] : memref<1x16x16x32xbf16, #tpu.memory_space<vmem>>, vector<1x16x16x32xbf16>
    %96 = vector.shape_cast %95 : vector<1x16x16x32xbf16> to vector<16x16x32xbf16>
    %97 = vector.shape_cast %94 : vector<16x16x32xbf16> to vector<1x16x16x32xbf16>
    tpu.vector_store %arg7[%c0_67, %c0_68, %c0_69, %c0_70], %97 {strides = array<i32>} : memref<1x16x16x32xbf16, #tpu.memory_space<vmem>>, vector<1x16x16x32xbf16>,
    %c0_71 = arith.constant 0 : index
    %c0_72 = arith.constant 0 : index
    %c0_73 = arith.constant 0 : index
    %98 = vector.load %arg8[%c0_71, %c0_72, %c0_73] : memref<1x2x32xf32, #tpu.memory_space<vmem>>, vector<1x1x32xf32>
    %99 = vector.shape_cast %98 : vector<1x1x32xf32> to vector<1x32xf32>
    %cst_74 = arith.constant dense<0.000000e+00> : vector<32xf32>
    %100 = vector.multi_reduction <add>, %92, %cst_74 [0] : vector<256x32xf32> to vector<32xf32>
    %101 = vector.shape_cast %100 : vector<32xf32> to vector<1x32xf32>
    %102 = arith.addf %99, %101 : vector<1x32xf32>
    %c0_75 = arith.constant 0 : index
    %c0_76 = arith.constant 0 : index
    %c0_77 = arith.constant 0 : index
    %103 = vector.load %arg8[%c0_75, %c0_76, %c0_77] : memref<1x2x32xf32, #tpu.memory_space<vmem>>, vector<1x1x32xf32>
    %104 = vector.shape_cast %103 : vector<1x1x32xf32> to vector<1x32xf32>
    %105 = vector.shape_cast %102 : vector<1x32xf32> to vector<1x1x32xf32>
    tpu.vector_store %arg8[%c0_75, %c0_76, %c0_77], %105 {strides = array<i32>} : memref<1x2x32xf32, #tpu.memory_space<vmem>>, vector<1x1x32xf32>,
    %c0_78 = arith.constant 0 : index
    %c1_79 = arith.constant 1 : index
    %c0_80 = arith.constant 0 : index
    %106 = vector.load %arg8[%c0_78, %c1_79, %c0_80] : memref<1x2x32xf32, #tpu.memory_space<vmem>>, vector<1x1x32xf32>
    %107 = vector.shape_cast %106 : vector<1x1x32xf32> to vector<1x32xf32>
    %108 = arith.mulf %92, %92 : vector<256x32xf32>
    %cst_81 = arith.constant dense<0.000000e+00> : vector<32xf32>
    %109 = vector.multi_reduction <add>, %108, %cst_81 [0] : vector<256x32xf32> to vector<32xf32>
    %110 = vector.shape_cast %109 : vector<32xf32> to vector<1x32xf32>
    %111 = arith.addf %107, %110 : vector<1x32xf32>
    %c0_82 = arith.constant 0 : index
    %c1_83 = arith.constant 1 : index
    %c0_84 = arith.constant 0 : index
    %112 = vector.load %arg8[%c0_82, %c1_83, %c0_84] : memref<1x2x32xf32, #tpu.memory_space<vmem>>, vector<1x1x32xf32>
    %113 = vector.shape_cast %112 : vector<1x1x32xf32> to vector<1x32xf32>
    %114 = vector.shape_cast %111 : vector<1x32xf32> to vector<1x1x32xf32>
    tpu.vector_store %arg8[%c0_82, %c1_83, %c0_84], %114 {strides = array<i32>} : memref<1x2x32xf32, #tpu.memory_space<vmem>>, vector<1x1x32xf32>,
    return
  }
  func.func @transform_0(%arg0: i32, %arg1: i32) -> (i32, i32, i32, i32) {
    %c4_i32 = arith.constant 4 : i32
    %0 = arith.muli %arg0, %c4_i32 : i32
    %1 = arith.addi %0, %arg1 : i32
    %c0_i32 = arith.constant 0 : i32
    %c0_i32_0 = arith.constant 0 : i32
    %c0_i32_1 = arith.constant 0 : i32
    %c0_i32_2 = arith.constant 0 : i32
    return %1, %c0_i32, %c0_i32_0, %c0_i32_1 : i32, i32, i32, i32
  }
  func.func @transform_1(%arg0: i32, %arg1: i32) -> (i32, i32) {
    %c0_i32 = arith.constant 0 : i32
    %c0_i32_0 = arith.constant 0 : i32
    %c0_i32_1 = arith.constant 0 : i32
    return %c0_i32, %c0_i32_0 : i32, i32
  }
  func.func @transform_2(%arg0: i32, %arg1: i32) -> (i32, i32) {
    %c0_i32 = arith.constant 0 : i32
    %c0_i32_0 = arith.constant 0 : i32
    %c0_i32_1 = arith.constant 0 : i32
    return %c0_i32, %c0_i32_0 : i32, i32
  }
  func.func @transform_3(%arg0: i32, %arg1: i32) -> (i32, i32, i32) {
    %c0_i32 = arith.constant 0 : i32
    %c0_i32_0 = arith.constant 0 : i32
    %c0_i32_1 = arith.constant 0 : i32
    %c0_i32_2 = arith.constant 0 : i32
    return %c0_i32, %c0_i32_0, %c0_i32_1 : i32, i32, i32
  }
  func.func @transform_4(%arg0: i32, %arg1: i32) -> (i32, i32) {
    %c0_i32 = arith.constant 0 : i32
    %c0_i32_0 = arith.constant 0 : i32
    %c0_i32_1 = arith.constant 0 : i32
    return %c0_i32, %c0_i32_0 : i32, i32
  }
  func.func @transform_5(%arg0: i32, %arg1: i32) -> (i32, i32, i32, i32) {
    %c4_i32 = arith.constant 4 : i32
    %0 = arith.muli %arg0, %c4_i32 : i32
    %1 = arith.addi %0, %arg1 : i32
    %c0_i32 = arith.constant 0 : i32
    %c0_i32_0 = arith.constant 0 : i32
    %c0_i32_1 = arith.constant 0 : i32
    %c0_i32_2 = arith.constant 0 : i32
    return %1, %c0_i32, %c0_i32_0, %c0_i32_1 : i32, i32, i32, i32
  }
  func.func @transform_6(%arg0: i32, %arg1: i32) -> (i32, i32, i32) {
    %c0_i32 = arith.constant 0 : i32
    %c0_i32_0 = arith.constant 0 : i32
    %c0_i32_1 = arith.constant 0 : i32
    return %arg0, %c0_i32, %c0_i32_0 : i32, i32, i32
  }
}

module attributes {stable_mosaic.version = 11 : i64} {
  func.func @_stage3_kernel(%arg0: i32, %arg1: memref<128x32xbf16, #tpu.memory_space<vmem>>, %arg2: memref<1x32xf32, #tpu.memory_space<vmem>>, %arg3: memref<1x32xf32, #tpu.memory_space<vmem>>, %arg4: memref<128x32xf32, #tpu.memory_space<vmem>>) attributes {dimension_semantics = [#tpu.dimension_semantics<parallel>], iteration_bounds = array<i64: 16>, scalar_prefetch = 0 : i64, scratch_operands = 0 : i64, tpu.core_type = #tpu.core_type<tc>, window_params = [{transform_indices = @transform_0, window_bounds = array<i64: 128, 32>}, {pipeline_mode = #tpu.pipeline_mode<synchronous>, transform_indices = @transform_1, window_bounds = array<i64: 1, 32>}, {pipeline_mode = #tpu.pipeline_mode<synchronous>, transform_indices = @transform_2, window_bounds = array<i64: 1, 32>}, {transform_indices = @transform_3, window_bounds = array<i64: 128, 32>}]} {
    %c0 = arith.constant 0 : index
    %c0_0 = arith.constant 0 : index
    %0 = vector.load %arg1[%c0, %c0_0] : memref<128x32xbf16, #tpu.memory_space<vmem>>, vector<128x32xbf16>
    %1 = arith.extf %0 : vector<128x32xbf16> to vector<128x32xf32>
    %c0_1 = arith.constant 0 : index
    %c0_2 = arith.constant 0 : index
    %2 = vector.load %arg2[%c0_1, %c0_2] : memref<1x32xf32, #tpu.memory_space<vmem>>, vector<1x32xf32>
    %3 = vector.broadcast %2 : vector<1x32xf32> to vector<128x32xf32>
    %4 = arith.mulf %1, %3 : vector<128x32xf32>
    %c0_3 = arith.constant 0 : index
    %c0_4 = arith.constant 0 : index
    %5 = vector.load %arg3[%c0_3, %c0_4] : memref<1x32xf32, #tpu.memory_space<vmem>>, vector<1x32xf32>
    %6 = vector.broadcast %5 : vector<1x32xf32> to vector<128x32xf32>
    %7 = arith.addf %4, %6 : vector<128x32xf32>
    %c0_5 = arith.constant 0 : index
    %c0_6 = arith.constant 0 : index
    %8 = vector.load %arg4[%c0_5, %c0_6] : memref<128x32xf32, #tpu.memory_space<vmem>>, vector<128x32xf32>
    tpu.vector_store %arg4[%c0_5, %c0_6], %7 {strides = array<i32>} : memref<128x32xf32, #tpu.memory_space<vmem>>, vector<128x32xf32>,
    return
  }
  func.func @transform_0(%arg0: i32) -> (i32, i32) {
    %c0_i32 = arith.constant 0 : i32
    %c0_i32_0 = arith.constant 0 : i32
    return %arg0, %c0_i32 : i32, i32
  }
  func.func @transform_1(%arg0: i32) -> (i32, i32) {
    %c0_i32 = arith.constant 0 : i32
    %c0_i32_0 = arith.constant 0 : i32
    %c0_i32_1 = arith.constant 0 : i32
    return %c0_i32, %c0_i32_0 : i32, i32
  }
  func.func @transform_2(%arg0: i32) -> (i32, i32) {
    %c0_i32 = arith.constant 0 : i32
    %c0_i32_0 = arith.constant 0 : i32
    %c0_i32_1 = arith.constant 0 : i32
    return %c0_i32, %c0_i32_0 : i32, i32
  }
  func.func @transform_3(%arg0: i32) -> (i32, i32) {
    %c0_i32 = arith.constant 0 : i32
    %c0_i32_0 = arith.constant 0 : i32
    return %arg0, %c0_i32 : i32, i32
  }
}

</mosaic_0001>

<bundles_post_ra>
// kernel: patch_embed_forward.3
= control target key start
LH: loop header
LB: loop body
LE: loop exit
PB: predicated region body
PF: predicated region fallthrough
CT: control target
= control target key end

     0   :  { %s1659_s15 = smov 0   ;;  %s1661_s16 = smov 0   ;;  %s2517_s0 = inlined_call_operand.vmem [shape: bf16[2048,12], index: 0, kind: input, shape index: {}]   ;;  %s2518_s1 = inlined_call_operand.vmem [shape: bf16[12,16], index: 1, kind: input, shape index: {}]   ;;  %s2519_s2 = inlined_call_operand.vmem [shape: f32[1,16], index: 2, kind: input, shape index: {}]   ;;  %s2520_s3 = inlined_call_operand.vmem [shape: bf16[2048,16], index: 3, kind: output, shape index: {0}]   ;;  %s2521_s4 = inlined_call_operand.vmem [shape: f32[2,2,16], index: 4, kind: output, shape index: {1}]  }
   0x1   :  { %s1663_s17 = smov 0   ;;  %s1665_s18 = smov 0  }
   0x2   :  { %s1667_s19 = smov 0  }
   0x3 LB: > { %s24_s20 = sadd.s32 1, %s1623_s17  ;;  %s27_s21 = sadd.s32 1, %s1627_s18  ;;  %s1631_s19 = sphi %s1667_s19, %s15_s19   ;;  %s1627_s18 = sphi %s1665_s18, %s2525_s18   ;;  %s1623_s17 = sphi %s1663_s17, %s2524_s17   ;;  %s1619_s16 = sphi %s1661_s16, %s2523_s16   ;;  %s1615_s15 = sphi %s1659_s15, %s2522_s15  }
   0x4   : > { %p25_p0 = scmp.ge.s32.totalorder %s24_s20, 2  ;;  %p1340_p1 = scmp.ge.s32.totalorder %s1631_s19, 1 }
   0x5   : > { %p190_p2 = scmp.lt.s32.totalorder %s1631_s19, 5 }
   0x6   : > { %s2527_s20 = smov (%p25_p0, %s24_s20), 0  ;;  %s2529_s21 = smov (!%p25_p0, %s27_s21), %s1627_s18 }
   0x7   : > { %p191_p3 = pnand %p1340_p1, %p190_p2  ;;  %p29_p4 = scmp.ge.s32.totalorder %s2529_s21, 2 }
   0x8   : > { %s1341_s22 = sshll.u32 (!%p191_p3), %s1619_s16, 1  ;;  %p244_p5 = scmp.lt.s32.totalorder (!%p191_p3), %s1619_s16, 1 }
   0x9   : > { %s2531_s21 = smov (%p29_p4, %s2529_s21), 0  ;;  %194 = sbr.rel (%p191_p3) target bundleno = 395 (0x18b), region = 32 }
   0xa   : > { %s225_s23 = sadd.s32 (!%p191_p3), %s1615_s15, %s1341_s22  ;;  %p1348_p7 = scmp.ne.s32.totalorder (!%p191_p3), %s1615_s15, 0 }
   0xb   : > { %s1342_s24 = sshll.u32 (!%p191_p3), %s225_s23, 6 }
   0xc   : > { %p227_p6 = scmp.lt.s32.totalorder (!%p191_p3), %s1342_s24, 255 }
   0xe   : > { %s2533_s16 = smov (!%p244_p5, %s1619_s16), 1  ;;  %s2535_s24 = smov (!%p227_p6, %s1342_s24), 255 }
   0xf   : > { %s1347_s25 = sshll.u32 %s2533_s16, 1  ;;  %s1343_s26 = sshll.u32 %s2535_s24, 2 }
  0x10   : > { %s1692_s29 = scalar_lea.vmem %s2521_s4, %s1347_s25  ;;  %s1697_s6 = scalar_lea.vmem %s2517_s0, %s1343_s26 }
  0x11   : > { %s1702_s9 = scalar_lea.vmem %s2520_s3, %s1343_s26  ;;  %252 = sbr.rel (%p1348_p7) target bundleno = 24 (0x18), region = 36 }
  0x16   : > { %vm253_vm0 = vcmask 123904   ;;  %v1633_v0 = vmov 0.0  }
  0x17   : > { %254 = vst.msk [vmem:[%s1692_s29] sm:$0x3] %vm253_vm0, %v1633_v0 }
  0x18 PF: > { %v1479_v1 = vld [vmem:[%s2518_s1] sm:$0xf]  ;;  %v1547_v2 = vld [vmem:[%s2518_s1] sm:$0x30]  ;;  %vm587_vm1 = vcmask 1045504   ;;  %vm490_vm2 = vcmask 97280  }
  0x19   : > { %v1480_v3 = vor.u32 %v1547_v2, %v1479_v1  ;;  %v1515_v5 = vld [vmem:[%s1697_s6] sm:$0xff]  ;;  %v1516_v7 = vld [vmem:[%s1697_s6 + $0x8] sm:$0xff]  ;;  %v1517_v10 = vld [vmem:[%s1697_s6 + $0x10] sm:$0xff]  ;;  %vm824_vm3 = vcmask 125952   ;;  %vm890_vm4 = vcmask 130048   ;;  %vm1025_vm5 = vcmask 122880  }
  0x1a   : > { %v1523_v6 = vld [vmem:[%s1697_s6 + $0x40] sm:$0xff]  ;;  %v1524_v8 = vld [vmem:[%s1697_s6 + $0x48] sm:$0xff]  ;;  %v1525_v11 = vld [vmem:[%s1697_s6 + $0x50] sm:$0xff] }
  0x1b   : > { %v589_v4 = vsel %vm587_vm1, %v1480_v3, 0  ;;  %v1531_v9 = vld [vmem:[%s1697_s6 + $0x80] sm:$0xff]  ;;  %v1532_v12 = vld [vmem:[%s1697_s6 + $0x88] sm:$0xff]  ;;  %v1518_v13 = vld [vmem:[%s1697_s6 + $0x18] sm:$0xff] }
  0x1c   : > { %598 = vmatpush.bf16.msra.mxu0 %v589_v4  ;;  %1548 = vmatpush.bf16.msra.mxu1 %v589_v4  ;;  %v1526_v14 = vld [vmem:[%s1697_s6 + $0x58] sm:$0xff]  ;;  %v1533_v15 = vld [vmem:[%s1697_s6 + $0x90] sm:$0xff]  ;;  %v1539_v16 = vld [vmem:[%s1697_s6 + $0xc0] sm:$0xff] }
  0x1d   : > { %1549 = vmatpush.bf16.msra.mxu2 %v589_v4  ;;  %1550 = vmatpush.bf16.msra.mxu3 %v589_v4  ;;  %v1519_v17 = vld [vmem:[%s1697_s6 + $0x20] sm:$0xff]  ;;  %v1534_v19 = vld [vmem:[%s1697_s6 + $0x98] sm:$0xff]  ;;  %v1540_v20 = vld [vmem:[%s1697_s6 + $0xc8] sm:$0xff] }
  0x1e   : > { %v1527_v18 = vld [vmem:[%s1697_s6 + $0x60] sm:$0xff]  ;;  %v1520_v21 = vld [vmem:[%s1697_s6 + $0x28] sm:$0xff]  ;;  %v1541_v24 = vld [vmem:[%s1697_s6 + $0xd0] sm:$0xff] }
  0x1f   : > { %1481 = vmatmul.msk.bf16.vlgmr.msra.gmra.mxu0 %vm490_vm2, %v1515_v5  ;;  %1489 = vmatmul.msk.bf16.vlgmr.msra.gmra.mxu1 %vm490_vm2, %v1523_v6  ;;  %v1528_v22 = vld [vmem:[%s1697_s6 + $0x68] sm:$0xff]  ;;  %v1535_v23 = vld [vmem:[%s1697_s6 + $0xa0] sm:$0xff]  ;;  %v1521_v25 = vld [vmem:[%s1697_s6 + $0x30] sm:$0xff] }
  0x20   : > { %1497 = vmatmul.msk.bf16.vlgmr.msra.gmra.mxu2 %vm490_vm2, %v1531_v9  ;;  %1505 = vmatmul.msk.bf16.vlgmr.msra.gmra.mxu3 %vm490_vm2, %v1539_v16  ;;  %v1529_v26 = vld [vmem:[%s1697_s6 + $0x70] sm:$0xff]  ;;  %v1536_v27 = vld [vmem:[%s1697_s6 + $0xa8] sm:$0xff]  ;;  %v1542_v28 = vld [vmem:[%s1697_s6 + $0xd8] sm:$0xff] }
  0x21   : > { %v1522_v29 = vld [vmem:[%s1697_s6 + $0x38] sm:$0xff]  ;;  %v1537_v31 = vld [vmem:[%s1697_s6 + $0xb0] sm:$0xff]  ;;  %v1543_v32 = vld [vmem:[%s1697_s6 + $0xe0] sm:$0xff] }
  0x22   : > { %v1530_v30 = vld [vmem:[%s1697_s6 + $0x78] sm:$0xff]  ;;  %v1770_v33 = vld [vmem:[%s2519_s2] ss:$0 sm:$0xff]  ;;  %v1544_v41 = vld [vmem:[%s1697_s6 + $0xe8] sm:$0xff] }
  0x23   : > { %v1538_v40 = vld [vmem:[%s1697_s6 + $0xb8] sm:$0xff]  ;;  %v1545_v0 = vld [vmem:[%s1697_s6 + $0xf0] sm:$0xff] }
  0x2f   : > { %1482 = vmatmul.msk.bf16.gmra.mxu0 %vm490_vm2, %v1516_v7  ;;  %1490 = vmatmul.msk.bf16.gmra.mxu1 %vm490_vm2, %v1524_v8 }
  0x30   : > { %1498 = vmatmul.msk.bf16.gmra.mxu2 %vm490_vm2, %v1532_v12  ;;  %1506 = vmatmul.msk.bf16.gmra.mxu3 %vm490_vm2, %v1540_v20 }
  0x3f   : > { %1483 = vmatmul.msk.bf16.gmra.mxu0 %vm490_vm2, %v1517_v10  ;;  %1491 = vmatmul.msk.bf16.gmra.mxu1 %vm490_vm2, %v1525_v11 }
  0x40   : > { %1499 = vmatmul.msk.bf16.gmra.mxu2 %vm490_vm2, %v1533_v15  ;;  %1507 = vmatmul.msk.bf16.gmra.mxu3 %vm490_vm2, %v1541_v24 }
  0x4f   : > { %1484 = vmatmul.msk.bf16.gmra.mxu0 %vm490_vm2, %v1518_v13  ;;  %1492 = vmatmul.msk.bf16.gmra.mxu1 %vm490_vm2, %v1526_v14 }
  0x50   : > { %1500 = vmatmul.msk.bf16.gmra.mxu2 %vm490_vm2, %v1534_v19  ;;  %1508 = vmatmul.msk.bf16.gmra.mxu3 %vm490_vm2, %v1542_v28  ;;  %v1546_v28 = vld [vmem:[%s1697_s6 + $0xf8] sm:$0xff] }
  0x5f   : > { %1485 = vmatmul.msk.bf16.gmra.mxu0 %vm490_vm2, %v1519_v17  ;;  %1493 = vmatmul.msk.bf16.gmra.mxu1 %vm490_vm2, %v1527_v18 }
  0x60   : > { %1501 = vmatmul.msk.bf16.gmra.mxu2 %vm490_vm2, %v1535_v23  ;;  %1509 = vmatmul.msk.bf16.gmra.mxu3 %vm490_vm2, %v1543_v32 }
  0x6f   : > { %1486 = vmatmul.msk.bf16.gmra.mxu0 %vm490_vm2, %v1520_v21  ;;  %1494 = vmatmul.msk.bf16.gmra.mxu1 %vm490_vm2, %v1528_v22 }
  0x70   : > { %1502 = vmatmul.msk.bf16.gmra.mxu2 %vm490_vm2, %v1536_v27  ;;  %1510 = vmatmul.msk.bf16.gmra.mxu3 %vm490_vm2, %v1544_v41 }
  0x7f   : > { %1487 = vmatmul.msk.bf16.gmra.mxu0 %vm490_vm2, %v1521_v25  ;;  %1495 = vmatmul.msk.bf16.gmra.mxu1 %vm490_vm2, %v1529_v26 }
  0x80   : > { %1503 = vmatmul.msk.bf16.gmra.mxu2 %vm490_vm2, %v1537_v31  ;;  %1511 = vmatmul.msk.bf16.gmra.mxu3 %vm490_vm2, %v1545_v0 }
  0x8f   : > { %1488 = vmatmul.msk.bf16.gmra.mxu0 %vm490_vm2, %v1522_v29  ;;  %1496 = vmatmul.msk.bf16.gmra.mxu1 %vm490_vm2, %v1530_v30 }
  0x90   : > { %1504 = vmatmul.msk.bf16.gmra.mxu2 %vm490_vm2, %v1538_v40  ;;  %1512 = vmatmul.msk.bf16.gmra.mxu3 %vm490_vm2, %v1546_v28 }
  0x9c   : > { %v600_v34 = vpop.f32.mrf.mxu0  ;;  %v640_v35 = vpop.f32.mrf.mxu1 }
  0x9d   : > { %v601_v36 = vadd.f32 %v1770_v33, %v600_v34  ;;  %v1774_v37 = vadd.f32 %v1770_v33, %v640_v35 }
  0x9f   : > { %v760_v38 = vpack.c.bf16 %v601_v36, %v601_v36  ;;  %v776_v39 = vpack.c.bf16 %v1774_v37, %v1774_v37  ;;  %v1028_v44 = vmul.f32 %v601_v36, %v601_v36  ;;  %v891_v47 = vsel %vm890_vm4, %v601_v36, 0.0 }
  0xa1   : > { %825 = vst.msk [vmem:[%s1702_s9] sm:$0xf] %vm824_vm3, %v760_v38  ;;  %v1092_v53 = vsel %vm890_vm4, %v1028_v44, 0.0 }
  0xa2   : > { %841 = vst.msk [vmem:[%s1702_s9 + $0x40] sm:$0xf] %vm824_vm3, %v776_v39 }
  0xa3   : > { %v680_v8 = vpop.f32.mrf.mxu2 }
  0xa4   : > { %v602_v42 = vpop.f32.mrf.mxu0  ;;  %v642_v43 = vpop.f32.mrf.mxu1  ;;  %v1827_v16 = vadd.f32 %v1770_v33, %v680_v8 }
  0xa5   : > { %v603_v45 = vadd.f32 %v1770_v33, %v602_v42  ;;  %v1788_v46 = vadd.f32 %v1770_v33, %v642_v43 }
  0xa6   : > { %v792_v19 = vpack.c.bf16 %v1827_v16, %v1827_v16 }
  0xa7   : > { %v761_v48 = vpack.c.bf16 %v603_v45, %v603_v45  ;;  %v892_v49 = vsel %vm890_vm4, %v603_v45, 0.0  ;;  %v1029_v50 = vmul.f32 %v603_v45, %v603_v45  ;;  %v777_v51 = vpack.c.bf16 %v1788_v46, %v1788_v46 }
  0xa8   : > { %v893_v52 = vadd.f32 %v892_v49, %v891_v47  ;;  %857 = vst.msk [vmem:[%s1702_s9 + $0x80] sm:$0xf] %vm824_vm3, %v792_v19 }
  0xa9   : > { %826 = vst.msk [vmem:[%s1702_s9 + $0x4] sm:$0xf] %vm824_vm3, %v761_v48  ;;  %v1093_v54 = vsel %vm890_vm4, %v1029_v50, 0.0 }
  0xaa   : > { %v1094_v55 = vadd.f32 %v1093_v54, %v1092_v53  ;;  %842 = vst.msk [vmem:[%s1702_s9 + $0x44] sm:$0xf] %vm824_vm3, %v777_v51 }
  0xab   : > { %v682_v22 = vpop.f32.mrf.mxu2 }
  0xac   : > { %v605_v56 = vpop.f32.mrf.mxu0  ;;  %v645_v57 = vpop.f32.mrf.mxu1  ;;  %v1838_v23 = vadd.f32 %v1770_v33, %v682_v22 }
  0xad   : > { %v606_v58 = vadd.f32 %v1770_v33, %v605_v56  ;;  %v1802_v59 = vadd.f32 %v1770_v33, %v645_v57 }
  0xae   : > { %v793_v30 = vpack.c.bf16 %v1838_v23, %v1838_v23 }
  0xaf   : > { %v762_v60 = vpack.c.bf16 %v606_v58, %v606_v58  ;;  %v894_v61 = vsel %vm890_vm4, %v606_v58, 0.0  ;;  %v1030_v62 = vmul.f32 %v606_v58, %v606_v58  ;;  %v778_v63 = vpack.c.bf16 %v1802_v59, %v1802_v59 }
  0xb0   : > { %v895_v1 = vadd.f32 %v894_v61, %v893_v52  ;;  %858 = vst.msk [vmem:[%s1702_s9 + $0x84] sm:$0xf] %vm824_vm3, %v793_v30 }
  0xb1   : > { %827 = vst.msk [vmem:[%s1702_s9 + $0x8] sm:$0xf] %vm824_vm3, %v762_v60  ;;  %v1095_v2 = vsel %vm890_vm4, %v1030_v62, 0.0  ;;  %v720_v60 = vpop.f32.mrf.mxu3 }
  0xb2   : > { %v1096_v3 = vadd.f32 %v1095_v2, %v1094_v55  ;;  %843 = vst.msk [vmem:[%s1702_s9 + $0x48] sm:$0xf] %vm824_vm3, %v778_v63  ;;  %v1918_v0 = vadd.f32 %v1770_v33, %v720_v60 }
  0xb3   : > { %v685_v39 = vpop.f32.mrf.mxu2 }
  0xb4   : > { %v607_v4 = vpop.f32.mrf.mxu0  ;;  %v647_v5 = vpop.f32.mrf.mxu1  ;;  %v1873_v42 = vadd.f32 %v1770_v33, %v685_v39 }
  0xb5   : > { %v608_v6 = vadd.f32 %v1770_v33, %v607_v4  ;;  %v1816_v7 = vadd.f32 %v1770_v33, %v647_v5  ;;  %v808_v4 = vpack.c.bf16 %v1918_v0, %v1918_v0 }
  0xb6   : > { %v794_v45 = vpack.c.bf16 %v1873_v42, %v1873_v42 }
  0xb7   : > { %v763_v9 = vpack.c.bf16 %v608_v6, %v608_v6  ;;  %v896_v10 = vsel %vm890_vm4, %v608_v6, 0.0  ;;  %v1031_v11 = vmul.f32 %v608_v6, %v608_v6  ;;  %v779_v12 = vpack.c.bf16 %v1816_v7, %v1816_v7  ;;  %873 = vst.msk [vmem:[%s1702_s9 + $0xc0] sm:$0xf] %vm824_vm3, %v808_v4 }
  0xb8   : > { %v897_v13 = vadd.f32 %v896_v10, %v895_v1  ;;  %859 = vst.msk [vmem:[%s1702_s9 + $0x88] sm:$0xf] %vm824_vm3, %v794_v45 }
  0xb9   : > { %828 = vst.msk [vmem:[%s1702_s9 + $0xc] sm:$0xf] %vm824_vm3, %v763_v9  ;;  %v1097_v14 = vsel %vm890_vm4, %v1031_v11, 0.0  ;;  %v722_v9 = vpop.f32.mrf.mxu3 }
  0xba   : > { %v1098_v15 = vadd.f32 %v1097_v14, %v1096_v3  ;;  %844 = vst.msk [vmem:[%s1702_s9 + $0x4c] sm:$0xf] %vm824_vm3, %v779_v12  ;;  %v1936_v11 = vadd.f32 %v1770_v33, %v722_v9 }
  0xbb   : > { %v687_v49 = vpop.f32.mrf.mxu2 }
  0xbc   : > { %v610_v17 = vpop.f32.mrf.mxu0  ;;  %v650_v18 = vpop.f32.mrf.mxu1  ;;  %v1886_v50 = vadd.f32 %v1770_v33, %v687_v49 }
  0xbd   : > { %v611_v20 = vadd.f32 %v1770_v33, %v610_v17  ;;  %v1833_v21 = vadd.f32 %v1770_v33, %v650_v18 }
  0xbe   : > { %v795_v53 = vpack.c.bf16 %v1886_v50, %v1886_v50 }
  0xbf   : > { %v764_v24 = vpack.c.bf16 %v611_v20, %v611_v20  ;;  %v898_v25 = vsel %vm890_vm4, %v611_v20, 0.0  ;;  %v1032_v26 = vmul.f32 %v611_v20, %v611_v20  ;;  %v780_v27 = vpack.c.bf16 %v1833_v21, %v1833_v21 }
  0xc0   : > { %v1844_v29 = vadd.f32 %v898_v25, %v897_v13  ;;  %860 = vst.msk [vmem:[%s1702_s9 + $0x8c] sm:$0xf] %vm824_vm3, %v795_v53 }
  0xc1   : > { %829 = vst.msk [vmem:[%s1702_s9 + $0x10] sm:$0xf] %vm824_vm3, %v764_v24  ;;  %v1099_v31 = vsel %vm890_vm4, %v1032_v26, 0.0  ;;  %v725_v24 = vpop.f32.mrf.mxu3 }
  0xc2   : > { %v1852_v32 = vadd.f32 %v1099_v31, %v1098_v15  ;;  %845 = vst.msk [vmem:[%s1702_s9 + $0x50] sm:$0xf] %vm824_vm3, %v780_v27  ;;  %v809_v15 = vpack.c.bf16 %v1936_v11, %v1936_v11  ;;  %v1974_v28 = vadd.f32 %v1770_v33, %v725_v24 }
  0xc3   : > { %v690_v58 = vpop.f32.mrf.mxu2 }
  0xc4   : > { %v612_v34 = vpop.f32.mrf.mxu0  ;;  %v652_v35 = vpop.f32.mrf.mxu1  ;;  %v1915_v63 = vadd.f32 %v1770_v33, %v690_v58  ;;  %874 = vst.msk [vmem:[%s1702_s9 + $0xc4] sm:$0xf] %vm824_vm3, %v809_v15 }
  0xc5   : > { %v1859_v36 = vadd.f32 %v1770_v33, %v612_v34  ;;  %v1862_v38 = vadd.f32 %v1770_v33, %v652_v35  ;;  %v810_v35 = vpack.c.bf16 %v1974_v28, %v1974_v28 }
  0xc6   : > { %v796_v3 = vpack.c.bf16 %v1915_v63, %v1915_v63 }
  0xc7   : > { %v765_v40 = vpack.c.bf16 %v1859_v36, %v1859_v36  ;;  %v781_v41 = vpack.c.bf16 %v1862_v38, %v1862_v38  ;;  %875 = vst.msk [vmem:[%s1702_s9 + $0xc8] sm:$0xf] %vm824_vm3, %v810_v35 }
  0xc8   : > { %861 = vst.msk [vmem:[%s1702_s9 + $0x90] sm:$0xf] %vm824_vm3, %v796_v3  ;;  %v1033_v3 = vmul.f32 %v1859_v36, %v1859_v36 }
  0xc9   : > { %830 = vst.msk [vmem:[%s1702_s9 + $0x14] sm:$0xf] %vm824_vm3, %v765_v40 }
  0xca   : > { %846 = vst.msk [vmem:[%s1702_s9 + $0x54] sm:$0xf] %vm824_vm3, %v781_v41 }
  0xcb   : > { %v692_v8 = vpop.f32.mrf.mxu2 }
  0xcc   : > { %v615_v43 = vpop.f32.mrf.mxu0  ;;  %v655_v44 = vpop.f32.mrf.mxu1  ;;  %v1933_v10 = vadd.f32 %v1770_v33, %v692_v8 }
  0xcd   : > { %v1878_v47 = vadd.f32 %v1770_v33, %v615_v43  ;;  %v1881_v48 = vadd.f32 %v1770_v33, %v655_v44  ;;  %v727_v43 = vpop.f32.mrf.mxu3 }
  0xce   : > { %v797_v14 = vpack.c.bf16 %v1933_v10, %v1933_v10  ;;  %v1992_v45 = vadd.f32 %v1770_v33, %v727_v43 }
  0xcf   : > { %v766_v51 = vpack.c.bf16 %v1878_v47, %v1878_v47  ;;  %v782_v52 = vpack.c.bf16 %v1881_v48, %v1881_v48  ;;  %v902_v43 = vsel %vm890_vm4, %v1878_v47, 0.0 }
  0xd0   : > { %862 = vst.msk [vmem:[%s1702_s9 + $0x94] sm:$0xf] %vm824_vm3, %v797_v14  ;;  %v811_v53 = vpack.c.bf16 %v1992_v45, %v1992_v45 }
  0xd1   : > { %831 = vst.msk [vmem:[%s1702_s9 + $0x18] sm:$0xf] %vm824_vm3, %v766_v51 }
  0xd2   : > { %847 = vst.msk [vmem:[%s1702_s9 + $0x58] sm:$0xf] %vm824_vm3, %v782_v52 }
  0xd3   : > { %v695_v22 = vpop.f32.mrf.mxu2  ;;  %876 = vst.msk [vmem:[%s1702_s9 + $0xcc] sm:$0xf] %vm824_vm3, %v811_v53 }
  0xd4   : > { %v617_v54 = vpop.f32.mrf.mxu0  ;;  %v657_v55 = vpop.f32.mrf.mxu1  ;;  %v1971_v27 = vadd.f32 %v1770_v33, %v695_v22 }
  0xd5   : > { %v1901_v56 = vadd.f32 %v1770_v33, %v617_v54  ;;  %v1904_v57 = vadd.f32 %v1770_v33, %v657_v55 }
  0xd6   : > { %v798_v34 = vpack.c.bf16 %v1971_v27, %v1971_v27 }
  0xd7   : > { %v767_v61 = vpack.c.bf16 %v1901_v56, %v1901_v56  ;;  %v783_v62 = vpack.c.bf16 %v1904_v57, %v1904_v57 }
  0xd8   : > { %863 = vst.msk [vmem:[%s1702_s9 + $0x98] sm:$0xf] %vm824_vm3, %v798_v34  ;;  %v1101_v34 = vsel %vm890_vm4, %v1033_v3, 0.0 }
  0xd9   : > { %832 = vst.msk [vmem:[%s1702_s9 + $0x1c] sm:$0xf] %vm824_vm3, %v767_v61 }
  0xda   : > { %848 = vst.msk [vmem:[%s1702_s9 + $0x5c] sm:$0xf] %vm824_vm3, %v783_v62  ;;  %v730_v62 = vpop.f32.mrf.mxu3 }
  0xdb   : > { %v697_v41 = vpop.f32.mrf.mxu2  ;;  %v2038_v14 = vadd.f32 %v1770_v33, %v730_v62 }
  0xdc   : > { %v620_v1 = vpop.f32.mrf.mxu0  ;;  %v660_v2 = vpop.f32.mrf.mxu1  ;;  %v1989_v44 = vadd.f32 %v1770_v33, %v697_v41  ;;  %v1035_v41 = vmul.f32 %v1901_v56, %v1901_v56 }
  0xdd   : > { %v1925_v5 = vadd.f32 %v1770_v33, %v620_v1  ;;  %v1928_v6 = vadd.f32 %v1770_v33, %v660_v2  ;;  %v812_v35 = vpack.c.bf16 %v2038_v14, %v2038_v14 }
  0xde   : > { %v799_v52 = vpack.c.bf16 %v1989_v44, %v1989_v44 }
  0xdf   : > { %v768_v12 = vpack.c.bf16 %v1925_v5, %v1925_v5  ;;  %v784_v13 = vpack.c.bf16 %v1928_v6, %v1928_v6  ;;  %v1036_v53 = vmul.f32 %v1925_v5, %v1925_v5  ;;  %877 = vst.msk [vmem:[%s1702_s9 + $0xd0] sm:$0xf] %vm824_vm3, %v812_v35 }
  0xe0   : > { %864 = vst.msk [vmem:[%s1702_s9 + $0x9c] sm:$0xf] %vm824_vm3, %v799_v52  ;;  %v1102_v52 = vadd.f32 %v1101_v34, %v1852_v32 }
  0xe1   : > { %833 = vst.msk [vmem:[%s1702_s9 + $0x20] sm:$0xf] %vm824_vm3, %v768_v12 }
  0xe2   : > { %849 = vst.msk [vmem:[%s1702_s9 + $0x60] sm:$0xf] %vm824_vm3, %v784_v13 }
  0xe3   : > { %v700_v61 = vpop.f32.mrf.mxu2 }
  0xe4   : > { %v622_v17 = vpop.f32.mrf.mxu0  ;;  %v662_v18 = vpop.f32.mrf.mxu1  ;;  %v2035_v13 = vadd.f32 %v1770_v33, %v700_v61  ;;  %v904_v61 = vsel %vm890_vm4, %v1901_v56, 0.0  ;;  %v906_v56 = vsel %vm890_vm4, %v1925_v5, 0.0 }
  0xe5   : > { %v1957_v19 = vadd.f32 %v1770_v33, %v622_v17  ;;  %v1960_v20 = vadd.f32 %v1770_v33, %v662_v18  ;;  %v732_v17 = vpop.f32.mrf.mxu3  ;;  %v1034_v18 = vmul.f32 %v1878_v47, %v1878_v47 }
  0xe7   : > { %v769_v25 = vpack.c.bf16 %v1957_v19, %v1957_v19  ;;  %v785_v26 = vpack.c.bf16 %v1960_v20, %v1960_v20 }
  0xe9   : > { %834 = vst.msk [vmem:[%s1702_s9 + $0x24] sm:$0xf] %vm824_vm3, %v769_v25 }
  0xea   : > { %850 = vst.msk [vmem:[%s1702_s9 + $0x64] sm:$0xf] %vm824_vm3, %v785_v26  ;;  %v800_v26 = vpack.c.bf16 %v2035_v13, %v2035_v13 }
  0xeb   : > { %v702_v15 = vpop.f32.mrf.mxu2 }
  0xec   : > { %v625_v30 = vpop.f32.mrf.mxu0  ;;  %v665_v31 = vpop.f32.mrf.mxu1  ;;  %v2047_v25 = vadd.f32 %v1770_v33, %v702_v15  ;;  %865 = vst.msk [vmem:[%s1702_s9 + $0xa0] sm:$0xf] %vm824_vm3, %v800_v26 }
  0xed   : > { %v1981_v39 = vadd.f32 %v1770_v33, %v625_v30  ;;  %v1984_v40 = vadd.f32 %v1770_v33, %v665_v31  ;;  %v2052_v30 = vadd.f32 %v1770_v33, %v732_v17  ;;  %v900_v31 = vsel %vm890_vm4, %v1859_v36, 0.0 }
  0xee   : > { %v801_v36 = vpack.c.bf16 %v2047_v25, %v2047_v25 }
  0xef   : > { %v770_v49 = vpack.c.bf16 %v1981_v39, %v1981_v39  ;;  %v786_v51 = vpack.c.bf16 %v1984_v40, %v1984_v40  ;;  %v813_v47 = vpack.c.bf16 %v2052_v30, %v2052_v30 }
  0xf0   : > { %866 = vst.msk [vmem:[%s1702_s9 + $0xa4] sm:$0xf] %vm824_vm3, %v801_v36 }
  0xf1   : > { %835 = vst.msk [vmem:[%s1702_s9 + $0x28] sm:$0xf] %vm824_vm3, %v770_v49  ;;  %v1103_v49 = vsel %vm890_vm4, %v1034_v18, 0.0 }
  0xf2   : > { %851 = vst.msk [vmem:[%s1702_s9 + $0x68] sm:$0xf] %vm824_vm3, %v786_v51  ;;  %v901_v51 = vadd.f32 %v900_v31, %v1844_v29  ;;  %v1104_v3 = vadd.f32 %v1103_v49, %v1102_v52  ;;  %v908_v31 = vsel %vm890_vm4, %v1957_v19, 0.0 }
  0xf3   : > { %v705_v32 = vpop.f32.mrf.mxu2  ;;  %878 = vst.msk [vmem:[%s1702_s9 + $0xd4] sm:$0xf] %vm824_vm3, %v813_v47 }
  0xf4   : > { %v627_v54 = vpop.f32.mrf.mxu0  ;;  %v667_v55 = vpop.f32.mrf.mxu1  ;;  %v2121_v47 = vadd.f32 %v1770_v33, %v705_v32 }
  0xf5   : > { %v2013_v58 = vadd.f32 %v1770_v33, %v627_v54  ;;  %v2016_v60 = vadd.f32 %v1770_v33, %v667_v55 }
  0xf7   : > { %v771_v1 = vpack.c.bf16 %v2013_v58, %v2013_v58  ;;  %v787_v2 = vpack.c.bf16 %v2016_v60, %v2016_v60  ;;  %v1039_v34 = vmul.f32 %v2013_v58, %v2013_v58 }
  0xf9   : > { %836 = vst.msk [vmem:[%s1702_s9 + $0x2c] sm:$0xf] %vm824_vm3, %v771_v1  ;;  %v735_v1 = vpop.f32.mrf.mxu3 }
  0xfa   : > { %852 = vst.msk [vmem:[%s1702_s9 + $0x6c] sm:$0xf] %vm824_vm3, %v787_v2  ;;  %v903_v2 = vadd.f32 %v902_v43, %v901_v51  ;;  %v910_v43 = vsel %vm890_vm4, %v1981_v39, 0.0 }
  0xfc   : > { %v630_v4 = vpop.f32.mrf.mxu0  ;;  %v670_v8 = vpop.f32.mrf.mxu1  ;;  %v905_v18 = vadd.f32 %v904_v61, %v903_v2 }
  0xfd   : > { %v2029_v9 = vadd.f32 %v1770_v33, %v630_v4  ;;  %v2032_v12 = vadd.f32 %v1770_v33, %v670_v8  ;;  %v1105_v4 = vsel %vm890_vm4, %v1035_v41, 0.0  ;;  %v1037_v8 = vmul.f32 %v1957_v19, %v1957_v19  ;;  %v707_v61 = vpop.f32.mrf.mxu2 }
  0xfe   : > { %v1106_v26 = vadd.f32 %v1105_v4, %v1104_v3  ;;  %v907_v5 = vadd.f32 %v906_v56, %v905_v18  ;;  %v912_v19 = vsel %vm890_vm4, %v2013_v58, 0.0  ;;  %v1113_v4 = vsel %vm890_vm4, %v1039_v34, 0.0 }
  0xff   : > { %v772_v22 = vpack.c.bf16 %v2029_v9, %v2029_v9  ;;  %v788_v24 = vpack.c.bf16 %v2032_v12, %v2032_v12  ;;  %v1109_v41 = vsel %vm890_vm4, %v1037_v8, 0.0  ;;  %v1040_v51 = vmul.f32 %v2029_v9, %v2029_v9 }
 0x100   : > { %v909_v49 = vadd.f32 %v908_v31, %v907_v5  ;;  %v914_v56 = vsel %vm890_vm4, %v2029_v9, 0.0 }
 0x101   : > { %837 = vst.msk [vmem:[%s1702_s9 + $0x30] sm:$0xf] %vm824_vm3, %v772_v22  ;;  %v1107_v22 = vsel %vm890_vm4, %v1036_v53, 0.0  ;;  %v737_v2 = vpop.f32.mrf.mxu3  ;;  %v1115_v9 = vsel %vm890_vm4, %v1040_v51, 0.0 }
 0x102   : > { %853 = vst.msk [vmem:[%s1702_s9 + $0x70] sm:$0xf] %vm824_vm3, %v788_v24  ;;  %v1038_v24 = vmul.f32 %v1981_v39, %v1981_v39  ;;  %v1108_v35 = vadd.f32 %v1107_v22, %v1106_v26  ;;  %v2124_v39 = vadd.f32 %v1770_v33, %v735_v1  ;;  %v911_v3 = vadd.f32 %v910_v43, %v909_v49 }
 0x103   : > { %v2132_v1 = vadd.f32 %v1770_v33, %v707_v61  ;;  %v802_v22 = vpack.c.bf16 %v2121_v47, %v2121_v47 }
 0x104   : > { %v632_v54 = vpop.f32.mrf.mxu0  ;;  %v672_v55 = vpop.f32.mrf.mxu1  ;;  %v1111_v36 = vsel %vm890_vm4, %v1038_v24, 0.0  ;;  %v1110_v58 = vadd.f32 %v1109_v41, %v1108_v35  ;;  %v913_v18 = vadd.f32 %v912_v19, %v911_v3  ;;  %v2137_v24 = vadd.f32 %v1770_v33, %v737_v2 }
 0x105   : > { %v633_v62 = vadd.f32 %v1770_v33, %v632_v54  ;;  %v2084_v29 = vadd.f32 %v1770_v33, %v672_v55  ;;  %v814_v5 = vpack.c.bf16 %v2124_v39, %v2124_v39  ;;  %867 = vst.msk [vmem:[%s1702_s9 + $0xa8] sm:$0xf] %vm824_vm3, %v802_v22  ;;  %v710_v2 = vpop.f32.mrf.mxu2  ;;  %v1044_v3 = vmul.f32 %v1774_v37, %v1774_v37 }
 0x106   : > { %v915_v35 = vadd.f32 %v914_v56, %v913_v18  ;;  %v1045_v18 = vmul.f32 %v1788_v46, %v1788_v46 }
 0x107   : > { %v773_v15 = vpack.c.bf16 %v633_v62, %v633_v62  ;;  %v789_v17 = vpack.c.bf16 %v2084_v29, %v2084_v29  ;;  %v1041_v8 = vmul.f32 %v633_v62, %v633_v62  ;;  %v916_v26 = vsel %vm890_vm4, %v633_v62, 0.0  ;;  %879 = vst.msk [vmem:[%s1702_s9 + $0xd8] sm:$0xf] %vm824_vm3, %v814_v5 }
 0x108   : > { %v803_v62 = vpack.c.bf16 %v2132_v1, %v2132_v1 }
 0x109   : > { %838 = vst.msk [vmem:[%s1702_s9 + $0x34] sm:$0xf] %vm824_vm3, %v773_v15  ;;  %v1117_v41 = vsel %vm890_vm4, %v1041_v8, 0.0 }
 0x10a   : > { %854 = vst.msk [vmem:[%s1702_s9 + $0x74] sm:$0xf] %vm824_vm3, %v789_v17  ;;  %v1112_v17 = vadd.f32 %v1111_v36, %v1110_v58  ;;  %v917_v36 = vadd.f32 %v916_v26, %v915_v35  ;;  %v740_v58 = vpop.f32.mrf.mxu3  ;;  %v922_v26 = vsel %vm890_vm4, %v1774_v37, 0.0  ;;  %v926_v37 = vsel %vm890_vm4, %v1802_v59, 0.0 }
 0x10b   : > { %868 = vst.msk [vmem:[%s1702_s9 + $0xac] sm:$0xf] %vm824_vm3, %v803_v62  ;;  %v1125_v62 = vsel %vm890_vm4, %v1045_v18, 0.0 }
 0x10c   : > { %v635_v52 = vpop.f32.mrf.mxu0  ;;  %v675_v53 = vpop.f32.mrf.mxu1  ;;  %v1114_v34 = vadd.f32 %v1113_v4, %v1112_v17 }
 0x10d   : > { %v636_v54 = vadd.f32 %v1770_v33, %v635_v52  ;;  %v2118_v55 = vadd.f32 %v1770_v33, %v675_v53  ;;  %v815_v52 = vpack.c.bf16 %v2137_v24, %v2137_v24 }
 0x10e   : > { %v1116_v49 = vadd.f32 %v1115_v9, %v1114_v34 }
 0x10f   : > { %v774_v15 = vpack.c.bf16 %v636_v54, %v636_v54  ;;  %v790_v32 = vpack.c.bf16 %v2118_v55, %v2118_v55  ;;  %v1042_v31 = vmul.f32 %v636_v54, %v636_v54  ;;  %v918_v43 = vsel %vm890_vm4, %v636_v54, 0.0  ;;  %880 = vst.msk [vmem:[%s1702_s9 + $0xdc] sm:$0xf] %vm824_vm3, %v815_v52 }
 0x110   : > { %v1118_v4 = vadd.f32 %v1117_v41, %v1116_v49  ;;  %v919_v56 = vadd.f32 %v918_v43, %v917_v36  ;;  %v1123_v41 = vsel %vm890_vm4, %v1044_v3, 0.0  ;;  %v924_v43 = vsel %vm890_vm4, %v1788_v46, 0.0  ;;  %v712_v46 = vpop.f32.mrf.mxu2 }
 0x111   : > { %839 = vst.msk [vmem:[%s1702_s9 + $0x38] sm:$0xf] %vm824_vm3, %v774_v15  ;;  %v1119_v53 = vsel %vm890_vm4, %v1042_v31, 0.0  ;;  %v1046_v31 = vmul.f32 %v1802_v59, %v1802_v59  ;;  %v2192_v52 = vadd.f32 %v1770_v33, %v710_v2  ;;  %v2198_v59 = vadd.f32 %v1770_v33, %v712_v46 }
 0x112   : > { %855 = vst.msk [vmem:[%s1702_s9 + $0x78] sm:$0xf] %vm824_vm3, %v790_v32  ;;  %v1120_v22 = vadd.f32 %v1119_v53, %v1118_v4  ;;  %v2195_v53 = vadd.f32 %v1770_v33, %v740_v58  ;;  %v1048_v2 = vmul.f32 %v1833_v21, %v1833_v21 }
 0x113   : > { %v804_v58 = vpack.c.bf16 %v2192_v52, %v2192_v52 }
 0x114   : > { %v637_v19 = vpop.f32.mrf.mxu0  ;;  %v677_v51 = vpop.f32.mrf.mxu1 }
 0x115   : > { %v638_v61 = vadd.f32 %v1770_v33, %v637_v19  ;;  %v2160_v54 = vadd.f32 %v1770_v33, %v677_v51  ;;  %v1127_v19 = vsel %vm890_vm4, %v1046_v31, 0.0  ;;  %v1047_v51 = vmul.f32 %v1816_v7, %v1816_v7  ;;  %869 = vst.msk [vmem:[%s1702_s9 + $0xb0] sm:$0xf] %vm824_vm3, %v804_v58 }
 0x116   : > { %v938_v58 = vsel %vm890_vm4, %v1928_v6, 0.0 }
 0x117   : > { %v775_v8 = vpack.c.bf16 %v638_v61, %v638_v61  ;;  %v920_v15 = vsel %vm890_vm4, %v638_v61, 0.0  ;;  %v1043_v32 = vmul.f32 %v638_v61, %v638_v61  ;;  %v791_v17 = vpack.c.bf16 %v2160_v54, %v2160_v54  ;;  %v742_v61 = vpop.f32.mrf.mxu3 }
 0x118   : > { %v921_v9 = vadd.f32 %v920_v15, %v919_v56  ;;  %v2201_v56 = vadd.f32 %v1770_v33, %v742_v61  ;;  %v816_v15 = vpack.c.bf16 %v2195_v53, %v2195_v53  ;;  %v1129_v18 = vsel %vm890_vm4, %v1047_v51, 0.0 }
 0x119   : > { %840 = vst.msk [vmem:[%s1702_s9 + $0x3c] sm:$0xf] %vm824_vm3, %v775_v8  ;;  %v1121_v5 = vsel %vm890_vm4, %v1043_v32, 0.0  ;;  %v928_v8 = vsel %vm890_vm4, %v1816_v7, 0.0  ;;  %v1049_v7 = vmul.f32 %v1862_v38, %v1862_v38  ;;  %v936_v61 = vsel %vm890_vm4, %v1904_v57, 0.0 }
 0x11a   : > { %v923_v34 = vadd.f32 %v922_v26, %v921_v9  ;;  %v1122_v35 = vadd.f32 %v1121_v5, %v1120_v22  ;;  %856 = vst.msk [vmem:[%s1702_s9 + $0x7c] sm:$0xf] %vm824_vm3, %v791_v17  ;;  %v930_v22 = vsel %vm890_vm4, %v1833_v21, 0.0  ;;  %v805_v9 = vpack.c.bf16 %v2198_v59, %v2198_v59 }
 0x11b   : > { %881 = vst.msk [vmem:[%s1702_s9 + $0xe0] sm:$0xf] %vm824_vm3, %v816_v15  ;;  %v817_v5 = vpack.c.bf16 %v2201_v56, %v2201_v56  ;;  %v932_v21 = vsel %vm890_vm4, %v1862_v38, 0.0  ;;  %v1054_v15 = vmul.f32 %v1984_v40, %v1984_v40 }
 0x11c   : > { %v925_v49 = vadd.f32 %v924_v43, %v923_v34  ;;  %v1124_v36 = vadd.f32 %v1123_v41, %v1122_v35  ;;  %v1131_v34 = vsel %vm890_vm4, %v1048_v2, 0.0  ;;  %v1050_v35 = vmul.f32 %v1881_v48, %v1881_v48  ;;  %870 = vst.msk [vmem:[%s1702_s9 + $0xb4] sm:$0xf] %vm824_vm3, %v805_v9 }
 0x11d   : > { %882 = vst.msk [vmem:[%s1702_s9 + $0xe4] sm:$0xf] %vm824_vm3, %v817_v5 }
 0x11e   : > { %v927_v3 = vadd.f32 %v926_v37, %v925_v49  ;;  %v1126_v4 = vadd.f32 %v1125_v62, %v1124_v36  ;;  %v1133_v62 = vsel %vm890_vm4, %v1049_v7, 0.0  ;;  %v934_v37 = vsel %vm890_vm4, %v1881_v48, 0.0  ;;  %v715_v36 = vpop.f32.mrf.mxu2 }
 0x11f   : > { %v1051_v49 = vmul.f32 %v1904_v57, %v1904_v57  ;;  %v1135_v46 = vsel %vm890_vm4, %v1050_v35, 0.0  ;;  %v942_v7 = vsel %vm890_vm4, %v1984_v40, 0.0  ;;  %v2260_v5 = vadd.f32 %v1770_v33, %v715_v36 }
 0x120   : > { %v929_v32 = vadd.f32 %v928_v8, %v927_v3  ;;  %v1128_v17 = vadd.f32 %v1127_v19, %v1126_v4  ;;  %v745_v19 = vpop.f32.mrf.mxu3  ;;  %v1052_v3 = vmul.f32 %v1928_v6, %v1928_v6  ;;  %v1053_v4 = vmul.f32 %v1960_v20, %v1960_v20 }
 0x121   : > { %v1137_v2 = vsel %vm890_vm4, %v1051_v49, 0.0  ;;  %v1055_v6 = vmul.f32 %v2016_v60, %v2016_v60  ;;  %v806_v49 = vpack.c.bf16 %v2260_v5, %v2260_v5 }
 0x122   : > { %v931_v26 = vadd.f32 %v930_v22, %v929_v32  ;;  %v1130_v31 = vadd.f32 %v1129_v18, %v1128_v17  ;;  %v1139_v57 = vsel %vm890_vm4, %v1052_v3, 0.0  ;;  %v940_v18 = vsel %vm890_vm4, %v1960_v20, 0.0 }
 0x123   : > { %v1141_v22 = vsel %vm890_vm4, %v1053_v4, 0.0  ;;  %871 = vst.msk [vmem:[%s1702_s9 + $0xb8] sm:$0xf] %vm824_vm3, %v806_v49 }
 0x124   : > { %v933_v41 = vadd.f32 %v932_v21, %v931_v26  ;;  %v1132_v43 = vadd.f32 %v1131_v34, %v1130_v31  ;;  %v1143_v31 = vsel %vm890_vm4, %v1054_v15, 0.0  ;;  %v2263_v34 = vadd.f32 %v1770_v33, %v745_v19 }
 0x126   : > { %v1134_v38 = vadd.f32 %v1133_v62, %v1132_v43  ;;  %v935_v51 = vadd.f32 %v934_v37, %v933_v41  ;;  %v717_v20 = vpop.f32.mrf.mxu2  ;;  %v944_v62 = vsel %vm890_vm4, %v2016_v60, 0.0  ;;  %v1056_v37 = vmul.f32 %v2032_v12, %v2032_v12 }
 0x127   : > { %v2266_v40 = vadd.f32 %v1770_v33, %v717_v20  ;;  %v818_v36 = vpack.c.bf16 %v2263_v34, %v2263_v34  ;;  %v1057_v60 = vmul.f32 %v2084_v29, %v2084_v29  ;;  %v954_v20 = vsel %vm890_vm4, %v1827_v16, 0.0 }
 0x128   : > { %v937_v8 = vadd.f32 %v936_v61, %v935_v51  ;;  %v1136_v48 = vadd.f32 %v1135_v46, %v1134_v38  ;;  %v747_v21 = vpop.f32.mrf.mxu3  ;;  %v1145_v51 = vsel %vm890_vm4, %v1055_v6, 0.0  ;;  %v946_v46 = vsel %vm890_vm4, %v2032_v12, 0.0 }
 0x129   : > { %v2269_v43 = vadd.f32 %v1770_v33, %v747_v21  ;;  %v807_v61 = vpack.c.bf16 %v2266_v40, %v2266_v40  ;;  %883 = vst.msk [vmem:[%s1702_s9 + $0xe8] sm:$0xf] %vm824_vm3, %v818_v36  ;;  %v948_v12 = vsel %vm890_vm4, %v2084_v29, 0.0 }
 0x12a   : > { %v939_v32 = vadd.f32 %v938_v58, %v937_v8  ;;  %v1138_v17 = vadd.f32 %v1137_v2, %v1136_v48  ;;  %v1147_v48 = vsel %vm890_vm4, %v1056_v37, 0.0  ;;  %v1058_v2 = vmul.f32 %v2118_v55, %v2118_v55 }
 0x12b   : > { %v819_v8 = vpack.c.bf16 %v2269_v43, %v2269_v43  ;;  %872 = vst.msk [vmem:[%s1702_s9 + $0xbc] sm:$0xf] %vm824_vm3, %v807_v61  ;;  %v956_v37 = vsel %vm890_vm4, %v1838_v23, 0.0 }
 0x12c   : > { %v941_v9 = vadd.f32 %v940_v18, %v939_v32  ;;  %v1140_v26 = vadd.f32 %v1139_v57, %v1138_v17  ;;  %v1149_v32 = vsel %vm890_vm4, %v1057_v60, 0.0  ;;  %v950_v17 = vsel %vm890_vm4, %v2118_v55, 0.0 }
 0x12d   : > { %884 = vst.msk [vmem:[%s1702_s9 + $0xec] sm:$0xf] %vm824_vm3, %v819_v8  ;;  %v1059_v57 = vmul.f32 %v2160_v54, %v2160_v54  ;;  %v1061_v55 = vmul.f32 %v1838_v23, %v1838_v23 }
 0x12e   : > { %v943_v35 = vadd.f32 %v942_v7, %v941_v9  ;;  %v1142_v41 = vadd.f32 %v1141_v22, %v1140_v26  ;;  %v1060_v7 = vmul.f32 %v1827_v16, %v1827_v16  ;;  %v1151_v9 = vsel %vm890_vm4, %v1058_v2, 0.0 }
 0x12f   : > { %v952_v26 = vsel %vm890_vm4, %v2160_v54, 0.0  ;;  %v1153_v21 = vsel %vm890_vm4, %v1059_v57, 0.0  ;;  %v1062_v54 = vmul.f32 %v1873_v42, %v1873_v42  ;;  %v958_v16 = vsel %vm890_vm4, %v1873_v42, 0.0 }
 0x130   : > { %v945_v19 = vadd.f32 %v944_v62, %v943_v35  ;;  %v1144_v38 = vadd.f32 %v1143_v31, %v1142_v41  ;;  %v750_v18 = vpop.f32.mrf.mxu3  ;;  %v1155_v62 = vsel %vm890_vm4, %v1060_v7, 0.0  ;;  %v1064_v42 = vmul.f32 %v1915_v63, %v1915_v63 }
 0x132   : > { %v947_v3 = vadd.f32 %v946_v46, %v945_v19  ;;  %v1146_v4 = vadd.f32 %v1145_v51, %v1144_v38  ;;  %v1157_v19 = vsel %vm890_vm4, %v1061_v55, 0.0  ;;  %v1063_v38 = vmul.f32 %v1886_v50, %v1886_v50 }
 0x133   : > { %v2327_v51 = vadd.f32 %v1770_v33, %v750_v18  ;;  %v1163_v57 = vsel %vm890_vm4, %v1064_v42, 0.0  ;;  %v964_v18 = vsel %vm890_vm4, %v1933_v10, 0.0 }
 0x134   : > { %v1148_v58 = vadd.f32 %v1147_v48, %v1146_v4  ;;  %v949_v15 = vadd.f32 %v948_v12, %v947_v3  ;;  %v1159_v3 = vsel %vm890_vm4, %v1062_v54, 0.0  ;;  %v960_v4 = vsel %vm890_vm4, %v1886_v50, 0.0 }
 0x135   : > { %v820_v8 = vpack.c.bf16 %v2327_v51, %v2327_v51 }
 0x136   : > { %v1150_v22 = vadd.f32 %v1149_v32, %v1148_v58  ;;  %v951_v29 = vadd.f32 %v950_v17, %v949_v15  ;;  %v1161_v58 = vsel %vm890_vm4, %v1063_v38, 0.0  ;;  %v962_v15 = vsel %vm890_vm4, %v1915_v63, 0.0 }
 0x137   : > { %v1065_v32 = vmul.f32 %v1933_v10, %v1933_v10  ;;  %885 = vst.msk [vmem:[%s1702_s9 + $0xf0] sm:$0xf] %vm824_vm3, %v820_v8  ;;  %v968_v10 = vsel %vm890_vm4, %v1989_v44, 0.0 }
 0x138   : > { %v1152_v31 = vadd.f32 %v1151_v9, %v1150_v22  ;;  %v953_v6 = vadd.f32 %v952_v26, %v951_v29  ;;  %v752_v46 = vpop.f32.mrf.mxu3  ;;  %v1066_v22 = vmul.f32 %v1971_v27, %v1971_v27  ;;  %v966_v9 = vsel %vm890_vm4, %v1971_v27, 0.0 }
 0x139   : > { %v2330_v61 = vadd.f32 %v1770_v33, %v752_v46  ;;  %v1165_v63 = vsel %vm890_vm4, %v1065_v32, 0.0  ;;  %v1067_v26 = vmul.f32 %v1989_v44, %v1989_v44  ;;  %v970_v27 = vsel %vm890_vm4, %v2035_v13, 0.0 }
 0x13a   : > { %v955_v35 = vadd.f32 %v954_v20, %v953_v6  ;;  %v1154_v41 = vadd.f32 %v1153_v21, %v1152_v31  ;;  %v1167_v55 = vsel %vm890_vm4, %v1066_v22, 0.0  ;;  %v1068_v21 = vmul.f32 %v2035_v13, %v2035_v13 }
 0x13b   : > { %v821_v2 = vpack.c.bf16 %v2330_v61, %v2330_v61  ;;  %v972_v44 = vsel %vm890_vm4, %v2047_v25, 0.0  ;;  %v974_v13 = vsel %vm890_vm4, %v2121_v47, 0.0  ;;  %v1074_v22 = vmul.f32 %v2260_v5, %v2260_v5 }
 0x13c   : > { %v957_v49 = vadd.f32 %v956_v37, %v955_v35  ;;  %v1156_v36 = vadd.f32 %v1155_v62, %v1154_v41  ;;  %v1169_v62 = vsel %vm890_vm4, %v1067_v26, 0.0  ;;  %v1069_v37 = vmul.f32 %v2047_v25, %v2047_v25 }
 0x13d   : > { %886 = vst.msk [vmem:[%s1702_s9 + $0xf4] sm:$0xf] %vm824_vm3, %v821_v2 }
 0x13e   : > { %v959_v60 = vadd.f32 %v958_v16, %v957_v49  ;;  %v1158_v23 = vadd.f32 %v1157_v19, %v1156_v36  ;;  %v1171_v36 = vsel %vm890_vm4, %v1068_v21, 0.0  ;;  %v1070_v19 = vmul.f32 %v2121_v47, %v2121_v47 }
 0x13f   : > { %v1173_v46 = vsel %vm890_vm4, %v1069_v37, 0.0  ;;  %v1072_v47 = vmul.f32 %v2192_v52, %v2192_v52  ;;  %v986_v21 = vsel %vm890_vm4, %v1918_v0, 0.0  ;;  %v988_v37 = vsel %vm890_vm4, %v1936_v11, 0.0 }
 0x140   : > { %v961_v48 = vadd.f32 %v960_v4, %v959_v60  ;;  %v1160_v12 = vadd.f32 %v1159_v3, %v1158_v23  ;;  %v755_v31 = vpop.f32.mrf.mxu3  ;;  %v1071_v60 = vmul.f32 %v2132_v1, %v2132_v1  ;;  %v1175_v8 = vsel %vm890_vm4, %v1070_v19, 0.0 }
 0x141   : > { %v2381_v23 = vadd.f32 %v1770_v33, %v755_v31 }
 0x142   : > { %v963_v50 = vadd.f32 %v962_v15, %v961_v48  ;;  %v1162_v17 = vadd.f32 %v1161_v58, %v1160_v12  ;;  %v976_v48 = vsel %vm890_vm4, %v2132_v1, 0.0  ;;  %v1177_v32 = vsel %vm890_vm4, %v1071_v60, 0.0 }
 0x143   : > { %v822_v12 = vpack.c.bf16 %v2381_v23, %v2381_v23 }
 0x144   : > { %v1164_v29 = vadd.f32 %v1163_v57, %v1162_v17  ;;  %v965_v7 = vadd.f32 %v964_v18, %v963_v50  ;;  %v1073_v50 = vmul.f32 %v2198_v59, %v2198_v59  ;;  %v1179_v57 = vsel %vm890_vm4, %v1072_v47, 0.0 }
 0x145   : > { %887 = vst.msk [vmem:[%s1702_s9 + $0xf8] sm:$0xf] %vm824_vm3, %v822_v12  ;;  %v980_v18 = vsel %vm890_vm4, %v2198_v59, 0.0  ;;  %v1183_v59 = vsel %vm890_vm4, %v1074_v22, 0.0  ;;  %v1082_v47 = vmul.f32 %v2124_v39, %v2124_v39  ;;  %v1085_v22 = vmul.f32 %v2201_v56, %v2201_v56 }
 0x146   : > { %v967_v6 = vadd.f32 %v966_v9, %v965_v7  ;;  %v1166_v20 = vadd.f32 %v1165_v63, %v1164_v29  ;;  %v982_v63 = vsel %vm890_vm4, %v2260_v5, 0.0  ;;  %v1075_v9 = vmul.f32 %v2266_v40, %v2266_v40 }
 0x147   : > { %v1077_v5 = vmul.f32 %v1936_v11, %v1936_v11  ;;  %v992_v11 = vsel %vm890_vm4, %v1992_v45, 0.0 }
 0x148   : > { %v969_v35 = vadd.f32 %v968_v10, %v967_v6  ;;  %v1168_v41 = vadd.f32 %v1167_v55, %v1166_v20  ;;  %v757_v3 = vpop.f32.mrf.mxu3  ;;  %v1076_v6 = vmul.f32 %v1918_v0, %v1918_v0  ;;  %v984_v20 = vsel %vm890_vm4, %v2266_v40, 0.0 }
 0x149   : > { %v2384_v42 = vadd.f32 %v1770_v33, %v757_v3  ;;  %v978_v33 = vsel %vm890_vm4, %v2192_v52, 0.0  ;;  %v1181_v52 = vsel %vm890_vm4, %v1073_v50, 0.0  ;;  %v1078_v40 = vmul.f32 %v1974_v28, %v1974_v28 }
 0x14a   : > { %v971_v54 = vadd.f32 %v970_v27, %v969_v35  ;;  %v1170_v49 = vadd.f32 %v1169_v62, %v1168_v41  ;;  %v1185_v35 = vsel %vm890_vm4, %v1075_v9, 0.0  ;;  %v1187_v27 = vsel %vm890_vm4, %v1076_v6, 0.0 }
 0x14b   : > { %v823_v15 = vpack.c.bf16 %v2384_v42, %v2384_v42  ;;  %v990_v0 = vsel %vm890_vm4, %v1974_v28, 0.0  ;;  %v994_v28 = vsel %vm890_vm4, %v2038_v14, 0.0  ;;  %v1199_v50 = vsel %vm890_vm4, %v1082_v47, 0.0  ;;  %v889_v47 = vld [vmem:[%s1692_s29] sm:$0x1] }
 0x14c   : > { %v973_v16 = vadd.f32 %v972_v44, %v971_v54  ;;  %v1172_v38 = vadd.f32 %v1171_v36, %v1170_v49  ;;  %v1189_v36 = vsel %vm890_vm4, %v1077_v5, 0.0  ;;  %v1079_v44 = vmul.f32 %v1992_v45, %v1992_v45 }
 0x14d   : > { %888 = vst.msk [vmem:[%s1702_s9 + $0xfc] sm:$0xf] %vm824_vm3, %v823_v15  ;;  %v996_v45 = vsel %vm890_vm4, %v2052_v30, 0.0  ;;  %v1083_v15 = vmul.f32 %v2137_v24, %v2137_v24  ;;  %v1087_v6 = vmul.f32 %v2269_v43, %v2269_v43 }
 0x14e   : > { %v975_v4 = vadd.f32 %v974_v13, %v973_v16  ;;  %v1174_v25 = vadd.f32 %v1173_v46, %v1172_v38  ;;  %v1191_v38 = vsel %vm890_vm4, %v1078_v40, 0.0  ;;  %v1080_v46 = vmul.f32 %v2038_v14, %v2038_v14 }
 0x14f   : > { %v1193_v3 = vsel %vm890_vm4, %v1079_v44, 0.0  ;;  %v998_v14 = vsel %vm890_vm4, %v2124_v39, 0.0  ;;  %v1002_v39 = vsel %vm890_vm4, %v2195_v53, 0.0  ;;  %v1090_v40 = vmul.f32 %v2381_v23, %v2381_v23 }
 0x150   : > { %v977_v2 = vadd.f32 %v976_v48, %v975_v4  ;;  %v1176_v58 = vadd.f32 %v1175_v8, %v1174_v25  ;;  %v1081_v4 = vmul.f32 %v2052_v30, %v2052_v30  ;;  %v1195_v48 = vsel %vm890_vm4, %v1080_v46, 0.0 }
 0x151   : > { %v1000_v30 = vsel %vm890_vm4, %v2137_v24, 0.0  ;;  %v1004_v24 = vsel %vm890_vm4, %v2201_v56, 0.0  ;;  %v1008_v56 = vsel %vm890_vm4, %v2269_v43, 0.0  ;;  %v1012_v43 = vsel %vm890_vm4, %v2330_v61, 0.0 }
 0x152   : > { %v1178_v1 = vadd.f32 %v1177_v32, %v1176_v58  ;;  %v979_v17 = vadd.f32 %v978_v33, %v977_v2  ;;  %v1197_v58 = vsel %vm890_vm4, %v1081_v4, 0.0 }
 0x154   : > { %v1180_v29 = vadd.f32 %v1179_v57, %v1178_v1  ;;  %v981_v7 = vadd.f32 %v980_v18, %v979_v17  ;;  %v1084_v1 = vmul.f32 %v2195_v53, %v2195_v53  ;;  %v1201_v18 = vsel %vm890_vm4, %v1083_v15, 0.0 }
 0x155   : > { %v1006_v53 = vsel %vm890_vm4, %v2263_v34, 0.0 }
 0x156   : > { %v1182_v26 = vadd.f32 %v1181_v52, %v1180_v29  ;;  %v983_v31 = vadd.f32 %v982_v63, %v981_v7  ;;  %v1203_v52 = vsel %vm890_vm4, %v1084_v1, 0.0  ;;  %v1086_v63 = vmul.f32 %v2263_v34, %v2263_v34 }
 0x157   : > { %v1010_v34 = vsel %vm890_vm4, %v2327_v51, 0.0 }
 0x158   : > { %v1184_v55 = vadd.f32 %v1183_v59, %v1182_v26  ;;  %v985_v10 = vadd.f32 %v984_v20, %v983_v31  ;;  %v1205_v31 = vsel %vm890_vm4, %v1085_v22, 0.0 }
 0x15a   : > { %v987_v41 = vadd.f32 %v986_v21, %v985_v10  ;;  %v1186_v62 = vadd.f32 %v1185_v35, %v1184_v55  ;;  %v1207_v55 = vsel %vm890_vm4, %v1086_v63, 0.0  ;;  %v1088_v10 = vmul.f32 %v2327_v51, %v2327_v51 }
 0x15b   : > { %v1209_v35 = vsel %vm890_vm4, %v1087_v6, 0.0  ;;  %v1014_v51 = vsel %vm890_vm4, %v2381_v23, 0.0 }
 0x15c   : > { %v989_v54 = vadd.f32 %v988_v37, %v987_v41  ;;  %v1188_v49 = vadd.f32 %v1187_v27, %v1186_v62  ;;  %v1089_v41 = vmul.f32 %v2330_v61, %v2330_v61  ;;  %v1211_v37 = vsel %vm890_vm4, %v1088_v10, 0.0 }
 0x15d   : > { %v1016_v61 = vsel %vm890_vm4, %v2384_v42, 0.0 }
 0x15e   : > { %v991_v19 = vadd.f32 %v990_v0, %v989_v54  ;;  %v1190_v16 = vadd.f32 %v1189_v36, %v1188_v49  ;;  %v1213_v36 = vsel %vm890_vm4, %v1089_v41, 0.0  ;;  %v1091_v0 = vmul.f32 %v2384_v42, %v2384_v42 }
 0x160   : > { %v993_v13 = vadd.f32 %v992_v11, %v991_v19  ;;  %v1192_v60 = vadd.f32 %v1191_v38, %v1190_v16  ;;  %v1215_v16 = vsel %vm890_vm4, %v1090_v40, 0.0  ;;  %v1217_v46 = vsel %vm890_vm4, %v1091_v0, 0.0 }
 0x162   : > { %v995_v25 = vadd.f32 %v994_v28, %v993_v13  ;;  %v1194_v8 = vadd.f32 %v1193_v3, %v1192_v60 }
 0x164   : > { %v1196_v12 = vadd.f32 %v1195_v48, %v1194_v8  ;;  %v997_v2 = vadd.f32 %v996_v45, %v995_v25 }
 0x166   : > { %v999_v32 = vadd.f32 %v998_v14, %v997_v2  ;;  %v1198_v33 = vadd.f32 %v1197_v58, %v1196_v12  ;;  %v1027_v2 = vld [vmem:[%s1692_s29 + $0x1] sm:$0x1] }
 0x168   : > { %v1001_v17 = vadd.f32 %v1000_v30, %v999_v32  ;;  %v1200_v57 = vadd.f32 %v1199_v50, %v1198_v33 }
 0x16a   : > { %v1003_v29 = vadd.f32 %v1002_v39, %v1001_v17  ;;  %v1202_v7 = vadd.f32 %v1201_v18, %v1200_v57 }
 0x16c   : > { %v1005_v9 = vadd.f32 %v1004_v24, %v1003_v29  ;;  %v1204_v26 = vadd.f32 %v1203_v52, %v1202_v7 }
 0x16e   : > { %v1007_v59 = vadd.f32 %v1006_v53, %v1005_v9  ;;  %v1206_v20 = vadd.f32 %v1205_v31, %v1204_v26 }
 0x170   : > { %v1009_v21 = vadd.f32 %v1008_v56, %v1007_v59  ;;  %v1208_v5 = vadd.f32 %v1207_v55, %v1206_v20 }
 0x172   : > { %v1210_v62 = vadd.f32 %v1209_v35, %v1208_v5  ;;  %v1011_v27 = vadd.f32 %v1010_v34, %v1009_v21 }
 0x174   : > { %v1212_v54 = vadd.f32 %v1211_v37, %v1210_v62  ;;  %v1013_v49 = vadd.f32 %v1012_v43, %v1011_v27 }
 0x176   : > { %v1214_v44 = vadd.f32 %v1213_v36, %v1212_v54  ;;  %v1015_v19 = vadd.f32 %v1014_v51, %v1013_v49 }
 0x178   : > { %v1216_v38 = vadd.f32 %v1215_v16, %v1214_v44  ;;  %v1017_v11 = vadd.f32 %v1016_v61, %v1015_v19 }
 0x17a   : > { %v1018_v13 = vrot.slane %v1017_v11, 4  ;;  %v1218_v60 = vadd.f32 %v1217_v46, %v1216_v38 }
 0x17c   : > { %v1019_v23 = vadd.f32 %v1018_v13, %v1017_v11  ;;  %v1219_v3 = vrot.slane %v1218_v60, 4 }
 0x17e   : > { %v1020_v28 = vrot.slane %v1019_v23, 2  ;;  %v1220_v4 = vadd.f32 %v1219_v3, %v1218_v60 }
 0x180   : > { %v1021_v25 = vadd.f32 %v1020_v28, %v1019_v23  ;;  %v1221_v8 = vrot.slane %v1220_v4, 2 }
 0x182   : > { %v1022_v48 = vrot.slane %v1021_v25, 1  ;;  %v1222_v45 = vadd.f32 %v1221_v8, %v1220_v4 }
 0x184   : > { %v1023_v12 = vadd.f32 %v1022_v48, %v1021_v25  ;;  %v1223_v42 = vrot.slane %v1222_v45, 1 }
 0x186   : > { %v1024_v58 = vadd.f32 %v1023_v12, %v889_v47  ;;  %v1224_v14 = vadd.f32 %v1223_v42, %v1222_v45 }
 0x188   : > { %1026 = vst.msk [vmem:[%s1692_s29] sm:$0x1] %vm1025_vm5, %v1024_v58  ;;  %v1225_v15 = vadd.f32 %v1224_v14, %v1027_v2 }
 0x18a   : > { %1226 = vst.msk [vmem:[%s1692_s29 + $0x1] sm:$0x1] %vm1025_vm5, %v1225_v15 }
 0x18b PF: > { %s15_s19 = sadd.s32 1, %s1631_s19   ;;  %s2522_s15 = smov %s1623_s17 }
 0x18c   : > { %p12_p8 = scmp.ge.s32.totalorder %s15_s19, 6   ;;  %s2523_s16 = smov %s1627_s18 }
 0x18d   : > { %s2524_s17 = smov %s2527_s20  ;;  %s2525_s18 = smov %s2531_s21 }
 0x18e   :  { %14 = sbr.rel (!%p12_p8) target bundleno = 3 (0x3), region = 78 }

// kernel: patch_embed_forward.5
= control target key start
LH: loop header
LB: loop body
LE: loop exit
PB: predicated region body
PF: predicated region fallthrough
CT: control target
= control target key end

     0   :  { %8 = vsyncpa [#allocation3], 0  ;;  %s695_s0 = inlined_call_operand.vmem [shape: bf16[2048,32], index: 0, kind: input, shape index: {}]   ;;  %s696_s1 = inlined_call_operand.vmem [shape: f32[1,32], index: 1, kind: input, shape index: {}]   ;;  %s697_s2 = inlined_call_operand.vmem [shape: f32[1,32], index: 2, kind: input, shape index: {}]   ;;  %s698_s3 = inlined_call_operand.hbm [shape: f32[2048,32], index: 3, kind: output, shape index: {}]  }
   0x1   :  { %10 = vsyncpa [#allocation3 + $0x1], 0  ;;  %s520_s12 = smov 0   ;;  %s522_s13 = smov 0  }
   0x2   :  { %s524_s14 = smov 0   ;;  %s526_s15 = smov 0  }
   0x3 LB: > { %s541_s16 = sadd.s32 4294967295, %s496_s15   ;;  %s339_s17 = sadd.s32 4294967294, %s496_s15   ;;  %s496_s15 = sphi %s526_s15, %s704_s15   ;;  %s492_s14 = sphi %s524_s14, %s703_s14   ;;  %s488_s13 = sphi %s522_s13, %s702_s13   ;;  %s484_s12 = sphi %s520_s12, %s701_s12  }
   0x4   : > { %s545_s18 = sadd.s32 1, %s496_s15   ;;  %s91_s19 = sadd.s32 1, %s492_s14 }
   0x5   : > { %s88_s20 = ssub.s32 %s496_s15, %s545_s18  ;;  %p101_p0 = scmp.ne.s32.totalorder %s492_s14, %s488_s13 }
   0x6   : > { %p89_p1 = scmp.eq.s32.totalorder %s88_s20, 0  ;;  %p102_p2 = scmp.eq.s32.totalorder %s541_s16, 15 }
   0x7   : > { %p107_p3 = scmp.ne.s32.totalorder %s488_s13, %s484_s12  ;;  %p108_p4 = scmp.eq.s32.totalorder %s339_s17, 15 }
   0x8   : > { %s556_s21 = scalar_select %p89_p1, %s492_s14, %s91_s19  }
   0x9   : > { %p558_p5 = por %p102_p2, %p101_p0  ;;  %p562_p6 = por %p108_p4, %p107_p3 }
   0xa   : > { %p342_p7 = scmp.ge.s32.totalorder %s496_s15, 1  ;;  %p141_p8 = scmp.lt.s32.totalorder %s496_s15, 17 }
   0xc   : > { %p142_p9 = pnand %p342_p7, %p141_p8 }
   0xd   : > { %s344_s24 = sshll.u32 (!%p142_p9), %s541_s16, 4  ;;  %s162_s25 = sand.u32 (!%p142_p9), 1, %s488_s13  }
   0xe   : > { %145 = sbr.rel (%p142_p9) target bundleno = 48 (0x30), region = 32  ;;  %p166_p10 = scmp.lt.s32.totalorder (!%p142_p9), %s344_s24, 255 }
   0xf   : > { %s343_s5 = sshll.u32 (!%p142_p9), %s162_s25, 7  ;;  %s351_s9 = sshll.u32 (!%p142_p9), %s541_s16, 7 }
  0x10   : > { %s608_s8 = scalar_lea.vmem (!%p142_p9), [#allocation2], %s343_s5  ;;  %s273_s16 = scalar_lea.hbm (!%p142_p9), %s698_s3, %s351_s9 }
  0x11   : > { %s274_s17 = sshll.u32 (!%p142_p9), %s608_s8, 4  ;;  %s276_s19 = sshll.u32 (!%p142_p9), %s273_s16, 4  ;;  %s275_s17 = int_to_ptr.vmem [resolvable:$true] %s274_s17  ;;  %s277_s19 = int_to_ptr.hbm [resolvable:$true] %s276_s19 }
  0x12   : > { %s262_s20 = scalar_lea.sflag (!%p142_p9), [#allocation3], %s162_s25 }
  0x13   : > { %s706_s24 = smov (!%p166_p10, %s344_s24), 255  ;;  %v578_v0 = vld [vmem:[%s696_s1] ss:$0 sm:$0xff]  ;;  %vm244_vm0 = vcmask 261120  }
  0x14   : > { %s345_s26 = sshll.u32 %s706_s24, 2  ;;  %v588_v5 = vld [vmem:[%s697_s2] ss:$0 sm:$0xff]  ;;  %s448_s24 = sshra.s32 %s277_s19, 4  ;;  %s449_s24 = int_to_ptr.hbm [resolvable:$true] %s448_s24 }
  0x15   : > { %s573_s29 = scalar_lea.vmem %s695_s0, %s345_s26  ;;  %s450_s26 = scalar_lea.hbm %s449_s24, 128 }
  0x16   : > { %v353_v1 = vld [vmem:[%s573_s29] sm:$0xff]   ;;  %v384_v2 = vld [vmem:[%s573_s29 + $0x8] sm:$0xff]   ;;  %v385_v3 = vld [vmem:[%s573_s29 + $0x10] sm:$0xff]   ;;  %p451_p11 = scmp.ne.s32.totalorder %s449_s24, %s450_s26  ;;  %p455_p0 = scmp.lt.s32.totalorder %s449_s24, %s698_s3 }
  0x17   : > { %v354_v4 = vunpack.c.l.bf16 %v353_v1  ;;  %v355_v6 = vunpack.c.h.bf16 %v353_v1  ;;  %v358_v7 = vunpack.c.l.bf16 %v384_v2  ;;  %v359_v8 = vunpack.c.h.bf16 %v384_v2  ;;  %v386_v9 = vld [vmem:[%s573_s29 + $0x18] sm:$0xff]   ;;  %v387_v21 = vld [vmem:[%s573_s29 + $0x20] sm:$0xff]   ;;  %v388_v22 = vld [vmem:[%s573_s29 + $0x28] sm:$0xff]  }
  0x18   : > { %v362_v10 = vunpack.c.l.bf16 %v385_v3  ;;  %v363_v11 = vunpack.c.h.bf16 %v385_v3  ;;  %v366_v12 = vunpack.c.l.bf16 %v386_v9  ;;  %v367_v13 = vunpack.c.h.bf16 %v386_v9  ;;  %v389_v26 = vld [vmem:[%s573_s29 + $0x30] sm:$0xff]   ;;  %v390_v30 = vld [vmem:[%s573_s29 + $0x38] sm:$0xff]   ;;  %p452_p12 = pnand %p451_p11, %p558_p5  ;;  %s454_s29 = scalar_lea.hbm %s698_s3, 2048 }
  0x19   : > { %v208_v14 = vmul.f32 %v578_v0, %v354_v4  ;;  %v209_v15 = vmul.f32 %v578_v0, %v355_v6  ;;  %v210_v16 = vmul.f32 %v578_v0, %v358_v7  ;;  %v211_v17 = vmul.f32 %v578_v0, %v359_v8  ;;  %p456_p1 = scmp.lt.s32.totalorder %s454_s29, %s450_s26 }
  0x1a   : > { %v212_v18 = vmul.f32 %v578_v0, %v362_v10  ;;  %v213_v19 = vmul.f32 %v578_v0, %v363_v11  ;;  %v214_v20 = vmul.f32 %v578_v0, %v366_v12  ;;  %v215_v29 = vmul.f32 %v578_v0, %v367_v13  ;;  %p453_p13 = pneg %p452_p12 }
  0x1b   : > { %v228_v23 = vadd.f32 %v588_v5, %v208_v14  ;;  %v229_v24 = vadd.f32 %v588_v5, %v209_v15  ;;  %v230_v25 = vadd.f32 %v588_v5, %v210_v16  ;;  %v231_v27 = vadd.f32 %v588_v5, %v211_v17  ;;  %p457_p2 = por %p456_p1, %p455_p0 }
  0x1c   : > { %v232_v28 = vadd.f32 %v588_v5, %v212_v18  ;;  %v370_v31 = vunpack.c.l.bf16 %v387_v21  ;;  %v371_v32 = vunpack.c.h.bf16 %v387_v21  ;;  %v374_v33 = vunpack.c.l.bf16 %v388_v22 }
  0x1d   : > { %245 = vst.msk [vmem:[%s608_s8] sm:$0xff] %vm244_vm0, %v228_v23  ;;  %v375_v34 = vunpack.c.h.bf16 %v388_v22  ;;  %v233_v35 = vadd.f32 %v588_v5, %v213_v19  ;;  %v234_v36 = vadd.f32 %v588_v5, %v214_v20  ;;  %v378_v37 = vunpack.c.l.bf16 %v389_v26  ;;  %p458_p3 = pnand %p457_p2, %p453_p13 }
  0x1e   : > { %246 = vst.msk [vmem:[%s608_s8 + $0x8] sm:$0xff] %vm244_vm0, %v229_v24  ;;  %v379_v38 = vunpack.c.h.bf16 %v389_v26  ;;  %v216_v39 = vmul.f32 %v578_v0, %v370_v31  ;;  %v217_v40 = vmul.f32 %v578_v0, %v371_v32  ;;  %v218_v41 = vmul.f32 %v578_v0, %v374_v33 }
  0x1f   : > { %247 = vst.msk [vmem:[%s608_s8 + $0x10] sm:$0xff] %vm244_vm0, %v230_v25  ;;  %v382_v42 = vunpack.c.l.bf16 %v390_v30  ;;  %v235_v43 = vadd.f32 %v588_v5, %v215_v29  ;;  %v219_v44 = vmul.f32 %v578_v0, %v375_v34  ;;  %v383_v45 = vunpack.c.h.bf16 %v390_v30 }
  0x20   : > { %248 = vst.msk [vmem:[%s608_s8 + $0x18] sm:$0xff] %vm244_vm0, %v231_v27  ;;  %v236_v46 = vadd.f32 %v588_v5, %v216_v39  ;;  %v220_v47 = vmul.f32 %v578_v0, %v378_v37  ;;  %v237_v48 = vadd.f32 %v588_v5, %v217_v40  ;;  %v221_v49 = vmul.f32 %v578_v0, %v379_v38 }
  0x21   : > { %249 = vst.msk [vmem:[%s608_s8 + $0x20] sm:$0xff] %vm244_vm0, %v232_v28  ;;  %v238_v50 = vadd.f32 %v588_v5, %v218_v41  ;;  %v222_v51 = vmul.f32 %v578_v0, %v382_v42  ;;  %v239_v52 = vadd.f32 %v588_v5, %v219_v44  ;;  %v223_v53 = vmul.f32 %v578_v0, %v383_v45 }
  0x22   : > { %250 = vst.msk [vmem:[%s608_s8 + $0x28] sm:$0xff] %vm244_vm0, %v233_v35  ;;  %v240_v54 = vadd.f32 %v588_v5, %v220_v47  ;;  %v241_v55 = vadd.f32 %v588_v5, %v221_v49 }
  0x23   : > { %251 = vst.msk [vmem:[%s608_s8 + $0x30] sm:$0xff] %vm244_vm0, %v234_v36  ;;  %v242_v56 = vadd.f32 %v588_v5, %v222_v51  ;;  %v243_v57 = vadd.f32 %v588_v5, %v223_v53 }
  0x24   : > { %252 = vst.msk [vmem:[%s608_s8 + $0x38] sm:$0xff] %vm244_vm0, %v235_v43 }
  0x25   : > { %253 = vst.msk [vmem:[%s608_s8 + $0x40] sm:$0xff] %vm244_vm0, %v236_v46 }
  0x26   : > { %254 = vst.msk [vmem:[%s608_s8 + $0x48] sm:$0xff] %vm244_vm0, %v237_v48 }
  0x27   : > { %255 = vst.msk [vmem:[%s608_s8 + $0x50] sm:$0xff] %vm244_vm0, %v238_v50 }
  0x28   : > { %256 = vst.msk [vmem:[%s608_s8 + $0x58] sm:$0xff] %vm244_vm0, %v239_v52 }
  0x29   : > { %257 = vst.msk [vmem:[%s608_s8 + $0x60] sm:$0xff] %vm244_vm0, %v240_v54 }
  0x2a   : > { %258 = vst.msk [vmem:[%s608_s8 + $0x68] sm:$0xff] %vm244_vm0, %v241_v55 }
  0x2b   : > { %259 = vst.msk [vmem:[%s608_s8 + $0x70] sm:$0xff] %vm244_vm0, %v242_v56 }
  0x2c   : > { %260 = vst.msk [vmem:[%s608_s8 + $0x78] sm:$0xff] %vm244_vm0, %v243_v57 }
  0x2d   : > { %461 = shalt.err (!%p458_p3)
}
  0x2e   : > { %s498_s25 = smov 128   ;;  %s499_s5 = smov 8  }
  0x2f   : > { %391 = dma.vmem_to_hbm [thread:$0]  (%p558_p5), %s275_s17, 2048, %s277_s19, %s262_s20, %s498_s25, %s498_s25, %s499_s5  }
  0x30 PF: > { %p397_p4 = scmp.ge.s32.totalorder %s496_s15, 2  ;;  %s291_s6 = sand.u32 1, %s484_s12  }
  0x31   : > { %s292_s7 = scalar_lea.sflag [#allocation3], %s291_s6 }
  0x32   : > { %p394_p7 = pnand %p397_p4, %p562_p6 }
  0x34   : > { %p395_p8 = pneg %p394_p7 }
  0x36   : > { %479 = dma.done.wait (%p395_p8), %s292_s7, 2048  }
  0x37   : > { %481 = vsyncadd (%p395_p8), %s292_s7, 4294965248  ;;  %p13_p9 = scmp.ge.s32.totalorder %s545_s18, 18   ;;  %s701_s12 = smov %s488_s13 }
  0x38   : > { %s702_s13 = smov %s492_s14  ;;  %s703_s14 = smov %s556_s21 }
  0x39   : > { %s704_s15 = smov %s545_s18  ;;  %15 = sbr.rel (!%p13_p9) target bundleno = 3 (0x3), region = 67 }
  0x3e   :  { %298 = vsyncpa [#allocation3], 1 }
  0x3f   :  { %300 = vsyncpa [#allocation3 + $0x1], 1 }

// kernel: patch_embed_forward.4
= control target key start
LH: loop header
LB: loop body
LE: loop exit
PB: predicated region body
PF: predicated region fallthrough
CT: control target
= control target key end

     0   :  { %s4272_s21 = smov 0   ;;  %s4274_s22 = smov 0   ;;  %s6518_s0 = inlined_call_operand.vmem [shape: bf16[8,16,16,16], index: 0, kind: input, shape index: {}]   ;;  %s6519_s1 = inlined_call_operand.vmem [shape: f32[1,16], index: 1, kind: input, shape index: {}]   ;;  %s6520_s2 = inlined_call_operand.vmem [shape: f32[1,16], index: 2, kind: input, shape index: {}]   ;;  %s6521_s3 = inlined_call_operand.vmem [shape: bf16[9,16,32], index: 3, kind: input, shape index: {}]   ;;  %s6522_s4 = inlined_call_operand.vmem [shape: f32[1,32], index: 4, kind: input, shape index: {}]   ;;  %s6523_s5 = inlined_call_operand.vmem [shape: bf16[8,16,16,32], index: 5, kind: output, shape index: {0}]   ;;  %s6524_s6 = inlined_call_operand.vmem [shape: f32[2,2,32], index: 6, kind: output, shape index: {1}]  }
   0x1   :  { %s4276_s23 = smov 0   ;;  %s4278_s24 = smov 0  }
   0x2   :  { %s4280_s25 = smov 0  }
   0x3 LB: > { %s26_s26 = sadd.s32 1, %s4225_s23  ;;  %s29_s27 = sadd.s32 1, %s4229_s24  ;;  %s4233_s25 = sphi %s4280_s25, %s17_s25   ;;  %s4229_s24 = sphi %s4278_s24, %s6638_s24   ;;  %s4225_s23 = sphi %s4276_s23, %s6637_s23   ;;  %s4221_s22 = sphi %s4274_s22, %s6636_s22   ;;  %s4217_s21 = sphi %s4272_s21, %s6635_s21  }
   0x4   : > { %p27_p0 = scmp.ge.s32.totalorder %s26_s26, 4  ;;  %p3749_p1 = scmp.ge.s32.totalorder %s4233_s25, 1 }
   0x5   : > { %p239_p2 = scmp.lt.s32.totalorder %s4233_s25, 9 }
   0x6   : > { %s6640_s26 = smov (%p27_p0, %s26_s26), 0  ;;  %s6642_s27 = smov (!%p27_p0, %s29_s27), %s4229_s24 }
   0x7   : > { %p240_p3 = pnand %p3749_p1, %p239_p2  ;;  %p31_p4 = scmp.ge.s32.totalorder %s6642_s27, 2 }
   0x8   : > { %s3750_s28 = sshll.u32 (!%p240_p3), %s4221_s22, 2  ;;  %p295_p5 = scmp.lt.s32.totalorder (!%p240_p3), %s4221_s22, 1 }
   0x9   : > { %s6644_s27 = smov (%p31_p4, %s6642_s27), 0  ;;  %243 = sbr.rel (%p240_p3) target bundleno = 1093 (0x445), region = 40 }
   0xa   : > { %s278_s29 = sadd.s32 (!%p240_p3), %s4217_s21, %s3750_s28  ;;  %p3757_p7 = scmp.ne.s32.totalorder (!%p240_p3), %s4217_s21, 0 }
   0xb   : > { %p279_p6 = scmp.lt.s32.totalorder (!%p240_p3), %s278_s29, 7 }
   0xe   : > { %s6646_s22 = smov (!%p295_p5, %s4221_s22), 1  ;;  %s6648_s29 = smov (!%p279_p6, %s278_s29), 7 }
   0xf   : > { %s3756_s30 = sshll.u32 %s6646_s22, 1  ;;  %s3988_s7 = sshll.u32 %s6648_s29, 7 }
  0x10   : > { %s4305_s10 = scalar_lea.vmem %s6524_s6, %s3756_s30  ;;  %s4310_s13 = scalar_lea.vmem %s6518_s0, %s3988_s7 }
  0x11   : > { %s4315_s16 = scalar_lea.vmem %s6523_s5, %s3988_s7  ;;  %303 = sbr.rel (%p3757_p7) target bundleno = 24 (0x18), region = 44 }
  0x16   : > { %vm304_vm0 = vcmask 254976   ;;  %v4235_v0 = vmov 0.0  }
  0x17   : > { %305 = vst.msk [vmem:[%s4305_s10] sm:$0x3] %vm304_vm0, %v4235_v0 }
  0x18 PF: > { %v3991_v1 = vld [vmem:[%s6521_s3 + $0x18] sm:$0xff]  ;;  %v4066_v2 = vld [vmem:[%s4310_s13 + $0x20] sm:$0xff]   ;;  %vm1850_vm1 = vcmask 130048   ;;  %vm1859_vm2 = vcmask 122880  }
  0x19   : > { %v4325_v3 = vld [vmem:[%s6519_s1] ss:$0 sm:$0xff]  ;;  %4078 = vmatpush.bf16.msra.mxu1 %v3991_v1  ;;  %4079 = vmatpush.bf16.msra.mxu2 %v3991_v1  ;;  %v4017_v5 = vunpack.c.l.bf16 %v4066_v2  ;;  %v4018_v6 = vunpack.c.h.bf16 %v4066_v2 }
  0x1a   : > { %v4330_v4 = vld [vmem:[%s6520_s2] ss:$0 sm:$0xff]  ;;  %4080 = vmatpush.bf16.msra.mxu3 %v3991_v1  ;;  %2048 = vmatpush.bf16.msra.mxu0 %v3991_v1 }
  0x1b   : > { %v4070_v7 = vld [vmem:[%s4310_s13 + $0x40] sm:$0xff]   ;;  %v383_v12 = vmul.f32 %v4325_v3, %v4017_v5  ;;  %v384_v13 = vmul.f32 %v4325_v3, %v4018_v6 }
  0x1c   : > { %v4074_v8 = vld [vmem:[%s4310_s13 + $0x60] sm:$0xff]   ;;  %v4033_v9 = vunpack.c.l.bf16 %v4070_v7  ;;  %v4034_v10 = vunpack.c.h.bf16 %v4070_v7 }
  0x1d   : > { %v4049_v11 = vunpack.c.l.bf16 %v4074_v8  ;;  %v418_v17 = vadd.f32 %v4330_v4, %v383_v12  ;;  %v419_v18 = vadd.f32 %v4330_v4, %v384_v13  ;;  %v4050_v23 = vunpack.c.h.bf16 %v4074_v8 }
  0x1e   : > { %v391_v14 = vmul.f32 %v4325_v3, %v4033_v9  ;;  %v392_v15 = vmul.f32 %v4325_v3, %v4034_v10 }
  0x1f   : > { %v399_v16 = vmul.f32 %v4325_v3, %v4049_v11  ;;  %v4347_v21 = vmul.f32 0.70710677, %v418_v17  ;;  %v4349_v22 = vmul.f32 0.70710677, %v419_v18  ;;  %v4368_v31 = vmul.f32 0.5, %v418_v17 }
  0x20   : > { %v4342_v19 = vadd.f32 %v4330_v4, %v391_v14  ;;  %v4345_v20 = vadd.f32 %v4330_v4, %v392_v15  ;;  %v400_v34 = vmul.f32 %v4325_v3, %v4050_v23  ;;  %v4375_v35 = vmul.f32 0.5, %v419_v18 }
  0x21   : > { %v4358_v26 = vadd.f32 %v4330_v4, %v399_v16  ;;  %v826_v27 = vmul.f32 %v4347_v21, %v4347_v21  ;;  %v866_v28 = vmul.f32 %v4349_v22, %v4349_v22 }
  0x22   : > { %v4352_v24 = vmul.f32 0.70710677, %v4342_v19  ;;  %v4355_v25 = vmul.f32 0.70710677, %v4345_v20  ;;  %v4391_v51 = vadd.f32 %v4330_v4, %v400_v34 }
  0x23   : > { %v4370_v32 = vmin.f32 %v826_v27, 16.0  ;;  %v4372_v33 = vmin.f32 %v866_v28, 16.0  ;;  %v4382_v38 = vmul.f32 0.70710677, %v4358_v26 }
  0x24   : > { %v1146_v29 = vmul.f32 %v4352_v24, %v4352_v24  ;;  %v1186_v30 = vmul.f32 %v4355_v25, %v4355_v25  ;;  %v4407_v11 = vmul.f32 0.70710677, %v4391_v51 }
  0x25   : > { %v828_v39 = vmul.f32 2.1237322e-06, %v4370_v32  ;;  %v839_v40 = vmul.f32 3.8918573e-05, %v4370_v32  ;;  %v868_v41 = vmul.f32 2.1237322e-06, %v4372_v33  ;;  %v1466_v15 = vmul.f32 %v4382_v38, %v4382_v38 }
  0x26   : > { %v4377_v36 = vmin.f32 %v1146_v29, 16.0  ;;  %v4379_v37 = vmin.f32 %v1186_v30, 16.0  ;;  %v879_v42 = vmul.f32 3.8918573e-05, %v4372_v33 }
  0x27   : > { %v829_v45 = vadd.f32 0.00028619796, %v828_v39  ;;  %v840_v46 = vadd.f32 0.001143296, %v839_v40  ;;  %v869_v47 = vadd.f32 0.00028619796, %v868_v41 }
  0x28   : > { %v1148_v43 = vmul.f32 2.1237322e-06, %v4377_v36  ;;  %v1159_v44 = vmul.f32 3.8918573e-05, %v4377_v36  ;;  %v880_v48 = vadd.f32 0.001143296, %v879_v42 }
  0x29   : > { %v830_v52 = vmul.f32 %v829_v45, %v4370_v32  ;;  %v841_v53 = vmul.f32 %v840_v46, %v4370_v32  ;;  %v870_v54 = vmul.f32 %v869_v47, %v4372_v33  ;;  %v1188_v55 = vmul.f32 2.1237322e-06, %v4379_v37  ;;  %v4000_v39 = vld [vmem:[%s4310_s13] sm:$0xff]  }
  0x2a   : > { %v1149_v49 = vadd.f32 0.00028619796, %v1148_v43  ;;  %v1160_v50 = vadd.f32 0.001143296, %v1159_v44  ;;  %v881_v56 = vmul.f32 %v880_v48, %v4372_v33  ;;  %v1199_v59 = vmul.f32 3.8918573e-05, %v4379_v37 }
  0x2b   : > { %v831_v60 = vadd.f32 0.0036580483, %v830_v52  ;;  %v842_v61 = vadd.f32 0.014752088, %v841_v53  ;;  %v871_v62 = vadd.f32 0.0036580483, %v870_v54 }
  0x2c   : > { %v1150_v57 = vmul.f32 %v1149_v49, %v4377_v36  ;;  %v1161_v58 = vmul.f32 %v1160_v50, %v4377_v36  ;;  %v882_v63 = vadd.f32 0.014752088, %v881_v56  ;;  %v1189_v7 = vadd.f32 0.00028619796, %v1188_v55 }
  0x2d   : > { %v832_v2 = vmul.f32 %v831_v60, %v4370_v32  ;;  %v843_v5 = vmul.f32 %v842_v61, %v4370_v32  ;;  %v872_v6 = vmul.f32 %v871_v62, %v4372_v33  ;;  %v1200_v10 = vadd.f32 0.001143296, %v1199_v59 }
  0x2e   : > { %v1151_v0 = vadd.f32 0.0036580483, %v1150_v57  ;;  %v1162_v1 = vadd.f32 0.014752088, %v1161_v58  ;;  %v883_v8 = vmul.f32 %v882_v63, %v4372_v33  ;;  %v1190_v23 = vmul.f32 %v1189_v7, %v4379_v37 }
  0x2f   : > { %v833_v12 = vadd.f32 0.05243302, %v832_v2  ;;  %v844_v13 = vadd.f32 0.112945676, %v843_v5  ;;  %v873_v14 = vadd.f32 0.05243302, %v872_v6  ;;  %v1201_v43 = vmul.f32 %v1200_v10, %v4379_v37 }
  0x30   : > { %v1152_v9 = vmul.f32 %v1151_v0, %v4377_v36  ;;  %v884_v16 = vadd.f32 0.112945676, %v883_v8  ;;  %v1163_v18 = vmul.f32 %v1162_v1, %v4377_v36  ;;  %v4236_v45 = vmov 0.0  }
  0x31   : > { %v834_v27 = vmul.f32 %v833_v12, %v4370_v32  ;;  %v845_v28 = vmul.f32 %v844_v13, %v4370_v32  ;;  %v874_v29 = vmul.f32 %v873_v14, %v4372_v33  ;;  %1865 = vst.msk [vmem:[#allocation2 + $0x78] sm:$0x1] %vm1859_vm2, %v4236_v45  ;;  %v1191_v54 = vadd.f32 0.0036580483, %v1190_v23 }
  0x32   : > { %v1153_v17 = vadd.f32 0.05243302, %v1152_v9  ;;  %v885_v30 = vmul.f32 %v884_v16, %v4372_v33  ;;  %1851 = vst.msk [vmem:[#allocation2] sm:$0xff] %vm1850_vm1, %v4236_v45  ;;  %v1164_v50 = vadd.f32 0.112945676, %v1163_v18  ;;  %v1506_v57 = vmul.f32 %v4407_v11, %v4407_v11 }
  0x33   : > { %v835_v40 = vadd.f32 0.18741608, %v834_v27  ;;  %v846_v41 = vadd.f32 0.4994258, %v845_v28  ;;  %v875_v42 = vadd.f32 0.18741608, %v874_v29  ;;  %v4001_v58 = vunpack.c.l.bf16 %v4000_v39 }
  0x34   : > { %v1154_v34 = vmul.f32 %v1153_v17, %v4377_v36  ;;  %v886_v44 = vadd.f32 0.4994258, %v885_v30  ;;  %1852 = vst.msk [vmem:[#allocation2 + $0x8] sm:$0xff] %vm1850_vm1, %v4236_v45  ;;  %v1202_v55 = vadd.f32 0.014752088, %v1201_v43  ;;  %v1165_v60 = vmul.f32 %v1164_v50, %v4377_v36 }
  0x35   : > { %v836_v47 = vmul.f32 %v835_v40, %v4370_v32  ;;  %v847_v48 = vmul.f32 %v846_v41, %v4370_v32  ;;  %v876_v49 = vmul.f32 %v875_v42, %v4372_v33  ;;  %1856 = vst.msk [vmem:[#allocation2 + $0x198] sm:$0xff] %vm1850_vm1, %v4236_v45  ;;  %v4435_v32 = vmin.f32 %v1466_v15, 16.0 }
  0x36   : > { %v1155_v46 = vadd.f32 0.18741608, %v1154_v34  ;;  %v887_v52 = vmul.f32 %v886_v44, %v4372_v33  ;;  %1857 = vst.msk [vmem:[#allocation2 + $0x1a0] sm:$0xff] %vm1850_vm1, %v4236_v45  ;;  %v4002_v61 = vunpack.c.h.bf16 %v4000_v39  ;;  %v4448_v63 = vmul.f32 0.5, %v4342_v19 }
  0x37   : > { %v4431_v56 = vadd.f32 1.0, %v847_v48  ;;  %v837_v59 = vadd.f32 1.1283791, %v836_v47  ;;  %v877_v62 = vadd.f32 1.1283791, %v876_v49  ;;  %v1192_v0 = vmul.f32 %v1191_v54, %v4379_v37 }
  0x38   : > { %v1156_v53 = vmul.f32 %v1155_v46, %v4377_v36  ;;  %v4439_v33 = vadd.f32 1.0, %v887_v52  ;;  %1861 = vst.msk [vmem:[#allocation2 + $0x18] sm:$0x1] %vm1859_vm2, %v4236_v45  ;;  %v1203_v5 = vmul.f32 %v1202_v55, %v4379_v37  ;;  %v4461_v19 = vmul.f32 0.5, %v4345_v20 }
  0x39   : > { %4126 = vrcp.f32 %v4431_v56  ;;  %v858_v1 = vand.u32 2147483647, %v4431_v56  ;;  %1862 = vst.msk [vmem:[#allocation2 + $0x30] sm:$0x1] %vm1859_vm2, %v4236_v45  ;;  %v860_v6 = vand.u32 2147483648, %v4431_v56  ;;  %v375_v8 = vmul.f32 %v4325_v3, %v4001_v58 }
  0x3a   : > { %4128 = vrcp.f32 %v4439_v33  ;;  %v1157_v2 = vadd.f32 1.1283791, %v1156_v53  ;;  %v898_v7 = vand.u32 2147483647, %v4439_v33  ;;  %1863 = vst.msk [vmem:[#allocation2 + $0x48] sm:$0x1] %vm1859_vm2, %v4236_v45  ;;  %v4465_v9 = vmul.f32 %v837_v59, %v4347_v21 }
  0x3b   : > { %vm854_vm3 = vweird.f32 %v4431_v56  ;;  %1864 = vst.msk [vmem:[#allocation2 + $0x60] sm:$0x1] %vm1859_vm2, %v4236_v45  ;;  %v1166_v10 = vadd.f32 0.4994258, %v1165_v60  ;;  %v376_v12 = vmul.f32 %v4325_v3, %v4002_v61  ;;  %v4472_v13 = vmul.f32 %v877_v62, %v4349_v22 }
  0x3c   : > { %vm894_vm4 = vweird.f32 %v4439_v33  ;;  %v900_v20 = vand.u32 2147483648, %v4439_v33  ;;  %1866 = vst.msk [vmem:[#allocation2 + $0x90] sm:$0x1] %vm1859_vm2, %v4236_v45  ;;  %v1193_v21 = vadd.f32 0.05243302, %v1192_v0  ;;  %vm4478_vm5 = vcmp.eq.f32.partialorder %v858_v1, 8.507059e+37 }
  0x3d   : > { %1867 = vst.msk [vmem:[#allocation2 + $0xa8] sm:$0x1] %vm1859_vm2, %v4236_v45  ;;  %v4485_v15 = vmul.f32 %v1157_v2, %v4352_v24  ;;  %v1167_v22 = vmul.f32 %v1166_v10, %v4377_v36  ;;  %v1204_v16 = vadd.f32 0.112945676, %v1203_v5  ;;  %v1468_v17 = vmul.f32 2.1237322e-06, %v4435_v32 }
  0x3e   : > { %v861_v23 = vor.u32 1.1754944e-38, %v860_v6  ;;  %vm4489_vm6 = vcmp.eq.f32.partialorder %v898_v7, 8.507059e+37  ;;  %1868 = vst.msk [vmem:[#allocation2 + $0xc0] sm:$0x1] %vm1859_vm2, %v4236_v45  ;;  %v1194_v28 = vmul.f32 %v1193_v21, %v4379_v37  ;;  %v4496_v29 = vmin.f32 %v1506_v57, 16.0 }
  0x3f   : > { %v4127_v18 = vpop.eup %4126  ;;  %1869 = vst.msk [vmem:[#allocation2 + $0xd8] sm:$0x1] %vm1859_vm2, %v4236_v45  ;;  %v4501_v36 = vadd.f32 1.0, %v1167_v22  ;;  %v1205_v34 = vmul.f32 %v1204_v16, %v4379_v37  ;;  %v1479_v39 = vmul.f32 3.8918573e-05, %v4435_v32  ;;  %v4509_v43 = vadd.f32 %v4330_v4, %v375_v8 }
  0x40   : > { %v4129_v24 = vpop.eup %4128  ;;  %v850_v30 = vmul.f32 %v4127_v18, %v4431_v56  ;;  %1870 = vst.msk [vmem:[#allocation2 + $0xf0] sm:$0x1] %vm1859_vm2, %v4236_v45  ;;  %v1195_v41 = vadd.f32 0.18741608, %v1194_v28  ;;  %v1469_v42 = vadd.f32 0.00028619796, %v1468_v17  ;;  %vm855_vm7 = vweird.f32 %v4127_v18 }
  0x41   : > { %v890_v40 = vmul.f32 %v4129_v24, %v4439_v33  ;;  %v901_v46 = vor.u32 1.1754944e-38, %v900_v20  ;;  %1871 = vst.msk [vmem:[#allocation2 + $0x108] sm:$0x1] %vm1859_vm2, %v4236_v45  ;;  %4130 = vrcp.f32 %v4501_v36  ;;  %vm895_vm8 = vweird.f32 %v4129_v24  ;;  %vm4527_vm9 = vmor %vm854_vm3, %vm855_vm7 }
  0x42   : > { %v851_v44 = vsub.f32 1.0, %v850_v30  ;;  %1872 = vst.msk [vmem:[#allocation2 + $0x120] sm:$0x1] %vm1859_vm2, %v4236_v45  ;;  %v1206_v48 = vadd.f32 0.4994258, %v1205_v34  ;;  %v4517_v49 = vadd.f32 %v4330_v4, %v376_v12  ;;  %v4522_v52 = vmul.f32 0.5, %v4358_v26  ;;  %vm4539_vm10 = vmor %vm894_vm4, %vm895_vm8 }
  0x43   : > { %v891_v47 = vsub.f32 1.0, %v890_v40  ;;  %1873 = vst.msk [vmem:[#allocation2 + $0x138] sm:$0x1] %vm1859_vm2, %v4236_v45  ;;  %v1470_v53 = vmul.f32 %v1469_v42, %v4435_v32  ;;  %v1480_v54 = vadd.f32 0.001143296, %v1479_v39  ;;  %v1196_v59 = vmul.f32 %v1195_v41, %v4379_v37 }
  0x44   : > { %v852_v50 = vmul.f32 %v4127_v18, %v851_v44  ;;  %1874 = vst.msk [vmem:[#allocation2 + $0x150] sm:$0x1] %vm1859_vm2, %v4236_v45  ;;  %v1178_v58 = vand.u32 2147483647, %v4501_v36  ;;  %v1207_v26 = vmul.f32 %v1206_v48, %v4379_v37  ;;  %v1508_v0 = vmul.f32 2.1237322e-06, %v4496_v29 }
  0x45   : > { %v892_v57 = vmul.f32 %v4129_v24, %v891_v47  ;;  %1875 = vst.msk [vmem:[#allocation2 + $0x168] sm:$0x1] %vm1859_vm2, %v4236_v45  ;;  %v1471_v61 = vadd.f32 0.0036580483, %v1470_v53  ;;  %v1481_v62 = vmul.f32 %v1480_v54, %v4435_v32  ;;  %vm1174_vm11 = vweird.f32 %v4501_v36 }
  0x46   : > { %v853_v60 = vadd.f32 %v4127_v18, %v852_v50  ;;  %1876 = vst.msk [vmem:[#allocation2 + $0x180] sm:$0x1] %vm1859_vm2, %v4236_v45  ;;  %v1180_v37 = vand.u32 2147483648, %v4501_v36  ;;  %v4551_v33 = vadd.f32 1.0, %v1207_v26  ;;  %v1509_v8 = vadd.f32 0.00028619796, %v1508_v0 }
  0x47   : > { %v893_v1 = vadd.f32 %v4129_v24, %v892_v57  ;;  %v4131_v2 = vpop.eup %4130  ;;  %1879 = vst.msk [vmem:[#allocation2 + $0x29] sm:$0x1] %vm1859_vm2, %v4236_v45  ;;  %v1472_v6 = vmul.f32 %v1471_v61, %v4435_v32  ;;  %v1482_v7 = vadd.f32 0.014752088, %v1481_v62  ;;  %vm4565_vm12 = vcmp.eq.f32.partialorder %v1178_v58, 8.507059e+37 }
  0x48   : > { %v857_v5 = vsel %vm4527_vm9, %v4127_v18, %v853_v60  ;;  %1880 = vst.msk [vmem:[#allocation2 + $0x41] sm:$0x1] %vm1859_vm2, %v4236_v45  ;;  %v1170_v20 = vmul.f32 %v4131_v2, %v4501_v36  ;;  %v1197_v14 = vadd.f32 1.1283791, %v1196_v59  ;;  %4132 = vrcp.f32 %v4551_v33 }
  0x49   : > { %v862_v10 = vsel %vm4478_vm5, %v861_v23, %v857_v5  ;;  %v897_v12 = vsel %vm4539_vm10, %v4129_v24, %v893_v1  ;;  %1881 = vst.msk [vmem:[#allocation2 + $0x59] sm:$0x1] %vm1859_vm2, %v4236_v45  ;;  %vm1175_vm13 = vweird.f32 %v4131_v2  ;;  %v1519_v23 = vmul.f32 3.8918573e-05, %v4496_v29 }
  0x4a   : > { %v863_v22 = vmul.f32 %v862_v10, %v4465_v9  ;;  %v902_v16 = vsel %vm4489_vm6, %v901_v46, %v897_v12  ;;  %1882 = vst.msk [vmem:[#allocation2 + $0x71] sm:$0x1] %vm1859_vm2, %v4236_v45  ;;  %v1171_v18 = vsub.f32 1.0, %v1170_v20  ;;  %v1473_v9 = vadd.f32 0.05243302, %v1472_v6  ;;  %vm4590_vm14 = vmor %vm1174_vm11, %vm1175_vm13 }
  0x4b   : > { %v903_v17 = vmul.f32 %v902_v16, %v4472_v13  ;;  %1883 = vst.msk [vmem:[#allocation2 + $0x89] sm:$0x1] %vm1859_vm2, %v4236_v45  ;;  %v1483_v27 = vmul.f32 %v1482_v7, %v4435_v32  ;;  %v1510_v24 = vmul.f32 %v1509_v8, %v4496_v29  ;;  %v1181_v34 = vor.u32 1.1754944e-38, %v1180_v37 }
  0x4c   : > { %v3766_v28 = vclamps-f32 %v863_v22, 1.0  ;;  %1884 = vst.msk [vmem:[#allocation2 + $0xa1] sm:$0x1] %vm1859_vm2, %v4236_v45  ;;  %v1172_v13 = vmul.f32 %v4131_v2, %v1171_v18  ;;  %v1218_v39 = vand.u32 2147483647, %v4551_v33  ;;  %v4595_v42 = vmul.f32 %v1197_v14, %v4355_v25 }
  0x4d   : > { %v3767_v30 = vclamps-f32 %v903_v17, 1.0  ;;  %1885 = vst.msk [vmem:[#allocation2 + $0xb9] sm:$0x1] %vm1859_vm2, %v4236_v45  ;;  %v1474_v44 = vmul.f32 %v1473_v9, %v4435_v32  ;;  %v1484_v46 = vadd.f32 0.112945676, %v1483_v27  ;;  %vm1214_vm15 = vweird.f32 %v4551_v33 }
  0x4e   : > { %v1794_v40 = vadd.f32 1.0, %v3766_v28  ;;  %1886 = vst.msk [vmem:[#allocation2 + $0xd1] sm:$0x1] %vm1859_vm2, %v4236_v45  ;;  %v1173_v48 = vadd.f32 %v4131_v2, %v1172_v13  ;;  %v1511_v50 = vadd.f32 0.0036580483, %v1510_v24  ;;  %v4133_v36 = vpop.eup %4132  ;;  %v1220_v26 = vand.u32 2147483648, %v4551_v33 }
  0x4f   : > { %v1795_v47 = vadd.f32 1.0, %v3767_v30  ;;  %1887 = vst.msk [vmem:[#allocation2 + $0xe9] sm:$0x1] %vm1859_vm2, %v4236_v45  ;;  %v1475_v25 = vadd.f32 0.18741608, %v1474_v44  ;;  %v1485_v54 = vmul.f32 %v1484_v46, %v4435_v32  ;;  %v1210_v59 = vmul.f32 %v4133_v36, %v4551_v33 }
  0x50   : > { %v1826_v53 = vmul.f32 %v1794_v40, %v4368_v31  ;;  %v1520_v55 = vadd.f32 0.001143296, %v1519_v23  ;;  %1888 = vst.msk [vmem:[#allocation2 + $0x101] sm:$0x1] %vm1859_vm2, %v4236_v45  ;;  %v1177_v58 = vsel %vm4590_vm14, %v4131_v2, %v1173_v48  ;;  %v4613_v31 = vld [vmem:[%s4310_s13 + $0x28] sm:$0xff]   ;;  %vm1215_vm0 = vweird.f32 %v4133_v36 }
  0x51   : > { %v1827_v57 = vmul.f32 %v1795_v47, %v4375_v35  ;;  %v1182_v60 = vsel %vm4565_vm12, %v1181_v34, %v1177_v58  ;;  %v1486_v56 = vadd.f32 0.4994258, %v1485_v54  ;;  %v1512_v35 = vmul.f32 %v1511_v50, %v4496_v29  ;;  %1889 = vst.msk [vmem:[#allocation2 + $0x119] sm:$0x1] %vm1859_vm2, %v4236_v45  ;;  %vm4639_vm3 = vmor %vm1214_vm15, %vm1215_vm0 }
  0x52   : > { %1905 = vst.msk [vmem:[#allocation2 + $0x79] sm:$0xff] %vm1850_vm1, %v1826_v53  ;;  %v1183_v61 = vmul.f32 %v1182_v60, %v4485_v15  ;;  %v1211_v62 = vsub.f32 1.0, %v1210_v59  ;;  %v1521_v0 = vmul.f32 %v1520_v55, %v4496_v29  ;;  %v4623_v1 = vmul.f32 0.70710677, %v4509_v43 }
  0x53   : > { %1906 = vst.msk [vmem:[#allocation2 + $0x81] sm:$0xff] %vm1850_vm1, %v1827_v57  ;;  %v1476_v37 = vmul.f32 %v1475_v25, %v4435_v32  ;;  %v1487_v2 = vmul.f32 %v1486_v56, %v4435_v32  ;;  %v1513_v5 = vadd.f32 0.05243302, %v1512_v35  ;;  %v4021_v6 = vunpack.c.l.bf16 %v4613_v31 }
  0x54   : > { %1890 = vst.msk [vmem:[#allocation2 + $0x131] sm:$0x1] %vm1859_vm2, %v4236_v45  ;;  %v3774_v15 = vclamps-f32 %v1183_v61, 1.0  ;;  %v1212_v7 = vmul.f32 %v4133_v36, %v1211_v62  ;;  %v1522_v8 = vadd.f32 0.014752088, %v1521_v0  ;;  %v506_v10 = vmul.f32 %v4623_v1, %v4623_v1 }
  0x55   : > { %1891 = vst.msk [vmem:[#allocation2 + $0x149] sm:$0x1] %vm1859_vm2, %v4236_v45  ;;  %v1221_v12 = vor.u32 1.1754944e-38, %v1220_v26  ;;  %v4643_v20 = vadd.f32 1.0, %v1487_v2  ;;  %v1514_v21 = vmul.f32 %v1513_v5, %v4496_v29  ;;  %v4647_v22 = vmul.f32 0.70710677, %v4517_v49 }
  0x56   : > { %1892 = vst.msk [vmem:[#allocation2 + $0x161] sm:$0x1] %vm1859_vm2, %v4236_v45  ;;  %v1213_v16 = vadd.f32 %v4133_v36, %v1212_v7  ;;  %vm1219_vm4 = vcmp.eq.f32.partialorder %v1218_v39, 8.507059e+37  ;;  %v1802_v14 = vadd.f32 1.0, %v3774_v15  ;;  %v1523_v33 = vmul.f32 %v1522_v8, %v4496_v29 }
  0x57   : > { %1893 = vst.msk [vmem:[#allocation2 + $0x179] sm:$0x1] %vm1859_vm2, %v4236_v45  ;;  %v1477_v17 = vadd.f32 1.1283791, %v1476_v37  ;;  %4134 = vrcp.f32 %v4643_v20  ;;  %v4655_v18 = vmin.f32 %v506_v10, 16.0  ;;  %v385_v23 = vmul.f32 %v4325_v3, %v4021_v6 }
  0x58   : > { %1894 = vst.msk [vmem:[#allocation2 + $0x191] sm:$0x1] %vm1859_vm2, %v4236_v45  ;;  %v1217_v9 = vsel %vm4639_vm3, %v4133_v36, %v1213_v16  ;;  %v1834_v27 = vmul.f32 %v1802_v14, %v4448_v63  ;;  %v1498_v24 = vand.u32 2147483647, %v4643_v20  ;;  %v1500_v30 = vand.u32 2147483648, %v4643_v20 }
  0x59   : > { %v1939_v28 = vld [vmem:[#allocation2 + $0x78] sm:$0xff]  ;;  %v1222_v34 = vsel %vm1219_vm4, %v1221_v12, %v1217_v9  ;;  %1860 = vst.msk [vmem:[#allocation2] sm:$0x1] %vm1859_vm2, %v4236_v45  ;;  %v4668_v39 = vmul.f32 0.5, %v4391_v51  ;;  %v1515_v40 = vadd.f32 0.18741608, %v1514_v21  ;;  %v546_v41 = vmul.f32 %v4647_v22, %v4647_v22 }
  0x5a   : > { %v1940_v13 = vld [vmem:[#allocation2 + $0x80] sm:$0xff]  ;;  %v1223_v63 = vmul.f32 %v1222_v34, %v4595_v42  ;;  %1913 = vst.msk [vmem:[#allocation2 + $0xd9] sm:$0xff] %vm1850_vm1, %v1834_v27  ;;  %v1524_v46 = vadd.f32 0.112945676, %v1523_v33  ;;  %v4022_v47 = vunpack.c.h.bf16 %v4613_v31  ;;  %v1478_v48 = vmul.f32 %v1477_v17, %v4382_v38 }
  0x5b   : > { %v4672_v44 = vpack.c.bf16 %v1940_v13, %v1939_v28  ;;  %1877 = vst.msk [vmem:[#allocation2 + $0x198] sm:$0x1] %vm1859_vm2, %v4236_v45  ;;  %vm1494_vm5 = vweird.f32 %v4643_v20  ;;  %v508_v51 = vmul.f32 2.1237322e-06, %v4655_v18  ;;  %v519_v50 = vmul.f32 3.8918573e-05, %v4655_v18 }
  0x5c   : > { %v3775_v42 = vclamps-f32 %v1223_v63, 1.0  ;;  %vm4685_vm6 = vcmp.eq.f32.partialorder %v1498_v24, 8.507059e+37  ;;  %v1501_v53 = vor.u32 1.1754944e-38, %v1500_v30  ;;  %v1525_v25 = vmul.f32 %v1524_v46, %v4496_v29 }
  0x5d   : > { %3800 = vmatmul.msk.bf16.vlgmr.msra.gmra.mxu1 %vm1850_vm1, %v4672_v44  ;;  %v4691_v54 = vadd.f32 %v4330_v4, %v385_v23  ;;  %v4135_v38 = vpop.eup %4134  ;;  %v1516_v55 = vmul.f32 %v1515_v40, %v4496_v29  ;;  %v509_v57 = vadd.f32 0.00028619796, %v508_v51  ;;  %v520_v58 = vadd.f32 0.001143296, %v519_v50 }
  0x5e   : > { %v4694_v59 = vmin.f32 %v546_v41, 16.0  ;;  %v1803_v26 = vadd.f32 1.0, %v3775_v42  ;;  %v1490_v31 = vmul.f32 %v4135_v38, %v4643_v20  ;;  %vm1495_vm7 = vweird.f32 %v4135_v38 }
  0x5f   : > { %v386_v60 = vmul.f32 %v4325_v3, %v4022_v47  ;;  %v1526_v56 = vadd.f32 0.4994258, %v1525_v25  ;;  %v510_v35 = vmul.f32 %v509_v57, %v4655_v18  ;;  %v521_v61 = vmul.f32 %v520_v58, %v4655_v18  ;;  %vm4713_vm8 = vmor %vm1494_vm5, %vm1495_vm7 }
  0x60   : > { %v548_v62 = vmul.f32 2.1237322e-06, %v4694_v59  ;;  %v1835_v0 = vmul.f32 %v1803_v26, %v4461_v19  ;;  %v1491_v37 = vsub.f32 1.0, %v1490_v31  ;;  %v559_v2 = vmul.f32 3.8918573e-05, %v4694_v59 }
  0x61   : > { %v4704_v5 = vmul.f32 0.70710677, %v4691_v54  ;;  %v1517_v6 = vadd.f32 1.1283791, %v1516_v55  ;;  %v1527_v15 = vmul.f32 %v1526_v56, %v4496_v29  ;;  %v511_v7 = vadd.f32 0.0036580483, %v510_v35 }
  0x62   : > { %v522_v8 = vadd.f32 0.014752088, %v521_v61  ;;  %1914 = vst.msk [vmem:[#allocation2 + $0xe1] sm:$0xff] %vm1850_vm1, %v1835_v0  ;;  %v1492_v10 = vmul.f32 %v4135_v38, %v1491_v37  ;;  %v549_v32 = vadd.f32 0.00028619796, %v548_v62  ;;  %v4722_v33 = vadd.f32 %v4330_v4, %v386_v60  ;;  %v1947_v9 = vld [vmem:[#allocation2 + $0xd8] sm:$0xff] }
  0x63   : > { %v560_v12 = vadd.f32 0.001143296, %v559_v2  ;;  %v906_v21 = vmul.f32 %v4704_v5, %v4704_v5  ;;  %v4717_v16 = vadd.f32 1.0, %v1527_v15  ;;  %v512_v29 = vmul.f32 %v511_v7, %v4655_v18  ;;  %v4766_v2 = vld [vmem:[%s4310_s13 + $0x48] sm:$0xff]  }
  0x64   : > { %v523_v14 = vmul.f32 %v522_v8, %v4655_v18  ;;  %v1493_v17 = vadd.f32 %v4135_v38, %v1492_v10  ;;  %v4725_v23 = vmul.f32 0.5, %v4509_v43  ;;  %v550_v28 = vmul.f32 %v549_v32, %v4694_v59 }
  0x65   : > { %v561_v20 = vmul.f32 %v560_v12, %v4694_v59  ;;  %v4730_v27 = vmul.f32 %v1517_v6, %v4407_v11  ;;  %4136 = vrcp.f32 %v4717_v16  ;;  %v4734_v24 = vmul.f32 0.5, %v4517_v49  ;;  %v3992_v49 = vld [vmem:[%s6521_s3 + $0x30] sm:$0xff] }
  0x66   : > { %v4736_v30 = vmin.f32 %v906_v21, 16.0  ;;  %v1497_v13 = vsel %vm4713_vm8, %v4135_v38, %v1493_v17  ;;  %v513_v43 = vadd.f32 0.05243302, %v512_v29  ;;  %v524_v34 = vadd.f32 0.112945676, %v523_v14  ;;  %2248 = vmatpush.bf16.msrb.mxu2 %v3992_v49 }
  0x67   : > { %v551_v40 = vadd.f32 0.0036580483, %v550_v28  ;;  %v1502_v41 = vsel %vm4685_vm6, %v1501_v53, %v1497_v13  ;;  %v1538_v63 = vand.u32 2147483647, %v4717_v16  ;;  %v562_v11 = vadd.f32 0.014752088, %v561_v20 }
  0x68   : > { %v4744_v46 = vmul.f32 0.70710677, %v4722_v33  ;;  %v1503_v47 = vmul.f32 %v1502_v41, %v1478_v48  ;;  %v514_v51 = vmul.f32 %v513_v43, %v4655_v18  ;;  %v525_v50 = vmul.f32 %v524_v34, %v4655_v18 }
  0x69   : > { %v552_v42 = vmul.f32 %v551_v40, %v4694_v59  ;;  %v1948_v25 = vld [vmem:[#allocation2 + $0xe0] sm:$0xff]  ;;  %v1540_v36 = vand.u32 2147483648, %v4717_v16  ;;  %v563_v53 = vmul.f32 %v562_v11, %v4694_v59  ;;  %v908_v38 = vmul.f32 2.1237322e-06, %v4736_v30 }
  0x6a   : > { %v919_v55 = vmul.f32 3.8918573e-05, %v4736_v30  ;;  %v4756_v48 = vpack.c.bf16 %v1948_v25, %v1947_v9  ;;  %v3782_v57 = vclamps-f32 %v1503_v47, 1.0  ;;  %v515_v58 = vadd.f32 0.18741608, %v514_v51 }
  0x6b   : > { %v526_v26 = vadd.f32 0.4994258, %v525_v50  ;;  %v4137_v31 = vpop.eup %4136  ;;  %vm1534_vm9 = vweird.f32 %v4717_v16  ;;  %v553_v60 = vadd.f32 0.05243302, %v552_v42  ;;  %v564_v56 = vadd.f32 0.112945676, %v563_v53 }
  0x6c   : > { %v909_v35 = vadd.f32 0.00028619796, %v908_v38  ;;  %3804 = vmatmul.msk.bf16.vlgmr.msra.gmra.mxu2 %vm1850_vm1, %v4756_v48  ;;  %v1530_v61 = vmul.f32 %v4137_v31, %v4717_v16  ;;  %v1810_v62 = vadd.f32 1.0, %v3782_v57  ;;  %v516_v0 = vmul.f32 %v515_v58, %v4655_v18 }
  0x6d   : > { %v946_v37 = vmul.f32 %v4744_v46, %v4744_v46  ;;  %v527_v6 = vmul.f32 %v526_v26, %v4655_v18  ;;  %v554_v15 = vmul.f32 %v553_v60, %v4694_v59  ;;  %v565_v7 = vmul.f32 %v564_v56, %v4694_v59 }
  0x6e   : > { %v910_v8 = vmul.f32 %v909_v35, %v4736_v30  ;;  %v1531_v10 = vsub.f32 1.0, %v1530_v61  ;;  %vm1535_vm10 = vweird.f32 %v4137_v31  ;;  %v1842_v32 = vmul.f32 %v1810_v62, %v4522_v52 }
  0x6f   : > { %v920_v12 = vadd.f32 0.001143296, %v919_v55  ;;  %v4773_v21 = vadd.f32 1.0, %v527_v6  ;;  %v555_v19 = vadd.f32 0.18741608, %v554_v15  ;;  %v4037_v14 = vunpack.c.l.bf16 %v4766_v2  ;;  %vm4784_vm12 = vmor %vm1534_vm9, %vm1535_vm10 }
  0x70   : > { %v566_v29 = vadd.f32 0.4994258, %v565_v7  ;;  %v1532_v17 = vmul.f32 %v4137_v31, %v1531_v10  ;;  %vm4776_vm11 = vcmp.eq.f32.partialorder %v1538_v63, 8.507059e+37  ;;  %1921 = vst.msk [vmem:[#allocation2 + $0x139] sm:$0xff] %vm1850_vm1, %v1842_v32  ;;  %v911_v28 = vadd.f32 0.0036580483, %v910_v8 }
  0x71   : > { %v921_v20 = vmul.f32 %v920_v12, %v4736_v30  ;;  %v1541_v9 = vor.u32 1.1754944e-38, %v1540_v36  ;;  %v517_v13 = vadd.f32 1.1283791, %v516_v0  ;;  %4138 = vrcp.f32 %v4773_v21  ;;  %v3994_v7 = vld [vmem:[%s6521_s3 + $0x20] sm:$0xff] }
  0x72   : > { %v4789_v43 = vmin.f32 %v946_v37, 16.0  ;;  %v1533_v34 = vadd.f32 %v4137_v31, %v1532_v17  ;;  %v556_v40 = vmul.f32 %v555_v19, %v4694_v59  ;;  %v567_v41 = vmul.f32 %v566_v29, %v4694_v59  ;;  %v3993_v37 = vld [vmem:[%s6521_s3 + $0x8] sm:$0xff]  ;;  %2612 = vmatpush.bf16.msrb.mxu0 %v3994_v7 }
  0x73   : > { %v912_v63 = vmul.f32 %v911_v28, %v4736_v30  ;;  %v538_v11 = vand.u32 2147483647, %v4773_v21  ;;  %v922_v16 = vadd.f32 0.014752088, %v921_v20  ;;  %v4038_v49 = vunpack.c.h.bf16 %v4766_v2  ;;  %v3990_v2 = vld [vmem:[%s6521_s3] sm:$0xff]  ;;  %2478 = vmatpush.bf16.msrb.mxu3 %v3993_v37 }
  0x74   : > { %v948_v47 = vmul.f32 2.1237322e-06, %v4789_v43  ;;  %v1537_v51 = vsel %vm4784_vm12, %v4137_v31, %v1533_v34  ;;  %v540_v50 = vand.u32 2147483648, %v4773_v21  ;;  %v4800_v42 = vadd.f32 1.0, %v567_v41  ;;  %2146 = vmatpush.bf16.msrb.mxu1 %v3990_v2 }
  0x75   : > { %v913_v25 = vadd.f32 0.05243302, %v912_v63  ;;  %v1542_v59 = vsel %vm4776_vm11, %v1541_v9, %v1537_v51  ;;  %v557_v36 = vadd.f32 1.1283791, %v556_v40  ;;  %v923_v53 = vmul.f32 %v922_v16, %v4736_v30 }
  0x76   : > { %v949_v38 = vadd.f32 0.00028619796, %v948_v47  ;;  %v1543_v55 = vmul.f32 %v1542_v59, %v4730_v27  ;;  %v518_v57 = vmul.f32 %v517_v13, %v4623_v1  ;;  %vm534_vm13 = vweird.f32 %v4773_v21 }
  0x77   : > { %4140 = vrcp.f32 %v4800_v42  ;;  %v4139_v58 = vpop.eup %4138  ;;  %vm4809_vm14 = vcmp.eq.f32.partialorder %v538_v11, 8.507059e+37  ;;  %v914_v31 = vmul.f32 %v913_v25, %v4736_v30  ;;  %v924_v60 = vadd.f32 0.112945676, %v923_v53 }
  0x78   : > { %v959_v56 = vmul.f32 3.8918573e-05, %v4789_v43  ;;  %v3783_v35 = vclamps-f32 %v1543_v55, 1.0  ;;  %v530_v61 = vmul.f32 %v4139_v58, %v4773_v21  ;;  %v541_v27 = vor.u32 1.1754944e-38, %v540_v50  ;;  %v1955_v55 = vld [vmem:[#allocation2 + $0x138] sm:$0xff] }
  0x79   : > { %v950_v1 = vmul.f32 %v949_v38, %v4789_v43  ;;  %vm535_vm15 = vweird.f32 %v4139_v58  ;;  %v4818_v62 = vmul.f32 %v557_v36, %v4647_v22  ;;  %vm574_vm0 = vweird.f32 %v4800_v42 }
  0x7a   : > { %v578_v0 = vand.u32 2147483647, %v4800_v42  ;;  %v1811_v6 = vadd.f32 1.0, %v3783_v35  ;;  %v531_v15 = vsub.f32 1.0, %v530_v61  ;;  %v915_v22 = vadd.f32 0.18741608, %v914_v31  ;;  %vm4839_vm3 = vmor %vm534_vm13, %vm535_vm15 }
  0x7b   : > { %v925_v8 = vmul.f32 %v924_v60, %v4736_v30  ;;  %v951_v10 = vadd.f32 0.0036580483, %v950_v1  ;;  %v960_v32 = vadd.f32 0.001143296, %v959_v56  ;;  %v393_v12 = vmul.f32 %v4325_v3, %v4037_v14 }
  0x7c   : > { %v394_v19 = vmul.f32 %v4325_v3, %v4038_v49  ;;  %v1843_v17 = vmul.f32 %v1811_v6, %v4668_v39  ;;  %v532_v18 = vmul.f32 %v4139_v58, %v531_v15  ;;  %v916_v28 = vmul.f32 %v915_v22, %v4736_v30 }
  0x7d   : > { %v4141_v29 = vpop.eup %4140  ;;  %v926_v20 = vadd.f32 0.4994258, %v925_v8  ;;  %v580_v14 = vand.u32 2147483648, %v4800_v42  ;;  %v952_v3 = vmul.f32 %v951_v10, %v4789_v43  ;;  %v961_v39 = vmul.f32 %v960_v32, %v4789_v43 }
  0x7e   : > { %v570_v9 = vmul.f32 %v4141_v29, %v4800_v42  ;;  %1922 = vst.msk [vmem:[#allocation2 + $0x141] sm:$0xff] %vm1850_vm1, %v1843_v17  ;;  %v533_v13 = vadd.f32 %v4139_v58, %v532_v18  ;;  %v917_v34 = vadd.f32 1.1283791, %v916_v28  ;;  %v4850_v21 = vadd.f32 %v4330_v4, %v393_v12 }
  0x7f   : > { %v927_v40 = vmul.f32 %v926_v20, %v4736_v30  ;;  %vm575_vm4 = vweird.f32 %v4141_v29  ;;  %v953_v63 = vadd.f32 0.05243302, %v952_v3  ;;  %v962_v11 = vadd.f32 0.014752088, %v961_v39  ;;  %v4918_v39 = vld [vmem:[%s6519_s1] ss:$0 sm:$0xff] }
  0x80   : > { %v571_v41 = vsub.f32 1.0, %v570_v9  ;;  %v537_v16 = vsel %vm4839_vm3, %v4139_v58, %v533_v13  ;;  %v4857_v49 = vadd.f32 %v4330_v4, %v394_v19  ;;  %v4860_v51 = vmul.f32 0.70710677, %v4850_v21  ;;  %vm4868_vm5 = vmor %vm574_vm0, %vm575_vm4 }
  0x81   : > { %v4854_v47 = vadd.f32 1.0, %v927_v40  ;;  %v542_v30 = vsel %vm4809_vm14, %v541_v27, %v537_v16  ;;  %v954_v25 = vmul.f32 %v953_v63, %v4789_v43  ;;  %v963_v59 = vmul.f32 %v962_v11, %v4789_v43 }
  0x82   : > { %v572_v50 = vmul.f32 %v4141_v29, %v571_v41  ;;  %v543_v36 = vmul.f32 %v542_v30, %v518_v57  ;;  %vm4872_vm6 = vcmp.eq.f32.partialorder %v578_v0, 8.507059e+37  ;;  %v581_v38 = vor.u32 1.1754944e-38, %v580_v14  ;;  %v4075_v0 = vld [vmem:[%s4310_s13 + $0x68] sm:$0xff]  }
  0x83   : > { %4142 = vrcp.f32 %v4854_v47  ;;  %v4878_v26 = vmul.f32 0.5, %v4691_v54  ;;  %v955_v57 = vadd.f32 0.18741608, %v954_v25  ;;  %v964_v31 = vadd.f32 0.112945676, %v963_v59 }
  0x84   : > { %v573_v58 = vadd.f32 %v4141_v29, %v572_v50  ;;  %v3758_v42 = vclamps-f32 %v543_v36, 1.0  ;;  %v4881_v60 = vmul.f32 %v917_v34, %v4704_v5  ;;  %v4884_v56 = vmul.f32 0.70710677, %v4857_v49 }
  0x85   : > { %v1226_v35 = vmul.f32 %v4860_v51, %v4860_v51  ;;  %v1956_v61 = vld [vmem:[#allocation2 + $0x140] sm:$0xff]  ;;  %vm934_vm7 = vweird.f32 %v4854_v47  ;;  %v938_v54 = vand.u32 2147483647, %v4854_v47  ;;  %v965_v1 = vmul.f32 %v964_v31, %v4789_v43 }
  0x86   : > { %v577_v27 = vsel %vm4868_vm5, %v4141_v29, %v573_v58  ;;  %v4894_v37 = vpack.c.bf16 %v1956_v61, %v1955_v55  ;;  %v1786_v2 = vadd.f32 1.0, %v3758_v42  ;;  %v956_v7 = vmul.f32 %v955_v57, %v4789_v43 }
  0x87   : > { %v582_v5 = vsel %vm4872_vm6, %v581_v38, %v577_v27  ;;  %v4898_v6 = vmin.f32 %v1226_v35, 16.0  ;;  %v966_v22 = vadd.f32 0.4994258, %v965_v1  ;;  %v1266_v8 = vmul.f32 %v4884_v56, %v4884_v56 }
  0x88   : > { %v583_v15 = vmul.f32 %v582_v5, %v4818_v62  ;;  %3808 = vmatmul.msk.bf16.vlgmr.msra.gmra.mxu3 %vm1850_vm1, %v4894_v37  ;;  %v1818_v32 = vmul.f32 %v1786_v2, %v4725_v23  ;;  %v4053_v29 = vunpack.c.l.bf16 %v4075_v0  ;;  %v940_v18 = vand.u32 2147483648, %v4854_v47 }
  0x89   : > { %v4143_v10 = vpop.eup %4142  ;;  %v1228_v12 = vmul.f32 2.1237322e-06, %v4898_v6  ;;  %v1239_v19 = vmul.f32 3.8918573e-05, %v4898_v6  ;;  %v967_v28 = vmul.f32 %v966_v22, %v4789_v43  ;;  %v4913_v9 = vmin.f32 %v1266_v8, 16.0 }
  0x8a   : > { %v3759_v17 = vclamps-f32 %v583_v15, 1.0  ;;  %v930_v62 = vmul.f32 %v4143_v10, %v4854_v47  ;;  %vm935_vm8 = vweird.f32 %v4143_v10  ;;  %1897 = vst.msk [vmem:[#allocation2 + $0x19] sm:$0xff] %vm1850_vm1, %v1818_v32  ;;  %v4054_v3 = vunpack.c.h.bf16 %v4075_v0  ;;  %v4945_v47 = vld [vmem:[%s6520_s2] ss:$0 sm:$0xff] }
  0x8b   : > { %v1229_v20 = vadd.f32 0.00028619796, %v1228_v12  ;;  %v1240_v52 = vadd.f32 0.001143296, %v1239_v19  ;;  %v401_v13 = vmul.f32 %v4918_v39, %v4053_v29  ;;  %v957_v34 = vadd.f32 1.1283791, %v956_v7  ;;  %vm4934_vm10 = vmor %vm934_vm7, %vm935_vm8 }
  0x8c   : > { %v1787_v23 = vadd.f32 1.0, %v3759_v17  ;;  %v931_v14 = vsub.f32 1.0, %v930_v62  ;;  %v4921_v40 = vadd.f32 1.0, %v967_v28  ;;  %vm4926_vm9 = vcmp.eq.f32.partialorder %v938_v54, 8.507059e+37 }
  0x8d   : > { %v1230_v41 = vmul.f32 %v1229_v20, %v4898_v6  ;;  %v1241_v43 = vmul.f32 %v1240_v52, %v4898_v6  ;;  %v1268_v30 = vmul.f32 2.1237322e-06, %v4913_v9  ;;  %v941_v25 = vor.u32 1.1754944e-38, %v940_v18 }
  0x8e   : > { %v1819_v63 = vmul.f32 %v1787_v23, %v4734_v24  ;;  %v932_v11 = vmul.f32 %v4143_v10, %v931_v14  ;;  %4144 = vrcp.f32 %v4921_v40  ;;  %v1279_v59 = vmul.f32 3.8918573e-05, %v4913_v9 }
  0x8f   : > { %v402_v24 = vmul.f32 %v4918_v39, %v4054_v3  ;;  %v1231_v53 = vadd.f32 0.0036580483, %v1230_v41  ;;  %v1242_v4 = vadd.f32 0.014752088, %v1241_v43  ;;  %v4948_v38 = vadd.f32 %v4945_v47, %v401_v13 }
  0x90   : > { %1898 = vst.msk [vmem:[#allocation2 + $0x21] sm:$0xff] %vm1850_vm1, %v1819_v63  ;;  %v933_v36 = vadd.f32 %v4143_v10, %v932_v11  ;;  %v4951_v55 = vmul.f32 %v957_v34, %v4744_v46  ;;  %vm974_vm11 = vweird.f32 %v4921_v40  ;;  %v978_v58 = vand.u32 2147483647, %v4921_v40 }
  0x91   : > { %v980_v57 = vand.u32 2147483648, %v4921_v40  ;;  %v1232_v42 = vmul.f32 %v1231_v53, %v4898_v6  ;;  %v1243_v35 = vmul.f32 %v1242_v4, %v4898_v6  ;;  %v1269_v61 = vadd.f32 0.00028619796, %v1268_v30  ;;  %v1931_v22 = vld [vmem:[#allocation2 + $0x18] sm:$0xff] }
  0x92   : > { %v937_v31 = vsel %vm4934_vm10, %v4143_v10, %v933_v36  ;;  %v1280_v54 = vadd.f32 0.001143296, %v1279_v59  ;;  %v4963_v46 = vadd.f32 %v4945_v47, %v402_v24  ;;  %v4966_v1 = vmul.f32 0.70710677, %v4948_v38 }
  0x93   : > { %v942_v27 = vsel %vm4926_vm9, %v941_v25, %v937_v31  ;;  %v1233_v5 = vadd.f32 0.05243302, %v1232_v42  ;;  %v1244_v2 = vadd.f32 0.112945676, %v1243_v35  ;;  %v1270_v15 = vmul.f32 %v1269_v61, %v4913_v9 }
  0x94   : > { %v943_v0 = vmul.f32 %v942_v27, %v4881_v60  ;;  %v4145_v7 = vpop.eup %4144  ;;  %v981_v8 = vor.u32 1.1754944e-38, %v980_v57  ;;  %v1281_v10 = vmul.f32 %v1280_v54, %v4913_v9  ;;  %v4972_v32 = vmul.f32 0.70710677, %v4963_v46  ;;  %v4063_v27 = vld [vmem:[%s4310_s13 + $0x8] sm:$0xff]  }
  0x95   : > { %v1546_v12 = vmul.f32 %v4966_v1, %v4966_v1  ;;  %v970_v29 = vmul.f32 %v4145_v7, %v4921_v40  ;;  %vm975_vm12 = vweird.f32 %v4145_v7  ;;  %v1234_v60 = vmul.f32 %v1233_v5, %v4898_v6 }
  0x96   : > { %v3768_v19 = vclamps-f32 %v943_v0, 1.0  ;;  %v1245_v62 = vmul.f32 %v1244_v2, %v4898_v6  ;;  %v1271_v18 = vadd.f32 0.0036580483, %v1270_v15  ;;  %v1282_v28 = vadd.f32 0.014752088, %v1281_v10  ;;  %vm4994_vm13 = vmor %vm974_vm11, %vm975_vm12 }
  0x97   : > { %v1932_v17 = vld [vmem:[#allocation2 + $0x20] sm:$0xff]  ;;  %v4979_v20 = vmin.f32 %v1546_v12, 16.0  ;;  %v971_v23 = vsub.f32 1.0, %v970_v29  ;;  %v1235_v3 = vadd.f32 0.18741608, %v1234_v60  ;;  %vm979_vm14 = vcmp.eq.f32.partialorder %v978_v58, 8.507059e+37 }
  0x98   : > { %v4981_v52 = vpack.c.bf16 %v1932_v17, %v1931_v22  ;;  %v1796_v14 = vadd.f32 1.0, %v3768_v19  ;;  %v1246_v13 = vadd.f32 0.4994258, %v1245_v62  ;;  %v1272_v34 = vmul.f32 %v1271_v18, %v4913_v9 }
  0x99   : > { %v1283_v41 = vmul.f32 %v1282_v28, %v4913_v9  ;;  %v1548_v43 = vmul.f32 2.1237322e-06, %v4979_v20  ;;  %v972_v63 = vmul.f32 %v4145_v7, %v971_v23  ;;  %v1236_v16 = vmul.f32 %v1235_v3, %v4898_v6 }
  0x9a   : > { %3796 = vmatmul.msk.bf16.vlgmr.msra.gmra.mxu0 %vm1850_vm1, %v4981_v52  ;;  %v1828_v11 = vmul.f32 %v1796_v14, %v4878_v26  ;;  %v1559_v30 = vmul.f32 3.8918573e-05, %v4979_v20  ;;  %v1247_v25 = vmul.f32 %v1246_v13, %v4898_v6  ;;  %v1273_v59 = vadd.f32 0.05243302, %v1272_v34 }
  0x9b   : > { %v1284_v24 = vadd.f32 0.112945676, %v1283_v41  ;;  %v1549_v36 = vadd.f32 0.00028619796, %v1548_v43  ;;  %v973_v53 = vadd.f32 %v4145_v7, %v972_v63  ;;  %v1586_v4 = vmul.f32 %v4972_v32, %v4972_v32 }
  0x9c   : > { %1907 = vst.msk [vmem:[#allocation2 + $0x91] sm:$0xff] %vm1850_vm1, %v1828_v11  ;;  %v1560_v26 = vadd.f32 0.001143296, %v1559_v30  ;;  %v1248_v57 = vadd.f32 1.0, %v1247_v25  ;;  %v1274_v40 = vmul.f32 %v1273_v59, %v4913_v9  ;;  %v453_v6 = vmul.f32 0.5, %v4722_v33 }
  0x9d   : > { %v1285_v31 = vmul.f32 %v1284_v24, %v4913_v9  ;;  %v1550_v42 = vmul.f32 %v1549_v36, %v4979_v20  ;;  %v977_v35 = vsel %vm4994_vm13, %v4145_v7, %v973_v53  ;;  %v5009_v58 = vmul.f32 0.5, %v4850_v21 }
  0x9e   : > { %v1561_v61 = vmul.f32 %v1560_v26, %v4979_v20  ;;  %v982_v54 = vsel %vm979_vm14, %v981_v8, %v977_v35  ;;  %v5014_v0 = vmul.f32 0.5, %v4857_v49  ;;  %v1237_v5 = vadd.f32 1.1283791, %v1236_v16 }
  0x9f   : > { %4146 = vrcp.f32 %v1248_v57  ;;  %v983_v2 = vmul.f32 %v982_v54, %v4951_v55  ;;  %v1275_v15 = vadd.f32 0.18741608, %v1274_v40  ;;  %v1286_v22 = vadd.f32 0.4994258, %v1285_v31 }
  0xa0   : > { %v5017_v33 = vmin.f32 %v1586_v4, 16.0  ;;  %v1258_v10 = vand.u32 2147483647, %v1248_v57  ;;  %v1551_v7 = vadd.f32 0.0036580483, %v1550_v42  ;;  %v4005_v21 = vunpack.c.l.bf16 %v4063_v27 }
  0xa1   : > { %v1562_v12 = vadd.f32 0.014752088, %v1561_v61  ;;  %v3769_v19 = vclamps-f32 %v983_v2, 1.0  ;;  %v1260_v29 = vand.u32 2147483648, %v1248_v57  ;;  %v1276_v60 = vmul.f32 %v1275_v15, %v4913_v9 }
  0xa2   : > { %v1287_v8 = vmul.f32 %v1286_v22, %v4913_v9  ;;  %v1238_v49 = vmul.f32 %v1237_v5, %v4860_v51  ;;  %vm1254_vm15 = vweird.f32 %v1248_v57  ;;  %v1552_v17 = vmul.f32 %v1551_v7, %v4979_v20 }
  0xa3   : > { %v1563_v55 = vmul.f32 %v1562_v12, %v4979_v20  ;;  %v1797_v62 = vadd.f32 1.0, %v3769_v19  ;;  %v1588_v28 = vmul.f32 2.1237322e-06, %v5017_v33  ;;  %v1599_v23 = vmul.f32 3.8918573e-05, %v5017_v33  ;;  %v1941_v61 = vld [vmem:[#allocation2 + $0x90] sm:$0xff] }
  0xa4   : > { %v5024_v18 = vadd.f32 1.0, %v1287_v8  ;;  %v1277_v3 = vadd.f32 1.1283791, %v1276_v60  ;;  %v1553_v13 = vadd.f32 0.05243302, %v1552_v17  ;;  %v4006_v41 = vunpack.c.h.bf16 %v4063_v27 }
  0xa5   : > { %v4147_v14 = vpop.eup %4146  ;;  %v1564_v34 = vadd.f32 0.112945676, %v1563_v55  ;;  %v1829_v9 = vmul.f32 %v1797_v62, %v453_v6  ;;  %vm5028_vm0 = vcmp.eq.f32.partialorder %v1258_v10, 8.507059e+37  ;;  %v1261_v63 = vor.u32 1.1754944e-38, %v1260_v29  ;;  %v5077_v29 = vld [vmem:[%s4310_s13 + $0x30] sm:$0xff]  }
  0xa6   : > { %v1250_v43 = vmul.f32 %v4147_v14, %v1248_v57  ;;  %vm1255_vm3 = vweird.f32 %v4147_v14  ;;  %4148 = vrcp.f32 %v5024_v18  ;;  %v5034_v11 = vmul.f32 0.5, %v4948_v38 }
  0xa7   : > { %v377_v16 = vmul.f32 %v4918_v39, %v4005_v21  ;;  %1908 = vst.msk [vmem:[#allocation2 + $0x99] sm:$0xff] %vm1850_vm1, %v1829_v9  ;;  %v1554_v50 = vmul.f32 %v1553_v13, %v4979_v20  ;;  %v1565_v25 = vmul.f32 %v1564_v34, %v4979_v20  ;;  %v1589_v59 = vadd.f32 0.00028619796, %v1588_v28  ;;  %vm5048_vm4 = vmor %vm1254_vm15, %vm1255_vm3 }
  0xa8   : > { %v1251_v30 = vsub.f32 1.0, %v1250_v43  ;;  %v5041_v24 = vmul.f32 %v1277_v3, %v4884_v56  ;;  %v1298_v36 = vand.u32 2147483647, %v5024_v18  ;;  %v1600_v53 = vadd.f32 0.001143296, %v1599_v23 }
  0xa9   : > { %v378_v26 = vmul.f32 %v4918_v39, %v4006_v41  ;;  %v1555_v4 = vadd.f32 0.18741608, %v1554_v50  ;;  %v1566_v40 = vadd.f32 0.4994258, %v1565_v25  ;;  %v1590_v31 = vmul.f32 %v1589_v59, %v5017_v33 }
  0xaa   : > { %v1252_v38 = vmul.f32 %v4147_v14, %v1251_v30  ;;  %vm1294_vm5 = vweird.f32 %v5024_v18  ;;  %v1601_v56 = vmul.f32 %v1600_v53, %v5017_v33  ;;  %v5055_v6 = vadd.f32 %v4945_v47, %v377_v16 }
  0xab   : > { %v5058_v35 = vadd.f32 %v4945_v47, %v378_v26  ;;  %v1556_v54 = vmul.f32 %v1555_v4, %v4979_v20  ;;  %v1567_v57 = vmul.f32 %v1566_v40, %v4979_v20  ;;  %v1591_v5 = vadd.f32 0.0036580483, %v1590_v31 }
  0xac   : > { %v1253_v27 = vadd.f32 %v4147_v14, %v1252_v38  ;;  %v4149_v2 = vpop.eup %4148  ;;  %vm5062_vm6 = vcmp.eq.f32.partialorder %v1298_v36, 8.507059e+37  ;;  %v1300_v22 = vand.u32 2147483648, %v5024_v18  ;;  %v1602_v10 = vadd.f32 0.014752088, %v1601_v56 }
  0xad   : > { %v5068_v7 = vmul.f32 0.70710677, %v5055_v6  ;;  %v1290_v21 = vmul.f32 %v4149_v2, %v5024_v18  ;;  %v1557_v19 = vadd.f32 1.1283791, %v1556_v54  ;;  %v5074_v20 = vmul.f32 0.70710677, %v5058_v35 }
  0xae   : > { %v1257_v12 = vsel %vm5048_vm4, %v4147_v14, %v1253_v27  ;;  %v1942_v60 = vld [vmem:[#allocation2 + $0x98] sm:$0xff]  ;;  %v1568_v17 = vadd.f32 1.0, %v1567_v57  ;;  %v1592_v55 = vmul.f32 %v1591_v5, %v5017_v33  ;;  %v1603_v62 = vmul.f32 %v1602_v10, %v5017_v33 }
  0xaf   : > { %v1262_v8 = vsel %vm5028_vm0, %v1261_v63, %v1257_v12  ;;  %v5083_v28 = vpack.c.bf16 %v1942_v60, %v1941_v61  ;;  %v1291_v14 = vsub.f32 1.0, %v1290_v21  ;;  %vm1295_vm7 = vweird.f32 %v4149_v2 }
  0xb0   : > { %v1263_v23 = vmul.f32 %v1262_v8, %v1238_v49  ;;  %v1301_v3 = vor.u32 1.1754944e-38, %v1300_v22  ;;  %4150 = vrcp.f32 %v1568_v17  ;;  %v4025_v13 = vunpack.c.l.bf16 %v5077_v29  ;;  %vm5091_vm8 = vmor %vm1294_vm5, %vm1295_vm7 }
  0xb1   : > { %v4026_v34 = vunpack.c.h.bf16 %v5077_v29  ;;  %3801 = vmatmul.msk.bf16.gmra.mxu1 %vm1850_vm1, %v5083_v28  ;;  %v1292_v9 = vmul.f32 %v4149_v2, %v1291_v14  ;;  %v1593_v43 = vadd.f32 0.05243302, %v1592_v55  ;;  %v1604_v51 = vadd.f32 0.112945676, %v1603_v62 }
  0xb2   : > { %v3776_v41 = vclamps-f32 %v1263_v23, 1.0  ;;  %v5096_v49 = vmul.f32 %v1557_v19, %v4966_v1  ;;  %v1578_v16 = vand.u32 2147483647, %v1568_v17  ;;  %v586_v30 = vmul.f32 %v5068_v7, %v5068_v7 }
  0xb3   : > { %v626_v50 = vmul.f32 %v5074_v20, %v5074_v20  ;;  %v1293_v25 = vadd.f32 %v4149_v2, %v1292_v9  ;;  %v1594_v36 = vmul.f32 %v1593_v43, %v5017_v33  ;;  %v1605_v18 = vmul.f32 %v1604_v51, %v5017_v33 }
  0xb4   : > { %v1804_v59 = vadd.f32 1.0, %v3776_v41  ;;  %vm1574_vm9 = vweird.f32 %v1568_v17  ;;  %v1580_v53 = vand.u32 2147483648, %v1568_v17  ;;  %v5104_v26 = vmin.f32 %v586_v30, 16.0 }
  0xb5   : > { %v5106_v38 = vmin.f32 %v626_v50, 16.0  ;;  %v1297_v1 = vsel %vm5091_vm8, %v4149_v2, %v1293_v25  ;;  %v1595_v40 = vadd.f32 0.18741608, %v1594_v36  ;;  %v1606_v31 = vadd.f32 0.4994258, %v1605_v18 }
  0xb6   : > { %v1836_v4 = vmul.f32 %v1804_v59, %v5009_v58  ;;  %v4151_v42 = vpop.eup %4150  ;;  %v1302_v56 = vsel %vm5062_vm6, %v1301_v3, %v1297_v1  ;;  %v588_v61 = vmul.f32 2.1237322e-06, %v5104_v26  ;;  %v599_v27 = vmul.f32 3.8918573e-05, %v5104_v26 }
  0xb7   : > { %v628_v54 = vmul.f32 2.1237322e-06, %v5106_v38  ;;  %v1303_v57 = vmul.f32 %v1302_v56, %v5041_v24  ;;  %v1570_v5 = vmul.f32 %v4151_v42, %v1568_v17  ;;  %vm5118_vm10 = vcmp.eq.f32.partialorder %v1578_v16, 8.507059e+37 }
  0xb8   : > { %1915 = vst.msk [vmem:[#allocation2 + $0xf1] sm:$0xff] %vm1850_vm1, %v1836_v4  ;;  %v1596_v58 = vmul.f32 %v1595_v40, %v5017_v33  ;;  %v1607_v15 = vmul.f32 %v1606_v31, %v5017_v33  ;;  %v589_v22 = vadd.f32 0.00028619796, %v588_v61  ;;  %v600_v10 = vadd.f32 0.001143296, %v599_v27 }
  0xb9   : > { %v629_v12 = vadd.f32 0.00028619796, %v628_v54  ;;  %v3777_v21 = vclamps-f32 %v1303_v57, 1.0  ;;  %v1571_v19 = vsub.f32 1.0, %v1570_v5  ;;  %vm1575_vm11 = vweird.f32 %v4151_v42 }
  0xba   : > { %v1597_v29 = vadd.f32 1.1283791, %v1596_v58  ;;  %v1608_v60 = vadd.f32 1.0, %v1607_v15  ;;  %v590_v24 = vmul.f32 %v589_v22, %v5104_v26  ;;  %v601_v8 = vmul.f32 %v600_v10, %v5104_v26  ;;  %vm5130_vm12 = vmor %vm1574_vm9, %vm1575_vm11 }
  0xbb   : > { %v387_v55 = vmul.f32 %v4918_v39, %v4025_v13  ;;  %v1805_v62 = vadd.f32 1.0, %v3777_v21  ;;  %v1572_v23 = vmul.f32 %v4151_v42, %v1571_v19  ;;  %v630_v14 = vmul.f32 %v629_v12, %v5106_v38 }
  0xbc   : > { %v639_v33 = vmul.f32 3.8918573e-05, %v5106_v38  ;;  %v1581_v41 = vor.u32 1.1754944e-38, %v1580_v53  ;;  %v5135_v9 = vmul.f32 %v1597_v29, %v4972_v32  ;;  %4152 = vrcp.f32 %v1608_v60 }
  0xbd   : > { %v388_v43 = vmul.f32 %v4918_v39, %v4026_v34  ;;  %v1837_v13 = vmul.f32 %v1805_v62, %v5014_v0  ;;  %v1573_v51 = vadd.f32 %v4151_v42, %v1572_v23  ;;  %vm1614_vm13 = vweird.f32 %v1608_v60 }
  0xbe   : > { %v591_v63 = vadd.f32 0.0036580483, %v590_v24  ;;  %v1618_v16 = vand.u32 2147483647, %v1608_v60  ;;  %v1620_v30 = vand.u32 2147483648, %v1608_v60  ;;  %v5140_v17 = vadd.f32 %v4945_v47, %v387_v55 }
  0xbf   : > { %v602_v50 = vadd.f32 0.014752088, %v601_v8  ;;  %1916 = vst.msk [vmem:[#allocation2 + $0xf9] sm:$0xff] %vm1850_vm1, %v1837_v13  ;;  %v1577_v32 = vsel %vm5130_vm12, %v4151_v42, %v1573_v51  ;;  %v631_v59 = vadd.f32 0.0036580483, %v630_v14  ;;  %v5150_v18 = vadd.f32 %v4945_v47, %v388_v43  ;;  %v1949_v2 = vld [vmem:[#allocation2 + $0xf0] sm:$0xff] }
  0xc0   : > { %v592_v25 = vmul.f32 %v591_v63, %v5104_v26  ;;  %v640_v34 = vadd.f32 0.001143296, %v639_v33  ;;  %v1582_v0 = vsel %vm5118_vm10, %v1581_v41, %v1577_v32  ;;  %v5153_v53 = vmul.f32 0.70710677, %v5140_v17 }
  0xc1   : > { %v603_v36 = vmul.f32 %v602_v50, %v5104_v26  ;;  %v1583_v1 = vmul.f32 %v1582_v0, %v5096_v49  ;;  %v632_v40 = vmul.f32 %v631_v59, %v5106_v38  ;;  %vm5158_vm14 = vcmp.eq.f32.partialorder %v1618_v16, 8.507059e+37 }
  0xc2   : > { %v593_v4 = vadd.f32 0.05243302, %v592_v25  ;;  %v641_v31 = vmul.f32 %v640_v34, %v5106_v38  ;;  %v4153_v42 = vpop.eup %4152  ;;  %v5163_v27 = vmul.f32 0.70710677, %v5150_v18  ;;  %v986_v54 = vmul.f32 %v5153_v53, %v5153_v53 }
  0xc3   : > { %v604_v61 = vadd.f32 0.112945676, %v603_v36  ;;  %v3784_v57 = vclamps-f32 %v1583_v1, 1.0  ;;  %v1610_v5 = vmul.f32 %v4153_v42, %v1608_v60  ;;  %vm1615_vm15 = vweird.f32 %v4153_v42 }
  0xc4   : > { %v594_v49 = vmul.f32 %v593_v4, %v5104_v26  ;;  %v633_v15 = vadd.f32 0.05243302, %v632_v40  ;;  %v642_v22 = vadd.f32 0.014752088, %v641_v31  ;;  %v5169_v10 = vmin.f32 %v986_v54, 16.0  ;;  %vm5182_vm0 = vmor %vm1614_vm13, %vm1615_vm15 }
  0xc5   : > { %v605_v58 = vmul.f32 %v604_v61, %v5104_v26  ;;  %v1611_v12 = vsub.f32 1.0, %v1610_v5  ;;  %v1812_v21 = vadd.f32 1.0, %v3784_v57  ;;  %v1026_v29 = vmul.f32 %v5163_v27, %v5163_v27 }
  0xc6   : > { %v595_v19 = vadd.f32 0.18741608, %v594_v49  ;;  %v1950_v24 = vld [vmem:[#allocation2 + $0xf8] sm:$0xff]  ;;  %v634_v55 = vmul.f32 %v633_v15, %v5106_v38  ;;  %v643_v62 = vmul.f32 %v642_v22, %v5106_v38  ;;  %v988_v23 = vmul.f32 2.1237322e-06, %v5169_v10 }
  0xc7   : > { %v606_v8 = vadd.f32 0.4994258, %v605_v58  ;;  %v5176_v14 = vpack.c.bf16 %v1950_v24, %v1949_v2  ;;  %v1612_v33 = vmul.f32 %v4153_v42, %v1611_v12  ;;  %v1844_v3 = vmul.f32 %v1812_v21, %v5034_v11 }
  0xc8   : > { %v596_v41 = vmul.f32 %v595_v19, %v5104_v26  ;;  %v1621_v13 = vor.u32 1.1754944e-38, %v1620_v30  ;;  %v644_v63 = vadd.f32 0.112945676, %v643_v62  ;;  %v989_v16 = vadd.f32 0.00028619796, %v988_v23 }
  0xc9   : > { %v607_v51 = vmul.f32 %v606_v8, %v5104_v26  ;;  %3805 = vmatmul.msk.bf16.gmra.mxu2 %vm1850_vm1, %v5176_v14  ;;  %v1613_v50 = vadd.f32 %v4153_v42, %v1612_v33  ;;  %1923 = vst.msk [vmem:[#allocation2 + $0x151] sm:$0xff] %vm1850_vm1, %v1844_v3  ;;  %v635_v11 = vadd.f32 0.18741608, %v634_v55  ;;  %v999_v32 = vmul.f32 3.8918573e-05, %v5169_v10  ;;  %v4072_v26 = vld [vmem:[%s4310_s13 + $0x50] sm:$0xff]  }
  0xca   : > { %v5191_v60 = vmin.f32 %v1026_v29, 16.0  ;;  %v597_v25 = vadd.f32 1.1283791, %v596_v41  ;;  %v645_v34 = vmul.f32 %v644_v63, %v5106_v38  ;;  %v990_v30 = vmul.f32 %v989_v16, %v5169_v10 }
  0xcb   : > { %v608_v59 = vadd.f32 1.0, %v607_v51  ;;  %v469_v0 = vmul.f32 0.5, %v4963_v46  ;;  %v1617_v36 = vsel %vm5182_vm0, %v4153_v42, %v1613_v50  ;;  %v1000_v1 = vadd.f32 0.001143296, %v999_v32 }
  0xcc   : > { %v1028_v4 = vmul.f32 2.1237322e-06, %v5191_v60  ;;  %v1622_v40 = vsel %vm5158_vm14, %v1621_v13, %v1617_v36  ;;  %v5203_v31 = vmul.f32 0.5, %v5055_v6  ;;  %v5206_v61 = vmul.f32 0.5, %v5058_v35 }
  0xcd   : > { %4154 = vrcp.f32 %v608_v59  ;;  %v1623_v54 = vmul.f32 %v1622_v40, %v5135_v9  ;;  %v636_v46 = vmul.f32 %v635_v11, %v5106_v38  ;;  %v646_v57 = vadd.f32 0.4994258, %v645_v34 }
  0xce   : > { %v4041_v5 = vunpack.c.l.bf16 %v4072_v26  ;;  %v5211_v42 = vmul.f32 %v597_v25, %v5068_v7  ;;  %v991_v49 = vadd.f32 0.0036580483, %v990_v30  ;;  %v1001_v56 = vmul.f32 %v1000_v1, %v5169_v10 }
  0xcf   : > { %v1029_v2 = vadd.f32 0.00028619796, %v1028_v4  ;;  %v3785_v58 = vclamps-f32 %v1623_v54, 1.0  ;;  %vm614_vm3 = vweird.f32 %v608_v59  ;;  %v618_v6 = vand.u32 2147483647, %v608_v59 }
  0xd0   : > { %v647_v35 = vmul.f32 %v646_v57, %v5106_v38  ;;  %v992_v15 = vmul.f32 %v991_v49, %v5169_v10  ;;  %v1002_v22 = vadd.f32 0.014752088, %v1001_v56  ;;  %v1039_v12 = vmul.f32 3.8918573e-05, %v5191_v60 }
  0xd1   : > { %v1030_v9 = vmul.f32 %v1029_v2, %v5191_v60  ;;  %v1813_v21 = vadd.f32 1.0, %v3785_v58  ;;  %v620_v19 = vand.u32 2147483648, %v608_v59  ;;  %v637_v7 = vadd.f32 1.1283791, %v636_v46 }
  0xd2   : > { %v648_v29 = vadd.f32 1.0, %v647_v35  ;;  %v993_v8 = vadd.f32 0.05243302, %v992_v15  ;;  %v1003_v55 = vmul.f32 %v1002_v22, %v5169_v10  ;;  %v1040_v23 = vadd.f32 0.001143296, %v1039_v12 }
  0xd3   : > { %v4155_v24 = vpop.eup %4154  ;;  %v1031_v62 = vadd.f32 0.0036580483, %v1030_v9  ;;  %v1845_v33 = vmul.f32 %v1813_v21, %v469_v0  ;;  %v4042_v38 = vunpack.c.h.bf16 %v4072_v26  ;;  %v395_v13 = vmul.f32 %v4918_v39, %v4041_v5 }
  0xd4   : > { %v610_v3 = vmul.f32 %v4155_v24, %v608_v59  ;;  %4156 = vrcp.f32 %v648_v29  ;;  %vm615_vm4 = vweird.f32 %v4155_v24  ;;  %v658_v41 = vand.u32 2147483647, %v648_v29  ;;  %v1957_v59 = vld [vmem:[#allocation2 + $0x150] sm:$0xff] }
  0xd5   : > { %v994_v43 = vmul.f32 %v993_v8, %v5169_v10  ;;  %1924 = vst.msk [vmem:[#allocation2 + $0x159] sm:$0xff] %vm1850_vm1, %v1845_v33  ;;  %v1004_v63 = vadd.f32 0.112945676, %v1003_v55  ;;  %v1032_v16 = vmul.f32 %v1031_v62, %v5191_v60  ;;  %v1041_v50 = vmul.f32 %v1040_v23, %v5191_v60  ;;  %vm5232_vm6 = vmor %vm614_vm3, %vm615_vm4 }
  0xd6   : > { %v611_v51 = vsub.f32 1.0, %v610_v3  ;;  %vm5224_vm5 = vcmp.eq.f32.partialorder %v618_v6, 8.507059e+37  ;;  %v621_v32 = vor.u32 1.1754944e-38, %v620_v19  ;;  %v638_v25 = vmul.f32 %v637_v7, %v5074_v20 }
  0xd7   : > { %v660_v34 = vand.u32 2147483648, %v648_v29  ;;  %v995_v26 = vadd.f32 0.18741608, %v994_v43  ;;  %v1005_v0 = vmul.f32 %v1004_v63, %v5169_v10  ;;  %v1033_v36 = vadd.f32 0.05243302, %v1032_v16 }
  0xd8   : > { %v612_v30 = vmul.f32 %v4155_v24, %v611_v51  ;;  %vm654_vm7 = vweird.f32 %v648_v29  ;;  %vm5236_vm8 = vcmp.eq.f32.partialorder %v658_v41, 8.507059e+37  ;;  %v1042_v40 = vadd.f32 0.014752088, %v1041_v50 }
  0xd9   : > { %v396_v20 = vmul.f32 %v4918_v39, %v4042_v38  ;;  %v1006_v57 = vadd.f32 0.4994258, %v1005_v0  ;;  %v1034_v5 = vmul.f32 %v1033_v36, %v5191_v60  ;;  %v5243_v49 = vadd.f32 %v4945_v47, %v395_v13  ;;  %v4076_v13 = vld [vmem:[%s4310_s13 + $0x70] sm:$0xff]  }
  0xda   : > { %v4157_v54 = vpop.eup %4156  ;;  %v613_v46 = vadd.f32 %v4155_v24, %v612_v30  ;;  %v996_v2 = vmul.f32 %v995_v26, %v5169_v10  ;;  %v1043_v58 = vmul.f32 %v1042_v40, %v5191_v60  ;;  %v661_v15 = vor.u32 1.1754944e-38, %v660_v34 }
  0xdb   : > { %v650_v56 = vmul.f32 %v4157_v54, %v648_v29  ;;  %v5248_v6 = vadd.f32 %v4945_v47, %v396_v20  ;;  %v1007_v22 = vmul.f32 %v1006_v57, %v5169_v10  ;;  %v1035_v9 = vadd.f32 0.18741608, %v1034_v5 }
  0xdc   : > { %v617_v35 = vsel %vm5232_vm6, %v4155_v24, %v613_v46  ;;  %v1958_v12 = vld [vmem:[#allocation2 + $0x158] sm:$0xff]  ;;  %vm655_vm9 = vweird.f32 %v4157_v54  ;;  %v1044_v7 = vadd.f32 0.112945676, %v1043_v58  ;;  %v5259_v23 = vmul.f32 0.70710677, %v5243_v49 }
  0xdd   : > { %v622_v21 = vsel %vm5224_vm5, %v621_v32, %v617_v35  ;;  %v651_v19 = vsub.f32 1.0, %v650_v56  ;;  %v5255_v8 = vpack.c.bf16 %v1958_v12, %v1957_v59  ;;  %v1008_v62 = vadd.f32 1.0, %v1007_v22  ;;  %vm5268_vm10 = vmor %vm654_vm7, %vm655_vm9  ;;  %v5303_v56 = vld [vmem:[%s4310_s13 + $0x10] sm:$0xff]  }
  0xde   : > { %v623_v55 = vmul.f32 %v622_v21, %v5211_v42  ;;  %v997_v33 = vadd.f32 1.1283791, %v996_v2  ;;  %v1045_v10 = vmul.f32 %v1044_v7, %v5191_v60  ;;  %v5263_v3 = vmul.f32 0.70710677, %v5248_v6 }
  0xdf   : > { %v652_v24 = vmul.f32 %v4157_v54, %v651_v19  ;;  %3809 = vmatmul.msk.bf16.gmra.mxu3 %vm1850_vm1, %v5255_v8  ;;  %v5273_v42 = vmul.f32 0.5, %v5140_v17  ;;  %4158 = vrcp.f32 %v1008_v62  ;;  %v1036_v43 = vmul.f32 %v1035_v9, %v5191_v60 }
  0xe0   : > { %v3760_v38 = vclamps-f32 %v623_v55, 1.0  ;;  %v1018_v63 = vand.u32 2147483647, %v1008_v62  ;;  %v1020_v16 = vand.u32 2147483648, %v1008_v62  ;;  %v1046_v50 = vadd.f32 0.4994258, %v1045_v10 }
  0xe1   : > { %v653_v51 = vadd.f32 %v4157_v54, %v652_v24  ;;  %v5278_v32 = vmul.f32 0.5, %v5150_v18  ;;  %v1306_v29 = vmul.f32 %v5259_v23, %v5259_v23  ;;  %v1346_v34 = vmul.f32 %v5263_v3, %v5263_v3 }
  0xe2   : > { %v1788_v11 = vadd.f32 1.0, %v3760_v38  ;;  %v998_v30 = vmul.f32 %v997_v33, %v5153_v53  ;;  %v1047_v26 = vmul.f32 %v1046_v50, %v5191_v60  ;;  %v4057_v0 = vunpack.c.l.bf16 %v4076_v13 }
  0xe3   : > { %v657_v17 = vsel %vm5268_vm10, %v4157_v54, %v653_v51  ;;  %v1037_v1 = vadd.f32 1.1283791, %v1036_v43  ;;  %v5291_v40 = vmin.f32 %v1306_v29, 16.0  ;;  %vm5293_vm11 = vcmp.eq.f32.partialorder %v1018_v63, 8.507059e+37 }
  0xe4   : > { %v662_v36 = vsel %vm5236_vm8, %v661_v15, %v657_v17  ;;  %v1820_v18 = vmul.f32 %v1788_v11, %v5203_v31  ;;  %v1021_v54 = vor.u32 1.1754944e-38, %v1020_v16  ;;  %v1048_v57 = vadd.f32 1.0, %v1047_v26 }
  0xe5   : > { %v663_v20 = vmul.f32 %v662_v36, %v638_v25  ;;  %v4159_v53 = vpop.eup %4158  ;;  %vm1014_vm12 = vweird.f32 %v1008_v62  ;;  %v1308_v60 = vmul.f32 2.1237322e-06, %v5291_v40  ;;  %v1319_v4 = vmul.f32 3.8918573e-05, %v5291_v40 }
  0xe6   : > { %1899 = vst.msk [vmem:[#allocation2 + $0x31] sm:$0xff] %vm1850_vm1, %v1820_v18  ;;  %v5300_v31 = vmin.f32 %v1346_v34, 16.0  ;;  %v1010_v59 = vmul.f32 %v4159_v53, %v1008_v62  ;;  %4160 = vrcp.f32 %v1048_v57  ;;  %v4058_v25 = vunpack.c.h.bf16 %v4076_v13 }
  0xe7   : > { %v3761_v5 = vclamps-f32 %v663_v20, 1.0  ;;  %vm1015_vm13 = vweird.f32 %v4159_v53  ;;  %v1058_v2 = vand.u32 2147483647, %v1048_v57  ;;  %v1309_v58 = vadd.f32 0.00028619796, %v1308_v60 }
  0xe8   : > { %v403_v35 = vmul.f32 %v4918_v39, %v4057_v0  ;;  %v1011_v22 = vsub.f32 1.0, %v1010_v59  ;;  %v1320_v9 = vadd.f32 0.001143296, %v1319_v4  ;;  %v1348_v12 = vmul.f32 2.1237322e-06, %v5300_v31  ;;  %vm5316_vm15 = vmor %vm1014_vm12, %vm1015_vm13 }
  0xe9   : > { %v1789_v15 = vadd.f32 1.0, %v3761_v5  ;;  %v5308_v21 = vmul.f32 %v1037_v1, %v5163_v27  ;;  %vm1054_vm14 = vweird.f32 %v1048_v57  ;;  %v1060_v19 = vand.u32 2147483648, %v1048_v57 }
  0xea   : > { %v4009_v7 = vunpack.c.l.bf16 %v5303_v56  ;;  %v1012_v24 = vmul.f32 %v4159_v53, %v1011_v22  ;;  %v1310_v33 = vmul.f32 %v1309_v58, %v5291_v40  ;;  %v1321_v10 = vmul.f32 %v1320_v9, %v5291_v40 }
  0xeb   : > { %v1821_v55 = vmul.f32 %v1789_v15, %v5206_v61  ;;  %vm5320_vm0 = vcmp.eq.f32.partialorder %v1058_v2, 8.507059e+37  ;;  %v1349_v41 = vadd.f32 0.00028619796, %v1348_v12  ;;  %v1359_v43 = vmul.f32 3.8918573e-05, %v5300_v31 }
  0xec   : > { %v404_v61 = vmul.f32 %v4918_v39, %v4058_v25  ;;  %v4161_v13 = vpop.eup %4160  ;;  %v1013_v51 = vadd.f32 %v4159_v53, %v1012_v24  ;;  %v1311_v63 = vadd.f32 0.0036580483, %v1310_v33  ;;  %v1322_v16 = vadd.f32 0.014752088, %v1321_v10 }
  0xed   : > { %1900 = vst.msk [vmem:[#allocation2 + $0x39] sm:$0xff] %vm1850_vm1, %v1821_v55  ;;  %v5328_v62 = vadd.f32 %v4945_v47, %v403_v35  ;;  %v1050_v50 = vmul.f32 %v4161_v13, %v1048_v57  ;;  %vm1055_vm3 = vweird.f32 %v4161_v13  ;;  %v1350_v11 = vmul.f32 %v1349_v41, %v5300_v31 }
  0xee   : > { %v1360_v29 = vadd.f32 0.001143296, %v1359_v43  ;;  %v1017_v34 = vsel %vm5316_vm15, %v4159_v53, %v1013_v51  ;;  %v1312_v17 = vmul.f32 %v1311_v63, %v5291_v40  ;;  %v1323_v26 = vmul.f32 %v1322_v16, %v5291_v40  ;;  %v1933_v53 = vld [vmem:[#allocation2 + $0x30] sm:$0xff]  ;;  %vm5347_vm4 = vmor %vm1054_vm14, %vm1055_vm3 }
  0xef   : > { %v5336_v0 = vadd.f32 %v4945_v47, %v404_v61  ;;  %v1022_v36 = vsel %vm5293_vm11, %v1021_v54, %v1017_v34  ;;  %v1051_v18 = vsub.f32 1.0, %v1050_v50  ;;  %v1351_v1 = vadd.f32 0.0036580483, %v1350_v11 }
  0xf0   : > { %v1361_v20 = vmul.f32 %v1360_v29, %v5300_v31  ;;  %v1023_v60 = vmul.f32 %v1022_v36, %v998_v30  ;;  %v1313_v4 = vadd.f32 0.05243302, %v1312_v17  ;;  %v1324_v5 = vadd.f32 0.112945676, %v1323_v26 }
  0xf1   : > { %v5342_v59 = vmul.f32 0.70710677, %v5328_v62  ;;  %v1052_v25 = vmul.f32 %v4161_v13, %v1051_v18  ;;  %v1061_v2 = vor.u32 1.1754944e-38, %v1060_v19  ;;  %v1352_v58 = vmul.f32 %v1351_v1, %v5300_v31 }
  0xf2   : > { %v1362_v47 = vadd.f32 0.014752088, %v1361_v20  ;;  %v3770_v35 = vclamps-f32 %v1023_v60, 1.0  ;;  %v1314_v30 = vmul.f32 %v1313_v4, %v5291_v40  ;;  %v1325_v54 = vmul.f32 %v1324_v5, %v5291_v40 }
  0xf3   : > { %v1626_v15 = vmul.f32 %v5342_v59, %v5342_v59  ;;  %v1053_v9 = vadd.f32 %v4161_v13, %v1052_v25  ;;  %v1353_v12 = vadd.f32 0.05243302, %v1352_v58  ;;  %v5357_v55 = vmul.f32 0.70710677, %v5336_v0 }
  0xf4   : > { %v1934_v22 = vld [vmem:[#allocation2 + $0x38] sm:$0xff]  ;;  %v1363_v19 = vmul.f32 %v1362_v47, %v5300_v31  ;;  %v1798_v24 = vadd.f32 1.0, %v3770_v35  ;;  %v1315_v33 = vadd.f32 0.18741608, %v1314_v30  ;;  %v1326_v10 = vadd.f32 0.4994258, %v1325_v54 }
  0xf5   : > { %v5359_v57 = vpack.c.bf16 %v1934_v22, %v1933_v53  ;;  %v1057_v38 = vsel %vm5347_vm4, %v4161_v13, %v1053_v9  ;;  %v1354_v41 = vmul.f32 %v1353_v12, %v5300_v31  ;;  %v5364_v61 = vmin.f32 %v1626_v15, 16.0 }
  0xf6   : > { %v1364_v43 = vadd.f32 0.112945676, %v1363_v19  ;;  %v1062_v51 = vsel %vm5320_vm0, %v1061_v2, %v1057_v38  ;;  %v1830_v63 = vmul.f32 %v1798_v24, %v5273_v42  ;;  %v1316_v16 = vmul.f32 %v1315_v33, %v5291_v40 }
  0xf7   : > { %3797 = vmatmul.msk.bf16.gmra.mxu0 %vm1850_vm1, %v5359_v57  ;;  %v1327_v50 = vmul.f32 %v1326_v10, %v5291_v40  ;;  %v1063_v11 = vmul.f32 %v1062_v51, %v5308_v21  ;;  %v1355_v13 = vadd.f32 0.18741608, %v1354_v41  ;;  %v1628_v34 = vmul.f32 2.1237322e-06, %v5364_v61 }
  0xf8   : > { %v1365_v29 = vmul.f32 %v1364_v43, %v5300_v31  ;;  %1909 = vst.msk [vmem:[#allocation2 + $0xa9] sm:$0xff] %vm1850_vm1, %v1830_v63  ;;  %v1639_v26 = vmul.f32 3.8918573e-05, %v5364_v61  ;;  %v1666_v27 = vmul.f32 %v5357_v55, %v5357_v55  ;;  %v4010_v42 = vunpack.c.h.bf16 %v5303_v56  ;;  %v5423_v63 = vld [vmem:[%s6520_s2] ss:$0 sm:$0xff] }
  0xf9   : > { %v1328_v17 = vadd.f32 1.0, %v1327_v50  ;;  %v3771_v36 = vclamps-f32 %v1063_v11, 1.0  ;;  %v1356_v40 = vmul.f32 %v1355_v13, %v5300_v31  ;;  %v1629_v21 = vadd.f32 0.00028619796, %v1628_v34 }
  0xfa   : > { %v1366_v18 = vadd.f32 0.4994258, %v1365_v29  ;;  %v5383_v1 = vmul.f32 0.5, %v5243_v49  ;;  %v5386_v20 = vmul.f32 0.5, %v5248_v6  ;;  %v1317_v60 = vadd.f32 1.1283791, %v1316_v16 }
  0xfb   : > { %4162 = vrcp.f32 %v1328_v17  ;;  %v1799_v4 = vadd.f32 1.0, %v3771_v36  ;;  %v1338_v5 = vand.u32 2147483647, %v1328_v17  ;;  %v1340_v53 = vand.u32 2147483648, %v1328_v17 }
  0xfc   : > { %v1367_v25 = vmul.f32 %v1366_v18, %v5300_v31  ;;  %v1357_v2 = vadd.f32 1.1283791, %v1356_v40  ;;  %v1630_v58 = vmul.f32 %v1629_v21, %v5364_v61  ;;  %v1640_v47 = vadd.f32 0.001143296, %v1639_v26 }
  0xfd   : > { %v5390_v35 = vmin.f32 %v1666_v27, 16.0  ;;  %v1831_v46 = vmul.f32 %v1799_v4, %v5278_v32  ;;  %v379_v6 = vmul.f32 %v4918_v39, %v4009_v7  ;;  %v380_v30 = vmul.f32 %v4918_v39, %v4010_v42 }
  0xfe   : > { %v5393_v49 = vadd.f32 1.0, %v1367_v25  ;;  %v1631_v54 = vadd.f32 0.0036580483, %v1630_v58  ;;  %v1641_v15 = vmul.f32 %v1640_v47, %v5364_v61  ;;  %v1318_v9 = vmul.f32 %v1317_v60, %v5259_v23 }
  0xff   : > { %v1668_v31 = vmul.f32 2.1237322e-06, %v5390_v35  ;;  %v1679_v22 = vmul.f32 3.8918573e-05, %v5390_v35  ;;  %1910 = vst.msk [vmem:[#allocation2 + $0xb1] sm:$0xff] %vm1850_vm1, %v1831_v46  ;;  %vm1334_vm5 = vweird.f32 %v1328_v17  ;;  %vm5404_vm6 = vcmp.eq.f32.partialorder %v1338_v5, 8.507059e+37 }
 0x100   : > { %4164 = vrcp.f32 %v5393_v49  ;;  %v1341_v39 = vor.u32 1.1754944e-38, %v1340_v53  ;;  %v5410_v7 = vmul.f32 %v1357_v2, %v5263_v3  ;;  %v1632_v12 = vmul.f32 %v1631_v54, %v5364_v61  ;;  %v1943_v50 = vld [vmem:[#allocation2 + $0xa8] sm:$0xff] }
 0x101   : > { %v4163_v56 = vpop.eup %4162  ;;  %v1642_v19 = vadd.f32 0.014752088, %v1641_v15  ;;  %vm1374_vm7 = vweird.f32 %v5393_v49  ;;  %v1378_v23 = vand.u32 2147483647, %v5393_v49  ;;  %v1380_v33 = vand.u32 2147483648, %v5393_v49  ;;  %v4069_v15 = vld [vmem:[%s4310_s13 + $0x38] sm:$0xff]  }
 0x102   : > { %v1330_v24 = vmul.f32 %v4163_v56, %v1328_v17  ;;  %v1633_v10 = vadd.f32 0.05243302, %v1632_v12  ;;  %v1669_v41 = vadd.f32 0.00028619796, %v1668_v31  ;;  %v1680_v43 = vadd.f32 0.001143296, %v1679_v22 }
 0x103   : > { %v1643_v38 = vmul.f32 %v1642_v19, %v5364_v61  ;;  %vm1335_vm8 = vweird.f32 %v4163_v56  ;;  %v5418_v3 = vmul.f32 0.5, %v5328_v62  ;;  %v5426_v16 = vadd.f32 %v5423_v63, %v379_v6 }
 0x104   : > { %v1331_v51 = vsub.f32 1.0, %v1330_v24  ;;  %v1634_v11 = vmul.f32 %v1633_v10, %v5364_v61  ;;  %v1670_v29 = vmul.f32 %v1669_v41, %v5390_v35  ;;  %v1681_v34 = vmul.f32 %v1680_v43, %v5390_v35  ;;  %vm5442_vm9 = vmor %vm1334_vm5, %vm1335_vm8 }
 0x105   : > { %v1644_v13 = vadd.f32 0.112945676, %v1643_v38  ;;  %v5432_v62 = vmul.f32 0.5, %v5336_v0  ;;  %v5435_v42 = vadd.f32 %v5423_v63, %v380_v30  ;;  %v5438_v36 = vmul.f32 0.70710677, %v5426_v16 }
 0x106   : > { %v4165_v26 = vpop.eup %4164  ;;  %v1332_v27 = vmul.f32 %v4163_v56, %v1331_v51  ;;  %v1944_v40 = vld [vmem:[#allocation2 + $0xb0] sm:$0xff]  ;;  %v1381_v60 = vor.u32 1.1754944e-38, %v1380_v33  ;;  %v1635_v4 = vadd.f32 0.18741608, %v1634_v11  ;;  %v1671_v25 = vadd.f32 0.0036580483, %v1670_v29 }
 0x107   : > { %v1370_v21 = vmul.f32 %v4165_v26, %v5393_v49  ;;  %v1645_v0 = vmul.f32 %v1644_v13, %v5364_v61  ;;  %v5448_v5 = vpack.c.bf16 %v1944_v40, %v1943_v50  ;;  %v1682_v2 = vadd.f32 0.014752088, %v1681_v34 }
 0x108   : > { %v1333_v53 = vadd.f32 %v4163_v56, %v1332_v27  ;;  %vm1375_vm10 = vweird.f32 %v4165_v26  ;;  %v666_v17 = vmul.f32 %v5438_v36, %v5438_v36  ;;  %v1672_v6 = vmul.f32 %v1671_v25, %v5390_v35 }
 0x109   : > { %v1371_v58 = vsub.f32 1.0, %v1370_v21  ;;  %v1646_v47 = vadd.f32 0.4994258, %v1645_v0  ;;  %3802 = vmatmul.msk.bf16.gmra.mxu1 %vm1850_vm1, %v5448_v5  ;;  %v1683_v30 = vmul.f32 %v1682_v2, %v5390_v35  ;;  %v5459_v54 = vmul.f32 0.70710677, %v5435_v42  ;;  %vm5468_vm11 = vmor %vm1374_vm7, %vm1375_vm10 }
 0x10a   : > { %v1337_v46 = vsel %vm5442_vm9, %v4163_v56, %v1333_v53  ;;  %v1636_v12 = vmul.f32 %v1635_v4, %v5364_v61  ;;  %v1673_v33 = vadd.f32 0.05243302, %v1672_v6  ;;  %v5472_v38 = vmin.f32 %v666_v17, 16.0 }
 0x10b   : > { %v1342_v31 = vsel %vm5404_vm6, %v1341_v39, %v1337_v46  ;;  %v1372_v22 = vmul.f32 %v4165_v26, %v1371_v58  ;;  %v1647_v19 = vmul.f32 %v1646_v47, %v5364_v61  ;;  %v1684_v10 = vadd.f32 0.112945676, %v1683_v30 }
 0x10c   : > { %v1343_v24 = vmul.f32 %v1342_v31, %v1318_v9  ;;  %vm1379_vm12 = vcmp.eq.f32.partialorder %v1378_v23, 8.507059e+37  ;;  %v4029_v39 = vunpack.c.l.bf16 %v4069_v15  ;;  %v1674_v51 = vmul.f32 %v1673_v33, %v5390_v35 }
 0x10d   : > { %v1373_v41 = vadd.f32 %v4165_v26, %v1372_v22  ;;  %v1648_v32 = vadd.f32 1.0, %v1647_v19  ;;  %v1685_v61 = vmul.f32 %v1684_v10, %v5390_v35  ;;  %v668_v9 = vmul.f32 2.1237322e-06, %v5472_v38 }
 0x10e   : > { %v3778_v43 = vclamps-f32 %v1343_v24, 1.0  ;;  %v1637_v50 = vadd.f32 1.1283791, %v1636_v12  ;;  %v706_v11 = vmul.f32 %v5459_v54, %v5459_v54  ;;  %v1675_v34 = vadd.f32 0.18741608, %v1674_v51 }
 0x10f   : > { %v1377_v49 = vsel %vm5468_vm11, %v4165_v26, %v1373_v41  ;;  %4166 = vrcp.f32 %v1648_v32  ;;  %v1658_v23 = vand.u32 2147483647, %v1648_v32  ;;  %v1686_v40 = vadd.f32 0.4994258, %v1685_v61 }
 0x110   : > { %v1382_v13 = vsel %vm1379_vm12, %v1381_v60, %v1377_v49  ;;  %v1806_v29 = vadd.f32 1.0, %v3778_v43  ;;  %v669_v18 = vadd.f32 0.00028619796, %v668_v9  ;;  %v4030_v21 = vunpack.c.h.bf16 %v4069_v15 }
 0x111   : > { %v1383_v27 = vmul.f32 %v1382_v13, %v5410_v7  ;;  %v1660_v0 = vand.u32 2147483648, %v1648_v32  ;;  %v1676_v53 = vmul.f32 %v1675_v34, %v5390_v35  ;;  %v679_v26 = vmul.f32 3.8918573e-05, %v5472_v38 }
 0x112   : > { %v1838_v4 = vmul.f32 %v1806_v29, %v5383_v1  ;;  %v1687_v2 = vmul.f32 %v1686_v40, %v5390_v35  ;;  %v670_v60 = vmul.f32 %v669_v18, %v5472_v38  ;;  %v5487_v58 = vmin.f32 %v706_v11, 16.0  ;;  %v5499_v35 = vld [vmem:[%s6519_s1] ss:$0 sm:$0xff] }
 0x113   : > { %v3779_v25 = vclamps-f32 %v1383_v27, 1.0  ;;  %v1638_v7 = vmul.f32 %v1637_v50, %v5342_v59  ;;  %vm1654_vm13 = vweird.f32 %v1648_v32  ;;  %vm5491_vm14 = vcmp.eq.f32.partialorder %v1658_v23, 8.507059e+37 }
 0x114   : > { %1917 = vst.msk [vmem:[#allocation2 + $0x109] sm:$0xff] %vm1850_vm1, %v1838_v4  ;;  %v680_v1 = vadd.f32 0.001143296, %v679_v26  ;;  %v1688_v6 = vadd.f32 1.0, %v1687_v2  ;;  %v708_v30 = vmul.f32 2.1237322e-06, %v5487_v58  ;;  %v389_v15 = vmul.f32 %v5499_v35, %v4029_v39 }
 0x115   : > { %v4167_v17 = vpop.eup %4166  ;;  %v1807_v46 = vadd.f32 1.0, %v3779_v25  ;;  %v1661_v59 = vor.u32 1.1754944e-38, %v1660_v0  ;;  %v1677_v22 = vadd.f32 1.1283791, %v1676_v53  ;;  %v671_v12 = vadd.f32 0.0036580483, %v670_v60 }
 0x116   : > { %v1650_v31 = vmul.f32 %v4167_v17, %v1648_v32  ;;  %vm1655_vm15 = vweird.f32 %v4167_v17  ;;  %4168 = vrcp.f32 %v1688_v6  ;;  %v390_v24 = vmul.f32 %v5499_v35, %v4030_v21 }
 0x117   : > { %v1839_v19 = vmul.f32 %v1807_v46, %v5386_v20  ;;  %v1698_v33 = vand.u32 2147483647, %v1688_v6  ;;  %v672_v10 = vmul.f32 %v671_v12, %v5472_v38  ;;  %v681_v41 = vmul.f32 %v680_v1, %v5472_v38  ;;  %vm5514_vm0 = vmor %vm1654_vm13, %vm1655_vm15 }
 0x118   : > { %v1651_v56 = vsub.f32 1.0, %v1650_v31  ;;  %v1700_v43 = vand.u32 2147483648, %v1688_v6  ;;  %v709_v39 = vadd.f32 0.00028619796, %v708_v30  ;;  %v719_v51 = vmul.f32 3.8918573e-05, %v5487_v58 }
 0x119   : > { %1918 = vst.msk [vmem:[#allocation2 + $0x111] sm:$0xff] %vm1850_vm1, %v1839_v19  ;;  %v5509_v61 = vadd.f32 %v5423_v63, %v389_v15  ;;  %v1678_v9 = vmul.f32 %v1677_v22, %v5357_v55  ;;  %v673_v49 = vadd.f32 0.05243302, %v672_v10  ;;  %v682_v50 = vadd.f32 0.014752088, %v681_v41 }
 0x11a   : > { %v1652_v20 = vmul.f32 %v4167_v17, %v1651_v56  ;;  %vm1694_vm3 = vweird.f32 %v1688_v6  ;;  %v710_v13 = vmul.f32 %v709_v39, %v5487_v58  ;;  %v720_v29 = vadd.f32 0.001143296, %v719_v51 }
 0x11b   : > { %v5520_v23 = vmul.f32 0.70710677, %v5509_v61  ;;  %vm5522_vm4 = vcmp.eq.f32.partialorder %v1698_v33, 8.507059e+37  ;;  %v674_v55 = vmul.f32 %v673_v49, %v5472_v38  ;;  %v683_v32 = vmul.f32 %v682_v50, %v5472_v38  ;;  %v1951_v53 = vld [vmem:[#allocation2 + $0x108] sm:$0xff] }
 0x11c   : > { %v1653_v34 = vadd.f32 %v4167_v17, %v1652_v20  ;;  %v4169_v40 = vpop.eup %4168  ;;  %v1701_v18 = vor.u32 1.1754944e-38, %v1700_v43  ;;  %v711_v21 = vadd.f32 0.0036580483, %v710_v13  ;;  %v721_v4 = vmul.f32 %v720_v29, %v5487_v58 }
 0x11d   : > { %v1066_v0 = vmul.f32 %v5520_v23, %v5520_v23  ;;  %v1690_v25 = vmul.f32 %v4169_v40, %v1688_v6  ;;  %vm1695_vm5 = vweird.f32 %v4169_v40  ;;  %v5534_v2 = vadd.f32 %v5423_v63, %v390_v24 }
 0x11e   : > { %v1657_v26 = vsel %vm5514_vm0, %v4167_v17, %v1653_v34  ;;  %v684_v1 = vadd.f32 0.112945676, %v683_v32  ;;  %v712_v46 = vmul.f32 %v711_v21, %v5487_v58  ;;  %v722_v30 = vadd.f32 0.014752088, %v721_v4  ;;  %vm5553_vm6 = vmor %vm1694_vm3, %vm1695_vm5 }
 0x11f   : > { %v1662_v60 = vsel %vm5491_vm14, %v1661_v59, %v1657_v26  ;;  %v1691_v22 = vsub.f32 1.0, %v1690_v25  ;;  %v675_v12 = vadd.f32 0.18741608, %v674_v55  ;;  %v5539_v19 = vmin.f32 %v1066_v0, 16.0 }
 0x120   : > { %v1952_v15 = vld [vmem:[#allocation2 + $0x110] sm:$0xff]  ;;  %v1663_v31 = vmul.f32 %v1662_v60, %v1638_v7  ;;  %v685_v17 = vmul.f32 %v684_v1, %v5472_v38  ;;  %v713_v33 = vadd.f32 0.05243302, %v712_v46  ;;  %v723_v24 = vmul.f32 %v722_v30, %v5487_v58  ;;  %v4073_v46 = vld [vmem:[%s4310_s13 + $0x58] sm:$0xff]  }
 0x121   : > { %v5541_v56 = vpack.c.bf16 %v1952_v15, %v1951_v53  ;;  %v1692_v47 = vmul.f32 %v4169_v40, %v1691_v22  ;;  %v5546_v59 = vmul.f32 0.70710677, %v5534_v2  ;;  %v1068_v41 = vmul.f32 2.1237322e-06, %v5539_v19 }
 0x122   : > { %v3786_v10 = vclamps-f32 %v1663_v31, 1.0  ;;  %v686_v43 = vadd.f32 0.4994258, %v685_v17  ;;  %v714_v39 = vmul.f32 %v713_v33, %v5487_v58  ;;  %v724_v51 = vadd.f32 0.112945676, %v723_v24 }
 0x123   : > { %3806 = vmatmul.msk.bf16.gmra.mxu2 %vm1850_vm1, %v5541_v56  ;;  %v1079_v20 = vmul.f32 3.8918573e-05, %v5539_v19  ;;  %v1693_v49 = vadd.f32 %v4169_v40, %v1692_v47  ;;  %v676_v11 = vmul.f32 %v675_v12, %v5472_v38  ;;  %v1069_v13 = vadd.f32 0.00028619796, %v1068_v41 }
 0x124   : > { %v1814_v50 = vadd.f32 1.0, %v3786_v10  ;;  %v687_v29 = vmul.f32 %v686_v43, %v5472_v38  ;;  %v715_v34 = vadd.f32 0.18741608, %v714_v39  ;;  %v725_v6 = vmul.f32 %v724_v51, %v5487_v58 }
 0x125   : > { %v1080_v55 = vadd.f32 0.001143296, %v1079_v20  ;;  %v1697_v32 = vsel %vm5553_vm6, %v4169_v40, %v1693_v49  ;;  %v1070_v4 = vmul.f32 %v1069_v13, %v5539_v19  ;;  %v1106_v0 = vmul.f32 %v5546_v59, %v5546_v59 }
 0x126   : > { %v1846_v21 = vmul.f32 %v1814_v50, %v5418_v3  ;;  %v1702_v53 = vsel %vm5522_vm4, %v1701_v18, %v1697_v32  ;;  %v5571_v38 = vmul.f32 0.5, %v5426_v16  ;;  %v688_v26 = vadd.f32 1.0, %v687_v29 }
 0x127   : > { %v726_v25 = vadd.f32 0.4994258, %v725_v6  ;;  %v1703_v60 = vmul.f32 %v1702_v53, %v1678_v9  ;;  %v716_v40 = vmul.f32 %v715_v34, %v5487_v58  ;;  %v1071_v1 = vadd.f32 0.0036580483, %v1070_v4 }
 0x128   : > { %1925 = vst.msk [vmem:[#allocation2 + $0x169] sm:$0xff] %vm1850_vm1, %v1846_v21  ;;  %v1081_v3 = vmul.f32 %v1080_v55, %v5539_v19  ;;  %v5578_v30 = vmul.f32 0.5, %v5435_v42  ;;  %v677_v15 = vadd.f32 1.1283791, %v676_v11  ;;  %4170 = vrcp.f32 %v688_v26 }
 0x129   : > { %v5580_v27 = vmin.f32 %v1106_v0, 16.0  ;;  %v3787_v16 = vclamps-f32 %v1703_v60, 1.0  ;;  %v698_v18 = vand.u32 2147483647, %v688_v26  ;;  %v727_v31 = vmul.f32 %v726_v25, %v5487_v58 }
 0x12a   : > { %v1072_v9 = vmul.f32 %v1071_v1, %v5539_v19  ;;  %v700_v22 = vand.u32 2147483648, %v688_v26  ;;  %v1082_v12 = vadd.f32 0.014752088, %v1081_v3  ;;  %v4045_v33 = vunpack.c.l.bf16 %v4073_v46 }
 0x12b   : > { %v1108_v17 = vmul.f32 2.1237322e-06, %v5580_v27  ;;  %v1815_v24 = vadd.f32 1.0, %v3787_v16  ;;  %v717_v10 = vadd.f32 1.1283791, %v716_v40  ;;  %v5585_v47 = vadd.f32 1.0, %v727_v31 }
 0x12c   : > { %v1073_v42 = vadd.f32 0.05243302, %v1072_v9  ;;  %v678_v41 = vmul.f32 %v677_v15, %v5438_v36  ;;  %v1083_v7 = vmul.f32 %v1082_v12, %v5539_v19  ;;  %v1119_v39 = vmul.f32 3.8918573e-05, %v5580_v27 }
 0x12d   : > { %v1109_v43 = vadd.f32 0.00028619796, %v1108_v17  ;;  %v1847_v58 = vmul.f32 %v1815_v24, %v5432_v62  ;;  %vm694_vm7 = vweird.f32 %v688_v26  ;;  %vm5591_vm8 = vcmp.eq.f32.partialorder %v698_v18, 8.507059e+37 }
 0x12e   : > { %4172 = vrcp.f32 %v5585_v47  ;;  %v4171_v20 = vpop.eup %4170  ;;  %v1074_v49 = vmul.f32 %v1073_v42, %v5539_v19  ;;  %v1084_v50 = vadd.f32 0.112945676, %v1083_v7  ;;  %v4046_v11 = vunpack.c.h.bf16 %v4073_v46 }
 0x12f   : > { %v1110_v36 = vmul.f32 %v1109_v43, %v5580_v27  ;;  %1926 = vst.msk [vmem:[#allocation2 + $0x171] sm:$0xff] %vm1850_vm1, %v1847_v58  ;;  %v690_v13 = vmul.f32 %v4171_v20, %v688_v26  ;;  %v701_v29 = vor.u32 1.1754944e-38, %v700_v22  ;;  %v5600_v62 = vmul.f32 %v717_v10, %v5459_v54  ;;  %v1959_v16 = vld [vmem:[#allocation2 + $0x168] sm:$0xff] }
 0x130   : > { %v1120_v34 = vadd.f32 0.001143296, %v1119_v39  ;;  %vm695_vm9 = vweird.f32 %v4171_v20  ;;  %vm734_vm10 = vweird.f32 %v5585_v47  ;;  %v738_v6 = vand.u32 2147483647, %v5585_v47 }
 0x131   : > { %v1075_v55 = vadd.f32 0.18741608, %v1074_v49  ;;  %v691_v32 = vsub.f32 1.0, %v690_v13  ;;  %v1085_v21 = vmul.f32 %v1084_v50, %v5539_v19  ;;  %v1111_v4 = vadd.f32 0.0036580483, %v1110_v36  ;;  %vm5613_vm11 = vmor %vm694_vm7, %vm695_vm9  ;;  %v5639_v50 = vld [vmem:[%s4310_s13 + $0x78] sm:$0xff]  }
 0x132   : > { %v1121_v0 = vmul.f32 %v1120_v34, %v5580_v27  ;;  %v740_v53 = vand.u32 2147483648, %v5585_v47  ;;  %v397_v54 = vmul.f32 %v5499_v35, %v4045_v33  ;;  %v398_v60 = vmul.f32 %v5499_v35, %v4046_v11 }
 0x133   : > { %v1076_v25 = vmul.f32 %v1075_v55, %v5539_v19  ;;  %v692_v1 = vmul.f32 %v4171_v20, %v691_v32  ;;  %v1086_v3 = vadd.f32 0.4994258, %v1085_v21  ;;  %v1112_v46 = vmul.f32 %v1111_v4, %v5580_v27 }
 0x134   : > { %v4173_v40 = vpop.eup %4172  ;;  %v1122_v15 = vadd.f32 0.014752088, %v1121_v0  ;;  %vm5618_vm13 = vcmp.eq.f32.partialorder %v738_v6, 8.507059e+37  ;;  %v5623_v22 = vadd.f32 %v5423_v63, %v397_v54  ;;  %v5628_v7 = vadd.f32 %v5423_v63, %v398_v60 }
 0x135   : > { %v730_v31 = vmul.f32 %v4173_v40, %v5585_v47  ;;  %vm735_vm12 = vweird.f32 %v4173_v40  ;;  %v693_v12 = vadd.f32 %v4171_v20, %v692_v1  ;;  %v1087_v17 = vmul.f32 %v1086_v3, %v5539_v19 }
 0x136   : > { %v1113_v33 = vadd.f32 0.05243302, %v1112_v46  ;;  %v1123_v26 = vmul.f32 %v1122_v15, %v5580_v27  ;;  %v1960_v24 = vld [vmem:[#allocation2 + $0x170] sm:$0xff]  ;;  %v1077_v42 = vadd.f32 1.1283791, %v1076_v25  ;;  %vm5651_vm14 = vmor %vm734_vm10, %vm735_vm12  ;;  %v741_v55 = vor.u32 1.1754944e-38, %v740_v53 }
 0x137   : > { %v731_v10 = vsub.f32 1.0, %v730_v31  ;;  %v5631_v43 = vmul.f32 0.70710677, %v5623_v22  ;;  %v5633_v39 = vpack.c.bf16 %v1960_v24, %v1959_v16  ;;  %v697_v58 = vsel %vm5613_vm11, %v4171_v20, %v693_v12 }
 0x138   : > { %v1088_v49 = vadd.f32 1.0, %v1087_v17  ;;  %v1114_v19 = vmul.f32 %v1113_v33, %v5580_v27  ;;  %v702_v36 = vsel %vm5591_vm8, %v701_v29, %v697_v58  ;;  %v1124_v13 = vadd.f32 0.112945676, %v1123_v26 }
 0x139   : > { %v732_v11 = vmul.f32 %v4173_v40, %v731_v10  ;;  %v5644_v34 = vmul.f32 0.70710677, %v5628_v7  ;;  %3810 = vmatmul.msk.bf16.gmra.mxu3 %vm1850_vm1, %v5633_v39  ;;  %v703_v6 = vmul.f32 %v702_v36, %v678_v41  ;;  %v5656_v51 = vmul.f32 0.5, %v5509_v61 }
 0x13a   : > { %4174 = vrcp.f32 %v1088_v49  ;;  %v1115_v32 = vadd.f32 0.18741608, %v1114_v19  ;;  %v1125_v21 = vmul.f32 %v1124_v13, %v5580_v27  ;;  %v4061_v4 = vunpack.c.l.bf16 %v5639_v50 }
 0x13b   : > { %v733_v29 = vadd.f32 %v4173_v40, %v732_v11  ;;  %v3762_v0 = vclamps-f32 %v703_v6, 1.0  ;;  %v5661_v41 = vmul.f32 %v1077_v42, %v5520_v23  ;;  %v1386_v47 = vmul.f32 %v5631_v43, %v5631_v43 }
 0x13c   : > { %v1426_v53 = vmul.f32 %v5644_v34, %v5644_v34  ;;  %vm1094_vm15 = vweird.f32 %v1088_v49  ;;  %v1116_v25 = vmul.f32 %v1115_v32, %v5580_v27  ;;  %v1126_v54 = vadd.f32 0.4994258, %v1125_v21 }
 0x13d   : > { %v737_v61 = vsel %vm5651_vm14, %v4173_v40, %v733_v29  ;;  %v1790_v1 = vadd.f32 1.0, %v3762_v0  ;;  %v5672_v3 = vmin.f32 %v1386_v47, 16.0  ;;  %v1098_v15 = vand.u32 2147483647, %v1088_v49 }
 0x13e   : > { %v742_v60 = vsel %vm5618_vm13, %v741_v55, %v737_v61  ;;  %v5674_v23 = vmin.f32 %v1426_v53, 16.0  ;;  %v1100_v16 = vand.u32 2147483648, %v1088_v49  ;;  %v1127_v18 = vmul.f32 %v1126_v54, %v5580_v27 }
 0x13f   : > { %v743_v46 = vmul.f32 %v742_v60, %v5600_v62  ;;  %v1822_v40 = vmul.f32 %v1790_v1, %v5571_v38  ;;  %v1388_v12 = vmul.f32 2.1237322e-06, %v5672_v3  ;;  %v1399_v17 = vmul.f32 3.8918573e-05, %v5672_v3 }
 0x140   : > { %v4175_v31 = vpop.eup %4174  ;;  %v1428_v9 = vmul.f32 2.1237322e-06, %v5674_v23  ;;  %v1117_v24 = vadd.f32 1.1283791, %v1116_v25  ;;  %v4062_v10 = vunpack.c.h.bf16 %v5639_v50  ;;  %v1128_v62 = vadd.f32 1.0, %v1127_v18 }
 0x141   : > { %v3763_v33 = vclamps-f32 %v743_v46, 1.0  ;;  %v1090_v26 = vmul.f32 %v4175_v31, %v1088_v49  ;;  %1901 = vst.msk [vmem:[#allocation2 + $0x49] sm:$0xff] %vm1850_vm1, %v1822_v40  ;;  %vm1095_vm0 = vweird.f32 %v4175_v31  ;;  %v1389_v42 = vadd.f32 0.00028619796, %v1388_v12 }
 0x142   : > { %v1400_v27 = vadd.f32 0.001143296, %v1399_v17  ;;  %v1429_v38 = vadd.f32 0.00028619796, %v1428_v9  ;;  %v1439_v36 = vmul.f32 3.8918573e-05, %v5674_v23  ;;  %4176 = vrcp.f32 %v1128_v62  ;;  %vm5691_vm3 = vmor %vm1094_vm15, %vm1095_vm0 }
 0x143   : > { %v1791_v58 = vadd.f32 1.0, %v3763_v33  ;;  %v1091_v19 = vsub.f32 1.0, %v1090_v26  ;;  %v1138_v11 = vand.u32 2147483647, %v1128_v62  ;;  %v1140_v13 = vand.u32 2147483648, %v1128_v62 }
 0x144   : > { %v405_v6 = vmul.f32 %v5499_v35, %v4061_v4  ;;  %v1390_v50 = vmul.f32 %v1389_v42, %v5672_v3  ;;  %v1401_v29 = vmul.f32 %v1400_v27, %v5672_v3  ;;  %vm5695_vm4 = vcmp.eq.f32.partialorder %v1098_v15, 8.507059e+37 }
 0x145   : > { %v1823_v20 = vmul.f32 %v1791_v58, %v5578_v30  ;;  %v1092_v55 = vmul.f32 %v4175_v31, %v1091_v19  ;;  %v1101_v0 = vor.u32 1.1754944e-38, %v1100_v16  ;;  %v1430_v4 = vmul.f32 %v1429_v38, %v5674_v23 }
 0x146   : > { %v1440_v47 = vadd.f32 0.001143296, %v1439_v36  ;;  %v1118_v53 = vmul.f32 %v1117_v24, %v5546_v59  ;;  %vm1134_vm5 = vweird.f32 %v1128_v62  ;;  %v1391_v61 = vadd.f32 0.0036580483, %v1390_v50 }
 0x147   : > { %1902 = vst.msk [vmem:[#allocation2 + $0x51] sm:$0xff] %vm1850_vm1, %v1823_v20  ;;  %v1093_v30 = vadd.f32 %v4175_v31, %v1092_v55  ;;  %v1402_v49 = vadd.f32 0.014752088, %v1401_v29  ;;  %v1431_v25 = vadd.f32 0.0036580483, %v1430_v4  ;;  %v406_v60 = vmul.f32 %v5499_v35, %v4062_v10 }
 0x148   : > { %v1441_v54 = vmul.f32 %v1440_v47, %v5674_v23  ;;  %vm5706_vm6 = vcmp.eq.f32.partialorder %v1138_v11, 8.507059e+37  ;;  %v1141_v15 = vor.u32 1.1754944e-38, %v1140_v13  ;;  %v1392_v16 = vmul.f32 %v1391_v61, %v5672_v3  ;;  %v4177_v18 = vpop.eup %4176  ;;  %v1935_v24 = vld [vmem:[#allocation2 + $0x48] sm:$0xff] }
 0x149   : > { %v1097_v1 = vsel %vm5691_vm3, %v4175_v31, %v1093_v30  ;;  %v5712_v59 = vadd.f32 %v5423_v63, %v405_v6  ;;  %v1403_v12 = vmul.f32 %v1402_v49, %v5672_v3  ;;  %v1432_v17 = vmul.f32 %v1431_v25, %v5674_v23 }
 0x14a   : > { %v1102_v40 = vsel %vm5695_vm4, %v1101_v0, %v1097_v1  ;;  %v1442_v9 = vadd.f32 0.014752088, %v1441_v54  ;;  %v1130_v33 = vmul.f32 %v4177_v18, %v1128_v62  ;;  %vm1135_vm7 = vweird.f32 %v4177_v18 }
 0x14b   : > { %v1103_v31 = vmul.f32 %v1102_v40, %v5661_v41  ;;  %v1393_v26 = vadd.f32 0.05243302, %v1392_v16  ;;  %v1404_v10 = vadd.f32 0.112945676, %v1403_v12  ;;  %v1433_v42 = vadd.f32 0.05243302, %v1432_v17  ;;  %vm5736_vm8 = vmor %vm1134_vm5, %vm1135_vm7 }
 0x14c   : > { %v1443_v27 = vmul.f32 %v1442_v9, %v5674_v23  ;;  %v5721_v58 = vadd.f32 %v5423_v63, %v406_v60  ;;  %v1131_v38 = vsub.f32 1.0, %v1130_v33  ;;  %v5725_v11 = vmul.f32 0.70710677, %v5712_v59  ;;  %v4065_v12 = vld [vmem:[%s4310_s13 + $0x18] sm:$0xff]  }
 0x14d   : > { %v3772_v19 = vclamps-f32 %v1103_v31, 1.0  ;;  %v1394_v36 = vmul.f32 %v1393_v26, %v5672_v3  ;;  %v1405_v41 = vmul.f32 %v1404_v10, %v5672_v3  ;;  %v1434_v6 = vmul.f32 %v1433_v42, %v5674_v23 }
 0x14e   : > { %v1936_v13 = vld [vmem:[#allocation2 + $0x50] sm:$0xff]  ;;  %v1444_v20 = vadd.f32 0.112945676, %v1443_v27  ;;  %v5730_v55 = vmul.f32 0.70710677, %v5721_v58  ;;  %v1132_v29 = vmul.f32 %v4177_v18, %v1131_v38  ;;  %v1706_v61 = vmul.f32 %v5725_v11, %v5725_v11 }
 0x14f   : > { %v5732_v50 = vpack.c.bf16 %v1936_v13, %v1935_v24  ;;  %v1800_v32 = vadd.f32 1.0, %v3772_v19  ;;  %v1395_v21 = vadd.f32 0.18741608, %v1394_v36  ;;  %v1406_v4 = vadd.f32 0.4994258, %v1405_v41 }
 0x150   : > { %v1435_v47 = vadd.f32 0.18741608, %v1434_v6  ;;  %v1445_v30 = vmul.f32 %v1444_v20, %v5674_v23  ;;  %v1133_v49 = vadd.f32 %v4177_v18, %v1132_v29  ;;  %v1746_v62 = vmul.f32 %v5730_v55, %v5730_v55 }
 0x151   : > { %3798 = vmatmul.msk.bf16.gmra.mxu0 %vm1850_vm1, %v5732_v50  ;;  %v1832_v25 = vmul.f32 %v1800_v32, %v5656_v51  ;;  %v1396_v54 = vmul.f32 %v1395_v21, %v5672_v3  ;;  %v1407_v60 = vmul.f32 %v1406_v4, %v5672_v3  ;;  %v5751_v40 = vmin.f32 %v1706_v61, 16.0 }
 0x152   : > { %v1436_v1 = vmul.f32 %v1435_v47, %v5674_v23  ;;  %v1446_v16 = vadd.f32 0.4994258, %v1445_v30  ;;  %v1137_v17 = vsel %vm5736_vm8, %v4177_v18, %v1133_v49  ;;  %v457_v51 = vmul.f32 0.5, %v5534_v2 }
 0x153   : > { %1911 = vst.msk [vmem:[#allocation2 + $0xc1] sm:$0xff] %vm1850_vm1, %v1832_v25  ;;  %v1142_v9 = vsel %vm5706_vm6, %v1141_v15, %v1137_v17  ;;  %v1408_v31 = vadd.f32 1.0, %v1407_v60  ;;  %v1708_v26 = vmul.f32 2.1237322e-06, %v5751_v40  ;;  %v1719_v24 = vmul.f32 3.8918573e-05, %v5751_v40 }
 0x154   : > { %v1447_v33 = vmul.f32 %v1446_v16, %v5674_v23  ;;  %v1143_v3 = vmul.f32 %v1142_v9, %v1118_v53  ;;  %v4013_v10 = vunpack.c.l.bf16 %v4065_v12  ;;  %v1397_v42 = vadd.f32 1.1283791, %v1396_v54 }
 0x155   : > { %4178 = vrcp.f32 %v1408_v31  ;;  %v1437_v27 = vadd.f32 1.1283791, %v1436_v1  ;;  %v5763_v18 = vmin.f32 %v1746_v62, 16.0  ;;  %v1418_v38 = vand.u32 2147483647, %v1408_v31 }
 0x156   : > { %v3773_v19 = vclamps-f32 %v1143_v3, 1.0  ;;  %v5765_v2 = vadd.f32 1.0, %v1447_v33  ;;  %v1709_v46 = vadd.f32 0.00028619796, %v1708_v26  ;;  %v1420_v15 = vand.u32 2147483648, %v1408_v31 }
 0x157   : > { %v1720_v36 = vadd.f32 0.001143296, %v1719_v24  ;;  %v1748_v23 = vmul.f32 2.1237322e-06, %v5763_v18  ;;  %v4014_v13 = vunpack.c.h.bf16 %v4065_v12  ;;  %v1398_v41 = vmul.f32 %v1397_v42, %v5631_v43 }
 0x158   : > { %v1801_v53 = vadd.f32 1.0, %v3773_v19  ;;  %4180 = vrcp.f32 %v5765_v2  ;;  %v1710_v6 = vmul.f32 %v1709_v46, %v5751_v40  ;;  %vm1414_vm9 = vweird.f32 %v1408_v31 }
 0x159   : > { %v1721_v20 = vmul.f32 %v1720_v36, %v5751_v40  ;;  %v1749_v29 = vadd.f32 0.00028619796, %v1748_v23  ;;  %v1759_v21 = vmul.f32 3.8918573e-05, %v5763_v18  ;;  %v381_v0 = vmul.f32 %v5499_v35, %v4013_v10 }
 0x15a   : > { %v1833_v32 = vmul.f32 %v1801_v53, %v457_v51  ;;  %vm5774_vm10 = vcmp.eq.f32.partialorder %v1418_v38, 8.507059e+37  ;;  %v1421_v30 = vor.u32 1.1754944e-38, %v1420_v15  ;;  %v1438_v61 = vmul.f32 %v1437_v27, %v5644_v34  ;;  %v1945_v19 = vld [vmem:[#allocation2 + $0xc0] sm:$0xff] }
 0x15b   : > { %v4179_v4 = vpop.eup %4178  ;;  %v1711_v43 = vadd.f32 0.0036580483, %v1710_v6  ;;  %vm1454_vm11 = vweird.f32 %v5765_v2  ;;  %v1722_v25 = vadd.f32 0.014752088, %v1721_v20  ;;  %v1750_v54 = vmul.f32 %v1749_v29, %v5763_v18 }
 0x15c   : > { %1912 = vst.msk [vmem:[#allocation2 + $0xc9] sm:$0xff] %vm1850_vm1, %v1833_v32  ;;  %v1410_v49 = vmul.f32 %v4179_v4, %v1408_v31  ;;  %vm1415_vm12 = vweird.f32 %v4179_v4  ;;  %v1760_v60 = vadd.f32 0.001143296, %v1759_v21  ;;  %v5784_v1 = vadd.f32 %v5423_v63, %v381_v0 }
 0x15d   : > { %v1712_v62 = vmul.f32 %v1711_v43, %v5751_v40  ;;  %v1723_v34 = vmul.f32 %v1722_v25, %v5751_v40  ;;  %v1751_v17 = vadd.f32 0.0036580483, %v1750_v54  ;;  %v382_v51 = vmul.f32 %v5499_v35, %v4014_v13  ;;  %vm5795_vm13 = vmor %vm1414_vm9, %vm1415_vm12 }
 0x15e   : > { %v4181_v16 = vpop.eup %4180  ;;  %v1411_v12 = vsub.f32 1.0, %v1410_v49  ;;  %v1458_v33 = vand.u32 2147483647, %v5765_v2  ;;  %v1761_v26 = vmul.f32 %v1760_v60, %v5763_v18  ;;  %v1460_v10 = vand.u32 2147483648, %v5765_v2 }
 0x15f   : > { %v1450_v9 = vmul.f32 %v4181_v16, %v5765_v2  ;;  %v1713_v3 = vadd.f32 0.05243302, %v1712_v62  ;;  %v1724_v42 = vadd.f32 0.112945676, %v1723_v34  ;;  %v1752_v27 = vmul.f32 %v1751_v17, %v5763_v18 }
 0x160   : > { %v1412_v24 = vmul.f32 %v4179_v4, %v1411_v12  ;;  %vm1455_vm14 = vweird.f32 %v4181_v16  ;;  %v1762_v46 = vadd.f32 0.014752088, %v1761_v26  ;;  %v5800_v15 = vmul.f32 0.70710677, %v5784_v1 }
 0x161   : > { %v1451_v35 = vsub.f32 1.0, %v1450_v9  ;;  %v1714_v23 = vmul.f32 %v1713_v3, %v5751_v40  ;;  %v1725_v53 = vmul.f32 %v1724_v42, %v5751_v40  ;;  %v5805_v13 = vadd.f32 %v5423_v63, %v382_v51  ;;  %vm5816_vm15 = vmor %vm1454_vm11, %vm1455_vm14 }
 0x162   : > { %v1413_v36 = vadd.f32 %v4179_v4, %v1412_v24  ;;  %v1753_v20 = vadd.f32 0.05243302, %v1752_v27  ;;  %v1763_v29 = vmul.f32 %v1762_v46, %v5763_v18  ;;  %v746_v32 = vmul.f32 %v5800_v15, %v5800_v15 }
 0x163   : > { %v1946_v6 = vld [vmem:[#allocation2 + $0xc8] sm:$0xff]  ;;  %v1452_v31 = vmul.f32 %v4181_v16, %v1451_v35  ;;  %v1461_v63 = vor.u32 1.1754944e-38, %v1460_v10  ;;  %v1726_v49 = vadd.f32 0.4994258, %v1725_v53  ;;  %vm1459_vm0 = vcmp.eq.f32.partialorder %v1458_v33, 8.507059e+37 }
 0x164   : > { %v5810_v21 = vpack.c.bf16 %v1946_v6, %v1945_v19  ;;  %v1417_v0 = vsel %vm5795_vm13, %v4179_v4, %v1413_v36  ;;  %v1764_v62 = vadd.f32 0.112945676, %v1763_v29  ;;  %v1715_v12 = vadd.f32 0.18741608, %v1714_v23 }
 0x165   : > { %v1422_v25 = vsel %vm5774_vm10, %v1421_v30, %v1417_v0  ;;  %v1453_v54 = vadd.f32 %v4181_v16, %v1452_v31  ;;  %v1727_v4 = vmul.f32 %v1726_v49, %v5751_v40  ;;  %v5826_v2 = vmul.f32 0.70710677, %v5805_v13 }
 0x166   : > { %3803 = vmatmul.msk.bf16.gmra.mxu1 %vm1850_vm1, %v5810_v21  ;;  %v1423_v60 = vmul.f32 %v1422_v25, %v1398_v41  ;;  %v1754_v17 = vmul.f32 %v1753_v20, %v5763_v18  ;;  %v1765_v47 = vmul.f32 %v1764_v62, %v5763_v18  ;;  %v5832_v30 = vmin.f32 %v746_v32, 16.0 }
 0x167   : > { %v1457_v34 = vsel %vm5816_vm15, %v4181_v16, %v1453_v54  ;;  %v464_v51 = vmul.f32 0.5, %v5623_v22  ;;  %v1728_v41 = vadd.f32 1.0, %v1727_v4  ;;  %v1716_v42 = vmul.f32 %v1715_v12, %v5751_v40 }
 0x168   : > { %v3780_v9 = vclamps-f32 %v1423_v60, 1.0  ;;  %v1462_v33 = vsel %vm1459_vm0, %v1461_v63, %v1457_v34  ;;  %v1766_v26 = vadd.f32 0.4994258, %v1765_v47  ;;  %v748_v24 = vmul.f32 2.1237322e-06, %v5832_v30 }
 0x169   : > { %v1463_v3 = vmul.f32 %v1462_v33, %v1438_v61  ;;  %4182 = vrcp.f32 %v1728_v41  ;;  %v786_v16 = vmul.f32 %v5826_v2, %v5826_v2  ;;  %v465_v27 = vmul.f32 0.5, %v5628_v7 }
 0x16a   : > { %v1808_v10 = vadd.f32 1.0, %v3780_v9  ;;  %v1755_v38 = vadd.f32 0.18741608, %v1754_v17  ;;  %v1767_v22 = vmul.f32 %v1766_v26, %v5763_v18  ;;  %v749_v46 = vadd.f32 0.00028619796, %v748_v24 }
 0x16b   : > { %v3781_v19 = vclamps-f32 %v1463_v3, 1.0  ;;  %v759_v61 = vmul.f32 3.8918573e-05, %v5832_v30  ;;  %v1717_v53 = vadd.f32 1.1283791, %v1716_v42  ;;  %v5844_v31 = vmin.f32 %v786_v16, 16.0 }
 0x16c   : > { %v1840_v35 = vmul.f32 %v1808_v10, %v464_v51  ;;  %v1768_v23 = vadd.f32 1.0, %v1767_v22  ;;  %v750_v40 = vmul.f32 %v749_v46, %v5832_v30  ;;  %v1756_v7 = vmul.f32 %v1755_v38, %v5763_v18 }
 0x16d   : > { %v1809_v36 = vadd.f32 1.0, %v3781_v19  ;;  %v760_v6 = vadd.f32 0.001143296, %v759_v61  ;;  %v1738_v32 = vand.u32 2147483647, %v1728_v41  ;;  %v1740_v25 = vand.u32 2147483648, %v1728_v41 }
 0x16e   : > { %1919 = vst.msk [vmem:[#allocation2 + $0x121] sm:$0xff] %vm1850_vm1, %v1840_v35  ;;  %4184 = vrcp.f32 %v1768_v23  ;;  %v751_v0 = vadd.f32 0.0036580483, %v750_v40  ;;  %v788_v63 = vmul.f32 2.1237322e-06, %v5844_v31  ;;  %v1718_v54 = vmul.f32 %v1717_v53, %v5725_v11 }
 0x16f   : > { %v1841_v20 = vmul.f32 %v1809_v36, %v465_v27  ;;  %v4183_v29 = vpop.eup %4182  ;;  %v761_v43 = vmul.f32 %v760_v6, %v5832_v30  ;;  %vm1734_vm3 = vweird.f32 %v1728_v41  ;;  %v799_v18 = vmul.f32 3.8918573e-05, %v5844_v31 }
 0x170   : > { %v1730_v49 = vmul.f32 %v4183_v29, %v1728_v41  ;;  %vm1735_vm4 = vweird.f32 %v4183_v29  ;;  %v789_v12 = vadd.f32 0.00028619796, %v788_v63  ;;  %vm5852_vm5 = vcmp.eq.f32.partialorder %v1738_v32, 8.507059e+37 }
 0x171   : > { %1920 = vst.msk [vmem:[#allocation2 + $0x129] sm:$0xff] %vm1850_vm1, %v1841_v20  ;;  %v762_v62 = vadd.f32 0.014752088, %v761_v43  ;;  %v1757_v34 = vadd.f32 1.1283791, %v1756_v7  ;;  %v752_v17 = vmul.f32 %v751_v0, %v5832_v30  ;;  %v1741_v33 = vor.u32 1.1754944e-38, %v1740_v25  ;;  %vm5860_vm6 = vmor %vm1734_vm3, %vm1735_vm4 }
 0x172   : > { %v1731_v60 = vsub.f32 1.0, %v1730_v49  ;;  %v790_v11 = vmul.f32 %v789_v12, %v5844_v31  ;;  %v800_v3 = vadd.f32 0.001143296, %v799_v18  ;;  %vm1774_vm7 = vweird.f32 %v1768_v23 }
 0x173   : > { %v763_v47 = vmul.f32 %v762_v62, %v5832_v30  ;;  %v1778_v42 = vand.u32 2147483647, %v1768_v23  ;;  %v1780_v19 = vand.u32 2147483648, %v1768_v23  ;;  %v753_v61 = vadd.f32 0.05243302, %v752_v17 }
 0x174   : > { %v4185_v51 = vpop.eup %4184  ;;  %v1732_v9 = vmul.f32 %v4183_v29, %v1731_v60  ;;  %v791_v38 = vadd.f32 0.0036580483, %v790_v11  ;;  %v801_v22 = vmul.f32 %v800_v3, %v5844_v31  ;;  %v1758_v43 = vmul.f32 %v1757_v34, %v5730_v55 }
 0x175   : > { %v1953_v26 = vld [vmem:[#allocation2 + $0x120] sm:$0xff]  ;;  %v1770_v10 = vmul.f32 %v4185_v51, %v1768_v23  ;;  %v764_v16 = vadd.f32 0.112945676, %v763_v47  ;;  %vm1775_vm8 = vweird.f32 %v4185_v51  ;;  %v1781_v63 = vor.u32 1.1754944e-38, %v1780_v19 }
 0x176   : > { %v1733_v27 = vadd.f32 %v4183_v29, %v1732_v9  ;;  %v802_v40 = vadd.f32 0.014752088, %v801_v22  ;;  %v792_v32 = vmul.f32 %v791_v38, %v5844_v31  ;;  %vm1776_vm9 = vmor %vm1774_vm7, %vm1775_vm8  ;;  %vm1779_vm10 = vcmp.eq.f32.partialorder %v1778_v42, 8.507059e+37 }
 0x177   : > { %v1771_v46 = vsub.f32 1.0, %v1770_v10  ;;  %v765_v36 = vmul.f32 %v764_v16, %v5832_v30  ;;  %v754_v25 = vmul.f32 %v753_v61, %v5832_v30  ;;  %v472_v60 = vmul.f32 0.5, %v5712_v59 }
 0x178   : > { %v1954_v35 = vld [vmem:[#allocation2 + $0x128] sm:$0xff]  ;;  %v1737_v53 = vsel %vm5860_vm6, %v4183_v29, %v1733_v27  ;;  %v803_v49 = vmul.f32 %v802_v40, %v5844_v31  ;;  %v473_v3 = vmul.f32 0.5, %v5721_v58  ;;  %vm1853_vm13 = vcmask 123904  }
 0x179   : > { %v5866_v41 = vpack.c.bf16 %v1954_v35, %v1953_v26  ;;  %v1742_v6 = vsel %vm5852_vm5, %v1741_v33, %v1737_v53  ;;  %v1772_v20 = vmul.f32 %v4185_v51, %v1771_v46  ;;  %v766_v7 = vadd.f32 0.4994258, %v765_v36  ;;  %v1929_v36 = vld [vmem:[#allocation2] sm:$0xff]  ;;  %v1930_v53 = vld [vmem:[#allocation2 + $0x8] sm:$0xff]  ;;  %1854 = vst.msk [vmem:[#allocation2 + $0x10] sm:$0x3] %vm1853_vm13, %v4236_v45 }
 0x17a   : > { %v1743_v0 = vmul.f32 %v1742_v6, %v1718_v54  ;;  %v804_v18 = vadd.f32 0.112945676, %v803_v49  ;;  %v793_v54 = vadd.f32 0.05243302, %v792_v32  ;;  %v755_v9 = vadd.f32 0.18741608, %v754_v25 }
 0x17b   : > { %3807 = vmatmul.msk.bf16.gmra.mxu2 %vm1850_vm1, %v5866_v41  ;;  %v1773_v29 = vadd.f32 %v4185_v51, %v1772_v20  ;;  %v767_v62 = vmul.f32 %v766_v7, %v5832_v30  ;;  %v1965_v40 = vpack.c.bf16 %v1930_v53, %v1929_v36  ;;  %v3996_v6 = vld [vmem:[%s6521_s3 + $0x10] sm:$0xff]  ;;  %1878 = vst.msk [vmem:[#allocation2 + $0x11] sm:$0x1] %vm1859_vm2, %v4236_v45  ;;  %vm3426_vm5 = vcmask 257024  }
 0x17c   : > { %v3788_v12 = vclamps-f32 %v1743_v0, 1.0  ;;  %v805_v23 = vmul.f32 %v804_v18, %v5844_v31  ;;  %v794_v24 = vmul.f32 %v793_v54, %v5844_v31  ;;  %v756_v10 = vmul.f32 %v755_v9, %v5832_v30  ;;  %1858 = vst.msk [vmem:[#allocation2 + $0x1a8] sm:$0x3] %vm1853_vm13, %v4236_v45  ;;  %2976 = vmatpush.bf16.msra.mxu2 %v3996_v6  ;;  %v2369_v36 = vld [vmem:[#allocation2 + $0x51] sm:$0xff] }
 0x17d   : > { %v1777_v4 = vsel %vm1776_vm9, %v4185_v51, %v1773_v29  ;;  %v768_v17 = vadd.f32 1.0, %v767_v62  ;;  %3816 = vmatmul.msk.bf16.vlgmr.msrb.gmra.mxu1 %vm1850_vm1, %v1965_v40  ;;  %1895 = vst.msk [vmem:[#allocation2 + $0x1a9] sm:$0x1] %vm1859_vm2, %v4236_v45  ;;  %v448_v54 = vmul.f32 0.5, %v5784_v1  ;;  %v3997_v1 = vld [vmem:[%s6521_s3 + $0x28] sm:$0xff]  ;;  %v5960_v40 = vpop.f32.mrf.mxu3  ;;  %vm3460_vm6 = vcmask 261120  }
 0x17e   : > { %v1782_v47 = vsel %vm1779_vm10, %v1781_v63, %v1777_v4  ;;  %v1816_v55 = vadd.f32 1.0, %v3788_v12  ;;  %v806_v11 = vadd.f32 0.4994258, %v805_v23  ;;  %v795_v19 = vadd.f32 0.18741608, %v794_v24  ;;  %3110 = vmatpush.bf16.msra.mxu3 %v3997_v1  ;;  %v2377_v1 = vld [vmem:[#allocation2 + $0xb1] sm:$0xff] }
 0x17f   : > { %v1783_v34 = vmul.f32 %v1782_v47, %v1758_v43  ;;  %4186 = vrcp.f32 %v768_v17  ;;  %v757_v22 = vadd.f32 1.1283791, %v756_v10  ;;  %v780_v58 = vand.u32 2147483648, %v768_v17 }
 0x180   : > { %v1848_v33 = vmul.f32 %v1816_v55, %v472_v60  ;;  %v807_v59 = vmul.f32 %v806_v11, %v5844_v31  ;;  %vm774_vm11 = vweird.f32 %v768_v17  ;;  %v778_v46 = vand.u32 2147483647, %v768_v17  ;;  %v2363_v10 = vld [vmem:[#allocation2 + $0x9] sm:$0xff] }
 0x181   : > { %v3789_v26 = vclamps-f32 %v1783_v34, 1.0  ;;  %v796_v61 = vmul.f32 %v795_v19, %v5844_v31  ;;  %v781_v7 = vor.u32 1.1754944e-38, %v780_v58  ;;  %v758_v0 = vmul.f32 %v757_v22, %v5800_v15  ;;  %v2364_v22 = vld [vmem:[#allocation2 + $0x19] sm:$0xff]  ;;  %v2365_v58 = vld [vmem:[#allocation2 + $0x21] sm:$0xff] }
 0x182   : > { %1927 = vst.msk [vmem:[#allocation2 + $0x181] sm:$0xff] %vm1850_vm1, %v1848_v33  ;;  %v808_v42 = vadd.f32 1.0, %v807_v59  ;;  %vm779_vm15 = vcmp.eq.f32.partialorder %v778_v46, 8.507059e+37  ;;  %v3998_v59 = vld [vmem:[%s6521_s3 + $0x40] sm:$0xff] }
 0x183   : > { %v1817_v51 = vadd.f32 1.0, %v3789_v26  ;;  %v797_v63 = vadd.f32 1.1283791, %v796_v61  ;;  %v449_v26 = vmul.f32 0.5, %v5805_v13  ;;  %3244 = vmatpush.bf16.msra.mxu0 %v3998_v59  ;;  %v2367_v46 = vld [vmem:[#allocation2 + $0x39] sm:$0xff] }
 0x184   : > { %4188 = vrcp.f32 %v808_v42  ;;  %vm814_vm0 = vweird.f32 %v808_v42  ;;  %v818_v62 = vand.u32 2147483647, %v808_v42  ;;  %v820_v60 = vand.u32 2147483648, %v808_v42 }
 0x185   : > { %v4187_v16 = vpop.eup %4186  ;;  %v1849_v27 = vmul.f32 %v1817_v51, %v473_v3  ;;  %v798_v55 = vmul.f32 %v797_v63, %v5826_v2  ;;  %v3995_v2 = vld [vmem:[%s6521_s3 + $0x38] sm:$0xff]  ;;  %v2362_v51 = vld [vmem:[#allocation2 + $0x1] sm:$0xff] }
 0x186   : > { %v770_v38 = vmul.f32 %v4187_v16, %v768_v17  ;;  %vm775_vm12 = vweird.f32 %v4187_v16  ;;  %v821_v47 = vor.u32 1.1754944e-38, %v820_v60  ;;  %vm819_vm4 = vcmp.eq.f32.partialorder %v818_v62, 8.507059e+37  ;;  %2746 = vmatpush.bf16.msra.mxu1 %v3995_v2 }
 0x187   : > { %1928 = vst.msk [vmem:[#allocation2 + $0x189] sm:$0xff] %vm1850_vm1, %v1849_v27  ;;  %vm5895_vm14 = vmor %vm774_vm11, %vm775_vm12 }
 0x188   : > { %v771_v35 = vsub.f32 1.0, %v770_v38 }
 0x189   : > { %v1961_v32 = vld [vmem:[#allocation2 + $0x180] sm:$0xff] }
 0x18a   : > { %v772_v30 = vmul.f32 %v4187_v16, %v771_v35  ;;  %v4189_v31 = vpop.eup %4188  ;;  %v2399_v35 = vpack.c.bf16 %v2365_v58, %v2364_v22  ;;  %v2379_v22 = vld [vmem:[#allocation2 + $0xc9] sm:$0xff] }
 0x18b   : > { %3838 = vmatmul.msk.bf16.vlgmr.msrb.gmra.mxu2 %vm1850_vm1, %v5359_v57  ;;  %v810_v49 = vmul.f32 %v4189_v31, %v808_v42  ;;  %vm815_vm3 = vweird.f32 %v4189_v31 }
 0x18c   : > { %v773_v43 = vadd.f32 %v4187_v16, %v772_v30  ;;  %vm816_vm2 = vmor %vm814_vm0, %vm815_vm3  ;;  %v5952_v30 = vpop.f32.mrf.mxu1 }
 0x18d   : > { %v811_v18 = vsub.f32 1.0, %v810_v49  ;;  %3817 = vmatmul.msk.bf16.gmra.mxu1 %vm1850_vm1, %v4981_v52  ;;  %v2366_v52 = vld [vmem:[#allocation2 + $0x31] sm:$0xff]  ;;  %v2050_v49 = vpop.f32.mrf.mxu0 }
 0x18e   : > { %v1962_v29 = vld [vmem:[#allocation2 + $0x188] sm:$0xff]  ;;  %v777_v25 = vsel %vm5895_vm14, %v4187_v16, %v773_v43  ;;  %v2398_v16 = vpack.c.bf16 %v2363_v10, %v2362_v51  ;;  %v5941_v61 = vpack.c.bf16 %v2367_v46, %v2366_v52 }
 0x18f   : > { %v5908_v15 = vpack.c.bf16 %v1962_v29, %v1961_v32  ;;  %v782_v12 = vsel %vm779_vm15, %v781_v7, %v777_v25  ;;  %v812_v17 = vmul.f32 %v4189_v31, %v811_v18  ;;  %v2373_v25 = vld [vmem:[#allocation2 + $0x81] sm:$0xff] }
 0x190   : > { %v783_v4 = vmul.f32 %v782_v12, %v758_v0  ;;  %v5974_v0 = vpop.f32.mrf.mxu3 }
 0x191   : > { %3811 = vmatmul.msk.bf16.gmra.mxu3 %vm1850_vm1, %v5908_v15  ;;  %v813_v23 = vadd.f32 %v4189_v31, %v812_v17 }
 0x192   : > { %v3764_v45 = vclamps-f32 %v783_v4, 1.0 }
 0x193   : > { %v817_v9 = vsel %vm816_vm2, %v4189_v31, %v813_v23 }
 0x194   : > { %v1792_v34 = vadd.f32 1.0, %v3764_v45  ;;  %v822_v33 = vsel %vm819_vm4, %v821_v47, %v817_v9  ;;  %v5962_v6 = vpop.f32.mrf.mxu1  ;;  %v2375_v47 = vld [vmem:[#allocation2 + $0x99] sm:$0xff] }
 0x195   : > { %v823_v3 = vmul.f32 %v822_v33, %v798_v55  ;;  %v2052_v4 = vpop.f32.mrf.mxu0 }
 0x196   : > { %v1824_v11 = vmul.f32 %v1792_v34, %v448_v54 }
 0x197   : > { %v3765_v24 = vclamps-f32 %v823_v3, 1.0 }
 0x198   : > { %1903 = vst.msk [vmem:[#allocation2 + $0x61] sm:$0xff] %vm1850_vm1, %v1824_v11  ;;  %v5986_v62 = vpop.f32.mrf.mxu3 }
 0x199   : > { %v1793_v42 = vadd.f32 1.0, %v3765_v24  ;;  %v2376_v24 = vld [vmem:[#allocation2 + $0xa9] sm:$0xff] }
 0x19a   : > { %v6032_v2 = vpack.c.bf16 %v2377_v1, %v2376_v24 }
 0x19b   : > { %3839 = vmatmul.msk.bf16.gmra.mxu2 %vm1850_vm1, %v5732_v50  ;;  %v1825_v13 = vmul.f32 %v1793_v42, %v449_v26 }
 0x19c   : > { %v5976_v43 = vpop.f32.mrf.mxu1 }
 0x19d   : > { %1904 = vst.msk [vmem:[#allocation2 + $0x69] sm:$0xff] %vm1850_vm1, %v1825_v13  ;;  %3818 = vmatmul.msk.bf16.gmra.mxu1 %vm1850_vm1, %v5359_v57  ;;  %v2368_v57 = vld [vmem:[#allocation2 + $0x49] sm:$0xff]  ;;  %v2055_v55 = vpop.f32.mrf.mxu0 }
 0x19e   : > { %v5950_v53 = vpack.c.bf16 %v2369_v36, %v2368_v57 }
 0x19f   : > { %v1937_v27 = vld [vmem:[#allocation2 + $0x60] sm:$0xff] }
 0x1a0   : > { %v2370_v20 = vld [vmem:[#allocation2 + $0x61] sm:$0xff]  ;;  %v5998_v17 = vpop.f32.mrf.mxu3 }
 0x1a1   : > { %3860 = vmatmul.msk.bf16.vlgmr.msrb.gmra.mxu3 %vm1850_vm1, %v2398_v16 }
 0x1a4   : > { %v1938_v19 = vld [vmem:[#allocation2 + $0x68] sm:$0xff]  ;;  %v5982_v29 = vpop.f32.mrf.mxu1 }
 0x1a5   : > { %v1969_v38 = vpack.c.bf16 %v1938_v19, %v1937_v27  ;;  %v2371_v7 = vld [vmem:[#allocation2 + $0x69] sm:$0xff]  ;;  %v2057_v11 = vpop.f32.mrf.mxu0 }
 0x1a6   : > { %v5968_v31 = vpack.c.bf16 %v2371_v7, %v2370_v20 }
 0x1a7   : > { %3799 = vmatmul.msk.bf16.gmra.mxu0 %vm1850_vm1, %v1969_v38 }
 0x1ab   : > { %3840 = vmatmul.msk.bf16.gmra.mxu2 %vm1850_vm1, %v1969_v38 }
 0x1ac   : > { %v5996_v18 = vpop.f32.mrf.mxu1 }
 0x1ad   : > { %3819 = vmatmul.msk.bf16.gmra.mxu1 %vm1850_vm1, %v5732_v50  ;;  %v5958_v50 = vpop.f32.mrf.mxu2 }
 0x1b1   : > { %3861 = vmatmul.msk.bf16.gmra.mxu3 %vm1850_vm1, %v2399_v35 }
 0x1b4   : > { %v6004_v45 = vpop.f32.mrf.mxu1 }
 0x1b5   : > { %v5972_v32 = vpop.f32.mrf.mxu2 }
 0x1b7   : > { %3882 = vmatmul.msk.bf16.vlgmr.msrb.gmra.mxu0 %vm1850_vm1, %v2399_v35 }
 0x1bb   : > { %3841 = vmatmul.msk.bf16.gmra.mxu2 %vm1850_vm1, %v4672_v44 }
 0x1bc   : > { %v6012_v34 = vpop.f32.mrf.mxu3 }
 0x1bd   : > { %3820 = vmatmul.msk.bf16.gmra.mxu1 %vm1850_vm1, %v1969_v38  ;;  %v5980_v63 = vpop.f32.mrf.mxu2  ;;  %v2378_v38 = vld [vmem:[#allocation2 + $0xc1] sm:$0xff] }
 0x1be   : > { %v6048_v35 = vpack.c.bf16 %v2379_v22, %v2378_v38 }
 0x1c1   : > { %3862 = vmatmul.msk.bf16.gmra.mxu3 %vm1850_vm1, %v5941_v61 }
 0x1c4   : > { %v6024_v26 = vpop.f32.mrf.mxu3 }
 0x1c5   : > { %v5994_v12 = vpop.f32.mrf.mxu2 }
 0x1c7   : > { %3883 = vmatmul.msk.bf16.gmra.mxu0 %vm1850_vm1, %v5941_v61 }
 0x1cb   : > { %3842 = vmatmul.msk.bf16.gmra.mxu2 %vm1850_vm1, %v5083_v28 }
 0x1cd   : > { %3821 = vmatmul.msk.bf16.gmra.mxu1 %vm1850_vm1, %v4672_v44  ;;  %v2372_v44 = vld [vmem:[#allocation2 + $0x79] sm:$0xff]  ;;  %v6002_v54 = vpop.f32.mrf.mxu2 }
 0x1ce   : > { %v5990_v60 = vpack.c.bf16 %v2373_v25, %v2372_v44  ;;  %v2060_v51 = vpop.f32.mrf.mxu0 }
 0x1d1   : > { %3863 = vmatmul.msk.bf16.gmra.mxu3 %vm1850_vm1, %v5950_v53 }
 0x1d5   : > { %v6016_v9 = vpop.f32.mrf.mxu2 }
 0x1d7   : > { %3884 = vmatmul.msk.bf16.gmra.mxu0 %vm1850_vm1, %v5950_v53 }
 0x1db   : > { %3843 = vmatmul.msk.bf16.gmra.mxu2 %vm1850_vm1, %v5448_v5 }
 0x1dd   : > { %3822 = vmatmul.msk.bf16.gmra.mxu1 %vm1850_vm1, %v5083_v28  ;;  %v2374_v28 = vld [vmem:[#allocation2 + $0x91] sm:$0xff] }
 0x1de   : > { %v6010_v23 = vpack.c.bf16 %v2375_v47, %v2374_v28 }
 0x1e1   : > { %3864 = vmatmul.msk.bf16.gmra.mxu3 %vm1850_vm1, %v5968_v31 }
 0x1e3   : > { %v6018_v33 = vpop.f32.mrf.mxu1 }
 0x1e7   : > { %3885 = vmatmul.msk.bf16.gmra.mxu0 %vm1850_vm1, %v5968_v31 }
 0x1eb   : > { %3844 = vmatmul.msk.bf16.gmra.mxu2 %vm1850_vm1, %v5810_v21 }
 0x1ed   : > { %3823 = vmatmul.msk.bf16.gmra.mxu1 %vm1850_vm1, %v5448_v5  ;;  %v6026_v5 = vpop.f32.mrf.mxu1 }
 0x1f1   : > { %3865 = vmatmul.msk.bf16.gmra.mxu3 %vm1850_vm1, %v5990_v60 }
 0x1f7   : > { %3886 = vmatmul.msk.bf16.gmra.mxu0 %vm1850_vm1, %v5990_v60 }
 0x1fa   : > { %v2148_v10 = vpop.f32.mrf.mxu1 }
 0x1fb   : > { %3845 = vmatmul.msk.bf16.gmra.mxu2 %vm1850_vm1, %v4756_v48  ;;  %v2149_v42 = vadd.f32 %v2148_v10, %v2050_v49 }
 0x1fd   : > { %3824 = vmatmul.msk.bf16.gmra.mxu1 %vm1850_vm1, %v5810_v21  ;;  %v2062_v21 = vpop.f32.mrf.mxu0 }
 0x1fe   : > { %v6022_v3 = vpop.f32.mrf.mxu2 }
 0x201   : > { %3866 = vmatmul.msk.bf16.gmra.mxu3 %vm1850_vm1, %v6010_v23 }
 0x202   : > { %v2150_v19 = vpop.f32.mrf.mxu1 }
 0x203   : > { %v2151_v52 = vadd.f32 %v2150_v19, %v2052_v4  ;;  %v2381_v4 = vld [vmem:[#allocation2 + $0xe1] sm:$0xff] }
 0x206   : > { %v6036_v59 = vpop.f32.mrf.mxu2 }
 0x207   : > { %3887 = vmatmul.msk.bf16.gmra.mxu0 %vm1850_vm1, %v6010_v23 }
 0x20a   : > { %v2153_v36 = vpop.f32.mrf.mxu1 }
 0x20b   : > { %3846 = vmatmul.msk.bf16.gmra.mxu2 %vm1850_vm1, %v5176_v14  ;;  %v2154_v20 = vadd.f32 %v2153_v36, %v2055_v55 }
 0x20d   : > { %3825 = vmatmul.msk.bf16.gmra.mxu1 %vm1850_vm1, %v4756_v48  ;;  %v2380_v48 = vld [vmem:[#allocation2 + $0xd9] sm:$0xff] }
 0x20e   : > { %v2250_v16 = vpop.f32.mrf.mxu2  ;;  %v6058_v10 = vpack.c.bf16 %v2381_v4, %v2380_v48 }
 0x20f   : > { %v2330_v27 = vadd.f32 %v2250_v16, %v2149_v42 }
 0x211   : > { %3867 = vmatmul.msk.bf16.gmra.mxu3 %vm1850_vm1, %v6032_v2 }
 0x212   : > { %v2155_v47 = vpop.f32.mrf.mxu1 }
 0x213   : > { %v2156_v42 = vadd.f32 %v2155_v47, %v2057_v11 }
 0x214   : > { %v6038_v13 = vpop.f32.mrf.mxu3 }
 0x216   : > { %v2252_v46 = vpop.f32.mrf.mxu2 }
 0x217   : > { %3888 = vmatmul.msk.bf16.gmra.mxu0 %vm1850_vm1, %v6032_v2  ;;  %v2331_v57 = vadd.f32 %v2252_v46, %v2151_v52 }
 0x21a   : > { %v2158_v19 = vpop.f32.mrf.mxu1 }
 0x21b   : > { %3847 = vmatmul.msk.bf16.gmra.mxu2 %vm1850_vm1, %v5541_v56  ;;  %v2159_v38 = vadd.f32 %v2158_v19, %v2060_v51 }
 0x21c   : > { %v6044_v58 = vpop.f32.mrf.mxu3 }
 0x21d   : > { %3826 = vmatmul.msk.bf16.gmra.mxu1 %vm1850_vm1, %v5176_v14 }
 0x21e   : > { %v2255_v25 = vpop.f32.mrf.mxu2 }
 0x21f   : > { %v2332_v28 = vadd.f32 %v2255_v25, %v2154_v20  ;;  %v2383_v25 = vld [vmem:[#allocation2 + $0xf9] sm:$0xff] }
 0x221   : > { %3868 = vmatmul.msk.bf16.gmra.mxu3 %vm1850_vm1, %v6048_v35 }
 0x222   : > { %v2160_v20 = vpop.f32.mrf.mxu1 }
 0x223   : > { %v2161_v11 = vadd.f32 %v2160_v20, %v2062_v21  ;;  %v2385_v20 = vld [vmem:[#allocation2 + $0x111] sm:$0xff] }
 0x224   : > { %v2480_v7 = vpop.f32.mrf.mxu3  ;;  %v2065_v44 = vpop.f32.mrf.mxu0 }
 0x225   : > { %v2560_v49 = vadd.f32 %v2480_v7, %v2330_v27  ;;  %v2382_v7 = vld [vmem:[#allocation2 + $0xf1] sm:$0xff] }
 0x226   : > { %v2257_v16 = vpop.f32.mrf.mxu2 }
 0x227   : > { %3889 = vmatmul.msk.bf16.gmra.mxu0 %vm1850_vm1, %v6048_v35  ;;  %v2333_v27 = vadd.f32 %v2257_v16, %v2156_v42 }
 0x22a   : > { %v2163_v42 = vpop.f32.mrf.mxu1 }
 0x22b   : > { %3848 = vmatmul.msk.bf16.gmra.mxu2 %vm1850_vm1, %v5866_v41  ;;  %v2164_v16 = vadd.f32 %v2163_v42, %v2065_v44 }
 0x22c   : > { %v2482_v24 = vpop.f32.mrf.mxu3  ;;  %v2067_v55 = vpop.f32.mrf.mxu0 }
 0x22d   : > { %v2561_v1 = vadd.f32 %v2482_v24, %v2331_v57  ;;  %3827 = vmatmul.msk.bf16.gmra.mxu1 %vm1850_vm1, %v5541_v56 }
 0x22e   : > { %v2260_v14 = vpop.f32.mrf.mxu2 }
 0x22f   : > { %v2334_v57 = vadd.f32 %v2260_v14, %v2159_v38  ;;  %v2384_v14 = vld [vmem:[#allocation2 + $0x109] sm:$0xff] }
 0x231   : > { %3869 = vmatmul.msk.bf16.gmra.mxu3 %vm1850_vm1, %v6058_v10 }
 0x234   : > { %v2485_v22 = vpop.f32.mrf.mxu3  ;;  %v2614_v46 = vpop.f32.mrf.mxu0 }
 0x235   : > { %v2562_v52 = vadd.f32 %v2485_v22, %v2332_v28  ;;  %v6062_v36 = vadd.f32 %v2614_v46, %v2560_v49  ;;  %v6070_v49 = vpack.c.bf16 %v2383_v25, %v2382_v7  ;;  %v2165_v46 = vpop.f32.mrf.mxu1 }
 0x236   : > { %v2262_v4 = vpop.f32.mrf.mxu2 }
 0x237   : > { %3890 = vmatmul.msk.bf16.gmra.mxu0 %vm1850_vm1, %v6058_v10  ;;  %v2335_v24 = vadd.f32 %v2262_v4, %v2161_v11 }
 0x23b   : > { %3849 = vmatmul.msk.bf16.gmra.mxu2 %vm1850_vm1, %v4894_v37 }
 0x23c   : > { %v2487_v47 = vpop.f32.mrf.mxu3  ;;  %v2616_v28 = vpop.f32.mrf.mxu0 }
 0x23d   : > { %v2563_v51 = vadd.f32 %v2487_v47, %v2333_v27  ;;  %v6072_v48 = vadd.f32 %v2616_v28, %v2561_v1  ;;  %v2166_v1 = vadd.f32 %v2165_v46, %v2067_v55  ;;  %3828 = vmatmul.msk.bf16.gmra.mxu1 %vm1850_vm1, %v5866_v41  ;;  %v2168_v28 = vpop.f32.mrf.mxu1 }
 0x23e   : > { %v2265_v56 = vpop.f32.mrf.mxu2 }
 0x23f   : > { %v2336_v27 = vadd.f32 %v2265_v56, %v2164_v16  ;;  %v2387_v56 = vld [vmem:[#allocation2 + $0x129] sm:$0xff] }
 0x241   : > { %3870 = vmatmul.msk.bf16.gmra.mxu3 %vm1850_vm1, %v6070_v49 }
 0x244   : > { %v2490_v21 = vpop.f32.mrf.mxu3  ;;  %v2619_v38 = vpop.f32.mrf.mxu0 }
 0x245   : > { %v2564_v19 = vadd.f32 %v2490_v21, %v2334_v57  ;;  %v6076_v22 = vadd.f32 %v2619_v38, %v2562_v52  ;;  %v6084_v52 = vpack.c.bf16 %v2385_v20, %v2384_v14  ;;  %v2169_v21 = vadd.f32 %v2168_v28, %v5952_v30  ;;  %v2386_v38 = vld [vmem:[#allocation2 + $0x121] sm:$0xff] }
 0x246   : > { %v2267_v25 = vpop.f32.mrf.mxu2 }
 0x247   : > { %3891 = vmatmul.msk.bf16.gmra.mxu0 %vm1850_vm1, %v6070_v49  ;;  %v2337_v47 = vadd.f32 %v2267_v25, %v2166_v1  ;;  %v6099_v1 = vpack.c.bf16 %v2387_v56, %v2386_v38 }
 0x24b   : > { %3850 = vmatmul.msk.bf16.gmra.mxu2 %vm1850_vm1, %v5255_v8 }
 0x24c   : > { %v2492_v11 = vpop.f32.mrf.mxu3  ;;  %v2621_v57 = vpop.f32.mrf.mxu0 }
 0x24d   : > { %v2565_v44 = vadd.f32 %v2492_v11, %v2335_v24  ;;  %v6086_v7 = vadd.f32 %v2621_v57, %v2563_v51  ;;  %v2170_v51 = vpop.f32.mrf.mxu1  ;;  %3829 = vmatmul.msk.bf16.gmra.mxu1 %vm1850_vm1, %v4894_v37 }
 0x24e   : > { %v2270_v41 = vpop.f32.mrf.mxu2  ;;  %v2171_v14 = vadd.f32 %v2170_v51, %v5962_v6  ;;  %v2388_v6 = vld [vmem:[#allocation2 + $0x139] sm:$0xff] }
 0x24f   : > { %v2338_v24 = vadd.f32 %v2270_v41, %v2169_v21  ;;  %v2389_v41 = vld [vmem:[#allocation2 + $0x141] sm:$0xff] }
 0x250   : > { %v6115_v38 = vpack.c.bf16 %v2389_v41, %v2388_v6 }
 0x251   : > { %3871 = vmatmul.msk.bf16.gmra.mxu3 %vm1850_vm1, %v6084_v52 }
 0x254   : > { %v2495_v4 = vpop.f32.mrf.mxu3  ;;  %v2624_v42 = vpop.f32.mrf.mxu0 }
 0x255   : > { %v2566_v55 = vadd.f32 %v2495_v4, %v2336_v27  ;;  %v6090_v16 = vadd.f32 %v2624_v42, %v2564_v19  ;;  %v2173_v57 = vpop.f32.mrf.mxu1 }
 0x256   : > { %v2272_v20 = vpop.f32.mrf.mxu2  ;;  %v2174_v37 = vadd.f32 %v2173_v57, %v5976_v43 }
 0x257   : > { %3892 = vmatmul.msk.bf16.gmra.mxu0 %vm1850_vm1, %v6084_v52  ;;  %v2339_v11 = vadd.f32 %v2272_v20, %v2171_v14 }
 0x25b   : > { %3851 = vmatmul.msk.bf16.gmra.mxu2 %vm1850_vm1, %v5633_v39 }
 0x25c   : > { %v2497_v46 = vpop.f32.mrf.mxu3  ;;  %v2626_v19 = vpop.f32.mrf.mxu0 }
 0x25d   : > { %v2567_v27 = vadd.f32 %v2497_v46, %v2337_v47  ;;  %v6101_v30 = vadd.f32 %v2626_v19, %v2565_v44  ;;  %v2175_v21 = vpop.f32.mrf.mxu1  ;;  %3830 = vmatmul.msk.bf16.gmra.mxu1 %vm1850_vm1, %v5255_v8 }
 0x25e   : > { %v2275_v44 = vpop.f32.mrf.mxu2  ;;  %v2176_v56 = vadd.f32 %v2175_v21, %v5982_v29  ;;  %v2390_v29 = vld [vmem:[#allocation2 + $0x151] sm:$0xff] }
 0x25f   : > { %v2340_v47 = vadd.f32 %v2275_v44, %v2174_v37  ;;  %v2391_v37 = vld [vmem:[#allocation2 + $0x159] sm:$0xff] }
 0x261   : > { %3872 = vmatmul.msk.bf16.gmra.mxu3 %vm1850_vm1, %v6099_v1 }
 0x264   : > { %v2500_v25 = vpop.f32.mrf.mxu3  ;;  %v2629_v4 = vpop.f32.mrf.mxu0 }
 0x265   : > { %v2568_v28 = vadd.f32 %v2500_v25, %v2338_v24  ;;  %v6106_v42 = vadd.f32 %v2629_v4, %v2566_v55 }
 0x266   : > { %v2277_v46 = vpop.f32.mrf.mxu2 }
 0x267   : > { %3893 = vmatmul.msk.bf16.gmra.mxu0 %vm1850_vm1, %v6099_v1  ;;  %v2341_v19 = vadd.f32 %v2277_v46, %v2176_v56  ;;  %v1963_v46 = vld [vmem:[#allocation2 + $0x198] sm:$0xff] }
 0x26b   : > { %3852 = vmatmul.msk.bf16.gmra.mxu2 %vm1850_vm1, %v5908_v15  ;;  %v2178_v15 = vpop.f32.mrf.mxu1 }
 0x26c   : > { %v2502_v51 = vpop.f32.mrf.mxu3  ;;  %v2631_v55 = vpop.f32.mrf.mxu0  ;;  %v2179_v8 = vadd.f32 %v2178_v15, %v5996_v18  ;;  %v1964_v15 = vld [vmem:[#allocation2 + $0x1a0] sm:$0xff] }
 0x26d   : > { %v2569_v24 = vadd.f32 %v2502_v51, %v2339_v11  ;;  %v6117_v43 = vadd.f32 %v2631_v55, %v2567_v27  ;;  %3831 = vmatmul.msk.bf16.gmra.mxu1 %vm1850_vm1, %v5633_v39 }
 0x26e   : > { %v2280_v27 = vpop.f32.mrf.mxu2 }
 0x26f   : > { %v2342_v11 = vadd.f32 %v2280_v27, %v2179_v8 }
 0x271   : > { %3873 = vmatmul.msk.bf16.gmra.mxu3 %vm1850_vm1, %v6115_v38 }
 0x273   : > { %v2180_v4 = vpop.f32.mrf.mxu1 }
 0x274   : > { %v2505_v14 = vpop.f32.mrf.mxu3  ;;  %v2634_v57 = vpop.f32.mrf.mxu0  ;;  %v2181_v18 = vadd.f32 %v2180_v4, %v6004_v45  ;;  %v2392_v4 = vld [vmem:[#allocation2 + $0x169] sm:$0xff] }
 0x275   : > { %v2570_v20 = vadd.f32 %v2505_v14, %v2340_v47  ;;  %v6122_v25 = vadd.f32 %v2634_v57, %v2568_v28  ;;  %v6129_v47 = vpack.c.bf16 %v2391_v37, %v2390_v29  ;;  %v2228_v57 = vpack.c.bf16 %v1964_v15, %v1963_v46  ;;  %v2393_v29 = vld [vmem:[#allocation2 + $0x171] sm:$0xff]  ;;  %v2860_v46 = vld [vmem:[#allocation2 + $0x2] sm:$0xff] }
 0x276   : > { %v2282_v41 = vpop.f32.mrf.mxu2  ;;  %v2861_v15 = vld [vmem:[#allocation2 + $0xa] sm:$0xff] }
 0x277   : > { %3894 = vmatmul.msk.bf16.gmra.mxu0 %vm1850_vm1, %v6115_v38  ;;  %v2343_v51 = vadd.f32 %v2282_v41, %v2181_v18 }
 0x27b   : > { %v2183_v55 = vpop.f32.mrf.mxu1  ;;  %3853 = vmatmul.msk.bf16.gmra.mxu2 %vm1850_vm1, %v2228_v57 }
 0x27c   : > { %v2507_v44 = vpop.f32.mrf.mxu3  ;;  %v2636_v6 = vpop.f32.mrf.mxu0 }
 0x27d   : > { %v2571_v21 = vadd.f32 %v2507_v44, %v2341_v19  ;;  %v6131_v28 = vadd.f32 %v2636_v6, %v2569_v24  ;;  %v2184_v24 = vadd.f32 %v2183_v55, %v6018_v33  ;;  %3904 = vmatmul.msk.bf16.vlgmr.msra.gmra.mxu1 %vm1850_vm1, %v5941_v61  ;;  %v6144_v6 = vpack.c.bf16 %v2393_v29, %v2392_v4 }
 0x27e   : > { %v2285_v45 = vpop.f32.mrf.mxu2 }
 0x27f   : > { %v2344_v8 = vadd.f32 %v2285_v45, %v2184_v24  ;;  %v2862_v24 = vld [vmem:[#allocation2 + $0x1a] sm:$0xff]  ;;  %v2863_v45 = vld [vmem:[#allocation2 + $0x22] sm:$0xff] }
 0x281   : > { %3874 = vmatmul.msk.bf16.gmra.mxu3 %vm1850_vm1, %v6129_v47 }
 0x283   : > { %v2185_v27 = vpop.f32.mrf.mxu1 }
 0x284   : > { %v2510_v56 = vpop.f32.mrf.mxu3  ;;  %v2639_v39 = vpop.f32.mrf.mxu0  ;;  %v2186_v33 = vadd.f32 %v2185_v27, %v6026_v5 }
 0x285   : > { %v2572_v14 = vadd.f32 %v2510_v56, %v2342_v11  ;;  %v6137_v19 = vadd.f32 %v2639_v39, %v2570_v20  ;;  %v2896_v39 = vpack.c.bf16 %v2861_v15, %v2860_v46 }
 0x286   : > { %v2287_v18 = vpop.f32.mrf.mxu2 }
 0x287   : > { %3895 = vmatmul.msk.bf16.gmra.mxu0 %vm1850_vm1, %v6129_v47  ;;  %v2345_v41 = vadd.f32 %v2287_v18, %v2186_v33  ;;  %v2394_v18 = vld [vmem:[#allocation2 + $0x181] sm:$0xff] }
 0x28b   : > { %v2188_v55 = vpop.f32.mrf.mxu1  ;;  %3926 = vmatmul.msk.bf16.vlgmr.msra.gmra.mxu2 %vm1850_vm1, %v2896_v39 }
 0x28c   : > { %v2512_v37 = vpop.f32.mrf.mxu3  ;;  %v2641_v44 = vpop.f32.mrf.mxu0 }
 0x28d   : > { %v2573_v11 = vadd.f32 %v2512_v37, %v2343_v51  ;;  %v6146_v20 = vadd.f32 %v2641_v44, %v2571_v21  ;;  %v2189_v21 = vadd.f32 %v2188_v55, %v5958_v50  ;;  %3905 = vmatmul.msk.bf16.gmra.mxu1 %vm1850_vm1, %v5950_v53  ;;  %v2897_v37 = vpack.c.bf16 %v2863_v45, %v2862_v24  ;;  %v2395_v55 = vld [vmem:[#allocation2 + $0x189] sm:$0xff]  ;;  %v2864_v24 = vld [vmem:[#allocation2 + $0x32] sm:$0xff]  ;;  %v2865_v45 = vld [vmem:[#allocation2 + $0x3a] sm:$0xff] }
 0x28e   : > { %v2290_v5 = vpop.f32.mrf.mxu2  ;;  %v6163_v39 = vpack.c.bf16 %v2395_v55, %v2394_v18 }
 0x28f   : > { %v2346_v27 = vadd.f32 %v2290_v5, %v2189_v21 }
 0x291   : > { %3875 = vmatmul.msk.bf16.gmra.mxu3 %vm1850_vm1, %v6144_v6 }
 0x293   : > { %v2190_v4 = vpop.f32.mrf.mxu1 }
 0x294   : > { %v2515_v56 = vpop.f32.mrf.mxu3  ;;  %v2644_v61 = vpop.f32.mrf.mxu0 }
 0x295   : > { %v2574_v57 = vadd.f32 %v2515_v56, %v2344_v8  ;;  %v6152_v51 = vadd.f32 %v2644_v61, %v2572_v14  ;;  %v2191_v14 = vadd.f32 %v2190_v4, %v5972_v32 }
 0x296   : > { %v2292_v50 = vpop.f32.mrf.mxu2 }
 0x297   : > { %3896 = vmatmul.msk.bf16.gmra.mxu0 %vm1850_vm1, %v6144_v6  ;;  %v2347_v56 = vadd.f32 %v2292_v50, %v2191_v14 }
 0x29b   : > { %v2193_v46 = vpop.f32.mrf.mxu1  ;;  %3927 = vmatmul.msk.bf16.gmra.mxu2 %vm1850_vm1, %v2897_v37 }
 0x29c   : > { %v2517_v29 = vpop.f32.mrf.mxu3  ;;  %v2646_v44 = vpop.f32.mrf.mxu0 }
 0x29d   : > { %v2575_v8 = vadd.f32 %v2517_v29, %v2345_v41  ;;  %v6159_v33 = vadd.f32 %v2646_v44, %v2573_v11  ;;  %v2194_v11 = vadd.f32 %v2193_v46, %v5980_v63  ;;  %3906 = vmatmul.msk.bf16.gmra.mxu1 %vm1850_vm1, %v5968_v31  ;;  %v2898_v44 = vpack.c.bf16 %v2865_v45, %v2864_v24 }
 0x29e   : > { %v2295_v32 = vpop.f32.mrf.mxu2 }
 0x29f   : > { %v2348_v41 = vadd.f32 %v2295_v32, %v2194_v11  ;;  %v2867_v11 = vld [vmem:[#allocation2 + $0x52] sm:$0xff] }
 0x2a1   : > { %3948 = vmatmul.msk.bf16.vlgmr.msra.gmra.mxu3 %vm1850_vm1, %v2897_v37 }
 0x2a3   : > { %v2195_v5 = vpop.f32.mrf.mxu1 }
 0x2a4   : > { %v2520_v15 = vpop.f32.mrf.mxu3  ;;  %v2649_v21 = vpop.f32.mrf.mxu0 }
 0x2a5   : > { %v2576_v61 = vadd.f32 %v2520_v15, %v2346_v27  ;;  %v6166_v53 = vadd.f32 %v2649_v21, %v2574_v57  ;;  %v2196_v57 = vadd.f32 %v2195_v5, %v5994_v12  ;;  %v2866_v12 = vld [vmem:[#allocation2 + $0x4a] sm:$0xff] }
 0x2a6   : > { %v2297_v63 = vpop.f32.mrf.mxu2  ;;  %v2899_v24 = vpack.c.bf16 %v2867_v11, %v2866_v12 }
 0x2a7   : > { %3897 = vmatmul.msk.bf16.gmra.mxu0 %vm1850_vm1, %v6163_v39  ;;  %v2349_v14 = vadd.f32 %v2297_v63, %v2196_v57 }
 0x2ab   : > { %v2198_v50 = vpop.f32.mrf.mxu1  ;;  %3928 = vmatmul.msk.bf16.gmra.mxu2 %vm1850_vm1, %v2898_v44 }
 0x2ac   : > { %v2522_v4 = vpop.f32.mrf.mxu3  ;;  %v2651_v29 = vpop.f32.mrf.mxu0  ;;  %v2199_v31 = vadd.f32 %v2198_v50, %v6002_v54 }
 0x2ad   : > { %v2577_v27 = vadd.f32 %v2522_v4, %v2347_v56  ;;  %v6173_v37 = vadd.f32 %v2651_v29, %v2575_v8  ;;  %3907 = vmatmul.msk.bf16.gmra.mxu1 %vm1850_vm1, %v5990_v60 }
 0x2ae   : > { %v2300_v8 = vpop.f32.mrf.mxu2 }
 0x2af   : > { %v2350_v56 = vadd.f32 %v2300_v8, %v2199_v31 }
 0x2b1   : > { %3949 = vmatmul.msk.bf16.gmra.mxu3 %vm1850_vm1, %v2898_v44 }
 0x2b3   : > { %v2200_v21 = vpop.f32.mrf.mxu1 }
 0x2b4   : > { %v2525_v18 = vpop.f32.mrf.mxu3  ;;  %v2654_v46 = vpop.f32.mrf.mxu0 }
 0x2b5   : > { %v2578_v55 = vadd.f32 %v2525_v18, %v2348_v41  ;;  %v6178_v15 = vadd.f32 %v2654_v46, %v2576_v61  ;;  %v2201_v61 = vadd.f32 %v2200_v21, %v6016_v9  ;;  %v2868_v9 = vld [vmem:[#allocation2 + $0x62] sm:$0xff]  ;;  %v2869_v46 = vld [vmem:[#allocation2 + $0x6a] sm:$0xff] }
 0x2b6   : > { %v2302_v54 = vpop.f32.mrf.mxu2  ;;  %v2900_v21 = vpack.c.bf16 %v2869_v46, %v2868_v9 }
 0x2b7   : > { %3970 = vmatmul.msk.bf16.vlgmr.msra.gmra.mxu0 %vm1850_vm1, %v2898_v44  ;;  %v2351_v4 = vadd.f32 %v2302_v54, %v2201_v61 }
 0x2bb   : > { %v2203_v29 = vpop.f32.mrf.mxu1  ;;  %3929 = vmatmul.msk.bf16.gmra.mxu2 %vm1850_vm1, %v2899_v24 }
 0x2bc   : > { %v2527_v32 = vpop.f32.mrf.mxu3  ;;  %v2656_v41 = vpop.f32.mrf.mxu0  ;;  %v2204_v60 = vadd.f32 %v2203_v29, %v6022_v3 }
 0x2bd   : > { %v2579_v5 = vadd.f32 %v2527_v32, %v2349_v14  ;;  %v6184_v45 = vadd.f32 %v2656_v41, %v2577_v27  ;;  %3908 = vmatmul.msk.bf16.gmra.mxu1 %vm1850_vm1, %v6010_v23 }
 0x2be   : > { %v2305_v27 = vpop.f32.mrf.mxu2 }
 0x2bf   : > { %v2352_v14 = vadd.f32 %v2305_v27, %v2204_v60 }
 0x2c1   : > { %3950 = vmatmul.msk.bf16.gmra.mxu3 %vm1850_vm1, %v2899_v24 }
 0x2c3   : > { %v2205_v18 = vpop.f32.mrf.mxu1 }
 0x2c4   : > { %v2530_v44 = vpop.f32.mrf.mxu3  ;;  %v2659_v63 = vpop.f32.mrf.mxu0 }
 0x2c5   : > { %v2580_v57 = vadd.f32 %v2530_v44, %v2350_v56  ;;  %v6189_v50 = vadd.f32 %v2659_v63, %v2578_v55  ;;  %v2206_v55 = vadd.f32 %v2205_v18, %v6036_v59  ;;  %v2870_v59 = vld [vmem:[#allocation2 + $0x7a] sm:$0xff]  ;;  %v2871_v44 = vld [vmem:[#allocation2 + $0x82] sm:$0xff] }
 0x2c6   : > { %v2307_v3 = vpop.f32.mrf.mxu2 }
 0x2c7   : > { %3971 = vmatmul.msk.bf16.gmra.mxu0 %vm1850_vm1, %v2899_v24  ;;  %v2353_v11 = vadd.f32 %v2307_v3, %v2206_v55 }
 0x2cb   : > { %v2208_v32 = vpop.f32.mrf.mxu1  ;;  %3930 = vmatmul.msk.bf16.gmra.mxu2 %vm1850_vm1, %v2900_v21 }
 0x2cc   : > { %v2532_v31 = vpop.f32.mrf.mxu3  ;;  %v2661_v56 = vpop.f32.mrf.mxu0  ;;  %v2209_v23 = vadd.f32 %v2208_v32, %v5960_v40  ;;  %v2873_v32 = vld [vmem:[#allocation2 + $0x9a] sm:$0xff] }
 0x2cd   : > { %v2581_v8 = vadd.f32 %v2532_v31, %v2351_v4  ;;  %v6195_v12 = vadd.f32 %v2661_v56, %v2579_v5  ;;  %3909 = vmatmul.msk.bf16.gmra.mxu1 %vm1850_vm1, %v6032_v2 }
 0x2ce   : > { %v2310_v5 = vpop.f32.mrf.mxu2 }
 0x2cf   : > { %v2354_v4 = vadd.f32 %v2310_v5, %v2209_v23 }
 0x2d1   : > { %3951 = vmatmul.msk.bf16.gmra.mxu3 %vm1850_vm1, %v2900_v21 }
 0x2d3   : > { %v2210_v29 = vpop.f32.mrf.mxu1 }
 0x2d4   : > { %v2535_v41 = vpop.f32.mrf.mxu3  ;;  %v2664_v61 = vpop.f32.mrf.mxu0 }
 0x2d5   : > { %v2582_v24 = vadd.f32 %v2535_v41, %v2352_v14  ;;  %v6200_v54 = vadd.f32 %v2664_v61, %v2580_v57  ;;  %v2901_v14 = vpack.c.bf16 %v2871_v44, %v2870_v59  ;;  %v2211_v57 = vadd.f32 %v2210_v29, %v5974_v0  ;;  %v2872_v0 = vld [vmem:[#allocation2 + $0x92] sm:$0xff] }
 0x2d6   : > { %v2312_v40 = vpop.f32.mrf.mxu2  ;;  %v2902_v5 = vpack.c.bf16 %v2873_v32, %v2872_v0 }
 0x2d7   : > { %3972 = vmatmul.msk.bf16.gmra.mxu0 %vm1850_vm1, %v2900_v21  ;;  %v2355_v9 = vadd.f32 %v2312_v40, %v2211_v57 }
 0x2db   : > { %v2213_v46 = vpop.f32.mrf.mxu1  ;;  %3931 = vmatmul.msk.bf16.gmra.mxu2 %vm1850_vm1, %v2901_v14 }
 0x2dc   : > { %v2537_v63 = vpop.f32.mrf.mxu3  ;;  %v2666_v27 = vpop.f32.mrf.mxu0  ;;  %v2214_v2 = vadd.f32 %v2213_v46, %v5986_v62 }
 0x2dd   : > { %v2583_v60 = vadd.f32 %v2537_v63, %v2353_v11  ;;  %v6206_v18 = vadd.f32 %v2666_v27, %v2581_v8  ;;  %3910 = vmatmul.msk.bf16.gmra.mxu1 %vm1850_vm1, %v6048_v35 }
 0x2de   : > { %v2315_v8 = vpop.f32.mrf.mxu2 }
 0x2df   : > { %v2356_v3 = vadd.f32 %v2315_v8, %v2214_v2 }
 0x2e1   : > { %3952 = vmatmul.msk.bf16.gmra.mxu3 %vm1850_vm1, %v2901_v14 }
 0x2e3   : > { %v2215_v11 = vpop.f32.mrf.mxu1 }
 0x2e4   : > { %v2540_v31 = vpop.f32.mrf.mxu3  ;;  %v2669_v21 = vpop.f32.mrf.mxu0 }
 0x2e5   : > { %v2584_v56 = vadd.f32 %v2540_v31, %v2354_v4  ;;  %v6211_v55 = vadd.f32 %v2669_v21, %v2582_v24  ;;  %v2216_v24 = vadd.f32 %v2215_v11, %v5998_v17  ;;  %v2874_v17 = vld [vmem:[#allocation2 + $0xaa] sm:$0xff] }
 0x2e6   : > { %v2317_v62 = vpop.f32.mrf.mxu2 }
 0x2e7   : > { %3973 = vmatmul.msk.bf16.gmra.mxu0 %vm1850_vm1, %v2901_v14  ;;  %v2357_v29 = vadd.f32 %v2317_v62, %v2216_v24  ;;  %v2877_v62 = vld [vmem:[#allocation2 + $0xca] sm:$0xff] }
 0x2eb   : > { %v2218_v59 = vpop.f32.mrf.mxu1  ;;  %3932 = vmatmul.msk.bf16.gmra.mxu2 %vm1850_vm1, %v2902_v5 }
 0x2ec   : > { %v2542_v41 = vpop.f32.mrf.mxu3  ;;  %v2671_v23 = vpop.f32.mrf.mxu0  ;;  %v2219_v35 = vadd.f32 %v2218_v59, %v6012_v34 }
 0x2ed   : > { %v2585_v61 = vadd.f32 %v2542_v41, %v2355_v9  ;;  %v6217_v4 = vadd.f32 %v2671_v23, %v2583_v60  ;;  %v2875_v9 = vld [vmem:[#allocation2 + $0xb2] sm:$0xff]  ;;  %3911 = vmatmul.msk.bf16.gmra.mxu1 %vm1850_vm1, %v6058_v10 }
 0x2ee   : > { %v2320_v60 = vpop.f32.mrf.mxu2  ;;  %v2903_v2 = vpack.c.bf16 %v2875_v9, %v2874_v17 }
 0x2ef   : > { %v2358_v57 = vadd.f32 %v2320_v60, %v2219_v35 }
 0x2f1   : > { %3953 = vmatmul.msk.bf16.gmra.mxu3 %vm1850_vm1, %v2902_v5 }
 0x2f3   : > { %v2220_v40 = vpop.f32.mrf.mxu1 }
 0x2f4   : > { %v2545_v44 = vpop.f32.mrf.mxu3  ;;  %v2674_v27 = vpop.f32.mrf.mxu0 }
 0x2f5   : > { %v2586_v63 = vadd.f32 %v2545_v44, %v2356_v3  ;;  %v6222_v14 = vadd.f32 %v2674_v27, %v2584_v56  ;;  %v2221_v56 = vadd.f32 %v2220_v40, %v6024_v26  ;;  %v2876_v26 = vld [vmem:[#allocation2 + $0xc2] sm:$0xff] }
 0x2f6   : > { %v2322_v34 = vpop.f32.mrf.mxu2  ;;  %v2904_v27 = vpack.c.bf16 %v2877_v62, %v2876_v26 }
 0x2f7   : > { %3974 = vmatmul.msk.bf16.gmra.mxu0 %vm1850_vm1, %v2902_v5  ;;  %v2359_v3 = vadd.f32 %v2322_v34, %v2221_v56 }
 0x2fb   : > { %v2223_v11 = vpop.f32.mrf.mxu1  ;;  %3933 = vmatmul.msk.bf16.gmra.mxu2 %vm1850_vm1, %v2903_v2 }
 0x2fc   : > { %v2547_v46 = vpop.f32.mrf.mxu3  ;;  %v2676_v21 = vpop.f32.mrf.mxu0  ;;  %v2224_v10 = vadd.f32 %v2223_v11, %v6038_v13 }
 0x2fd   : > { %v2587_v31 = vadd.f32 %v2547_v46, %v2357_v29  ;;  %v6228_v8 = vadd.f32 %v2676_v21, %v2585_v61  ;;  %3912 = vmatmul.msk.bf16.gmra.mxu1 %vm1850_vm1, %v6070_v49  ;;  %v2878_v21 = vld [vmem:[#allocation2 + $0xda] sm:$0xff] }
 0x2fe   : > { %v2325_v61 = vpop.f32.mrf.mxu2 }
 0x2ff   : > { %v2360_v24 = vadd.f32 %v2325_v61, %v2224_v10 }
 0x301   : > { %3954 = vmatmul.msk.bf16.gmra.mxu3 %vm1850_vm1, %v2903_v2 }
 0x303   : > { %v2225_v5 = vpop.f32.mrf.mxu1 }
 0x304   : > { %v2550_v0 = vpop.f32.mrf.mxu3  ;;  %v2679_v41 = vpop.f32.mrf.mxu0 }
 0x305   : > { %v2588_v32 = vadd.f32 %v2550_v0, %v2358_v57  ;;  %v6233_v23 = vadd.f32 %v2679_v41, %v2586_v63  ;;  %v2226_v63 = vadd.f32 %v2225_v5, %v6044_v58 }
 0x306   : > { %v2327_v60 = vpop.f32.mrf.mxu2 }
 0x307   : > { %3975 = vmatmul.msk.bf16.gmra.mxu0 %vm1850_vm1, %v2903_v2  ;;  %v2361_v57 = vadd.f32 %v2327_v60, %v2226_v63 }
 0x30b   : > { %v2748_v13 = vpop.f32.mrf.mxu1  ;;  %3934 = vmatmul.msk.bf16.gmra.mxu2 %vm1850_vm1, %v2904_v27 }
 0x30c   : > { %v2552_v29 = vpop.f32.mrf.mxu3  ;;  %v2681_v44 = vpop.f32.mrf.mxu0 }
 0x30d   : > { %v2589_v59 = vadd.f32 %v2552_v29, %v2359_v3  ;;  %v6239_v35 = vadd.f32 %v2681_v44, %v2587_v31  ;;  %v2879_v31 = vld [vmem:[#allocation2 + $0xe2] sm:$0xff]  ;;  %3913 = vmatmul.msk.bf16.gmra.mxu1 %vm1850_vm1, %v6084_v52  ;;  %v2881_v52 = vld [vmem:[#allocation2 + $0xfa] sm:$0xff]  ;;  %v2828_v29 = vadd.f32 %v2748_v13, %v6062_v36 }
 0x30e   : > { %v2978_v49 = vpop.f32.mrf.mxu2  ;;  %v2905_v3 = vpack.c.bf16 %v2879_v31, %v2878_v21 }
 0x311   : > { %3955 = vmatmul.msk.bf16.gmra.mxu3 %vm1850_vm1, %v2904_v27 }
 0x313   : > { %v2750_v56 = vpop.f32.mrf.mxu1 }
 0x314   : > { %v2555_v40 = vpop.f32.mrf.mxu3  ;;  %v2684_v9 = vpop.f32.mrf.mxu0 }
 0x315   : > { %v2590_v17 = vadd.f32 %v2555_v40, %v2360_v24  ;;  %v6244_v46 = vadd.f32 %v2684_v9, %v2588_v32  ;;  %v2880_v24 = vld [vmem:[#allocation2 + $0xf2] sm:$0xff]  ;;  %v6265_v9 = vld [vmem:[%s6522_s4] ss:$0 sm:$0xff] }
 0x316   : > { %v2980_v0 = vpop.f32.mrf.mxu2  ;;  %v2906_v44 = vpack.c.bf16 %v2881_v52, %v2880_v24 }
 0x317   : > { %3976 = vmatmul.msk.bf16.gmra.mxu0 %vm1850_vm1, %v2904_v27  ;;  %v3058_v27 = vadd.f32 %v2978_v49, %v2828_v29 }
 0x31b   : > { %v2753_v41 = vpop.f32.mrf.mxu1  ;;  %3935 = vmatmul.msk.bf16.gmra.mxu2 %vm1850_vm1, %v2905_v3 }
 0x31c   : > { %v2557_v2 = vpop.f32.mrf.mxu3  ;;  %v2686_v34 = vpop.f32.mrf.mxu0 }
 0x31d   : > { %v2591_v58 = vadd.f32 %v2557_v2, %v2361_v57  ;;  %v6249_v11 = vadd.f32 %v2686_v34, %v2589_v59  ;;  %3914 = vmatmul.msk.bf16.gmra.mxu1 %vm1850_vm1, %v6099_v1  ;;  %v2829_v1 = vadd.f32 %v2750_v56, %v6072_v48  ;;  %v2830_v34 = vadd.f32 %v2753_v41, %v6076_v22 }
 0x31e   : > { %v2983_v5 = vpop.f32.mrf.mxu2 }
 0x31f   : > { %v3059_v13 = vadd.f32 %v2980_v0, %v2829_v1  ;;  %v3060_v0 = vadd.f32 %v2983_v5, %v2830_v34 }
 0x321   : > { %3956 = vmatmul.msk.bf16.gmra.mxu3 %vm1850_vm1, %v2905_v3 }
 0x323   : > { %v2755_v62 = vpop.f32.mrf.mxu1 }
 0x324   : > { %v3112_v32 = vpop.f32.mrf.mxu3  ;;  %v2689_v10 = vpop.f32.mrf.mxu0 }
 0x325   : > { %v6253_v61 = vadd.f32 %v2689_v10, %v2590_v17  ;;  %v3192_v57 = vadd.f32 %v3112_v32, %v3058_v27  ;;  %v2883_v32 = vld [vmem:[#allocation2 + $0x112] sm:$0xff] }
 0x326   : > { %v2985_v60 = vpop.f32.mrf.mxu2 }
 0x327   : > { %3977 = vmatmul.msk.bf16.gmra.mxu0 %vm1850_vm1, %v2905_v3  ;;  %v2882_v3 = vld [vmem:[#allocation2 + $0x10a] sm:$0xff] }
 0x328   : > { %v2907_v52 = vpack.c.bf16 %v2883_v32, %v2882_v3 }
 0x32b   : > { %v2758_v17 = vpop.f32.mrf.mxu1  ;;  %3936 = vmatmul.msk.bf16.gmra.mxu2 %vm1850_vm1, %v2906_v44 }
 0x32c   : > { %v3114_v26 = vpop.f32.mrf.mxu3  ;;  %v2691_v59 = vpop.f32.mrf.mxu0 }
 0x32d   : > { %v6259_v63 = vadd.f32 %v2691_v59, %v2591_v58  ;;  %v3193_v58 = vadd.f32 %v3114_v26, %v3059_v13  ;;  %3915 = vmatmul.msk.bf16.gmra.mxu1 %vm1850_vm1, %v6115_v38  ;;  %v2831_v13 = vadd.f32 %v2755_v62, %v6086_v7  ;;  %v2885_v7 = vld [vmem:[#allocation2 + $0x12a] sm:$0xff] }
 0x32e   : > { %v2988_v31 = vpop.f32.mrf.mxu2 }
 0x331   : > { %3957 = vmatmul.msk.bf16.gmra.mxu3 %vm1850_vm1, %v2906_v44 }
 0x333   : > { %v2760_v48 = vpop.f32.mrf.mxu1 }
 0x334   : > { %v3117_v40 = vpop.f32.mrf.mxu3  ;;  %v3246_v21 = vpop.f32.mrf.mxu0 }
 0x335   : > { %v3326_v36 = vadd.f32 %v3246_v21, %v3192_v57  ;;  %v3194_v22 = vadd.f32 %v3117_v40, %v3060_v0 }
 0x336   : > { %v2990_v41 = vpop.f32.mrf.mxu2 }
 0x337   : > { %3978 = vmatmul.msk.bf16.gmra.mxu0 %vm1850_vm1, %v2906_v44  ;;  %v3362_v49 = vadd.f32 %v6265_v9, %v3326_v36 }
 0x339   : > { %v3394_v2 = vpack.c.bf16 %v3362_v49, %v3362_v49  ;;  %v3534_v29 = vmul.f32 %v3362_v49, %v3362_v49  ;;  %v3461_v59 = vsel %vm3460_vm6, %v3362_v49, 0.0  ;;  %v3061_v49 = vadd.f32 %v2985_v60, %v2831_v13 }
 0x33b   : > { %3427 = vst.msk [vmem:[%s4315_s16] sm:$0xf] %vm3426_vm5, %v3394_v2  ;;  %v6280_v5 = vpop.f32.mrf.mxu1  ;;  %v3566_v21 = vsel %vm3460_vm6, %v3534_v29, 0.0  ;;  %3937 = vmatmul.msk.bf16.gmra.mxu2 %vm1850_vm1, %v2907_v52 }
 0x33c   : > { %v3119_v10 = vpop.f32.mrf.mxu3  ;;  %v3248_v56 = vpop.f32.mrf.mxu0 }
 0x33d   : > { %v3327_v24 = vadd.f32 %v3248_v56, %v3193_v58  ;;  %3916 = vmatmul.msk.bf16.gmra.mxu1 %vm1850_vm1, %v6129_v47 }
 0x33e   : > { %v2993_v3 = vpop.f32.mrf.mxu2 }
 0x33f   : > { %v3363_v26 = vadd.f32 %v6265_v9, %v3327_v24  ;;  %v3195_v24 = vadd.f32 %v3119_v10, %v3061_v49 }
 0x341   : > { %3958 = vmatmul.msk.bf16.gmra.mxu3 %vm1850_vm1, %v2907_v52  ;;  %v3395_v44 = vpack.c.bf16 %v3363_v26, %v3363_v26  ;;  %v3462_v38 = vsel %vm3460_vm6, %v3363_v26, 0.0  ;;  %v3535_v27 = vmul.f32 %v3363_v26, %v3363_v26  ;;  %v2884_v26 = vld [vmem:[#allocation2 + $0x122] sm:$0xff] }
 0x342   : > { %v3463_v57 = vadd.f32 %v3462_v38, %v3461_v59 }
 0x343   : > { %3428 = vst.msk [vmem:[%s4315_s16 + $0x4] sm:$0xf] %vm3426_vm5, %v3395_v44  ;;  %v3567_v36 = vsel %vm3460_vm6, %v3535_v27, 0.0  ;;  %v2765_v59 = vpop.f32.mrf.mxu1  ;;  %v2908_v27 = vpack.c.bf16 %v2885_v7, %v2884_v26 }
 0x344   : > { %v3122_v1 = vpop.f32.mrf.mxu3  ;;  %v3568_v40 = vadd.f32 %v3567_v36, %v3566_v21  ;;  %v3251_v2 = vpop.f32.mrf.mxu0 }
 0x345   : > { %v3328_v58 = vadd.f32 %v3251_v2, %v3194_v22 }
 0x346   : > { %v2995_v21 = vpop.f32.mrf.mxu2 }
 0x347   : > { %3979 = vmatmul.msk.bf16.gmra.mxu0 %vm1850_vm1, %v2907_v52  ;;  %v3364_v34 = vadd.f32 %v6265_v9, %v3328_v58  ;;  %v2832_v52 = vadd.f32 %v2758_v17, %v6090_v16  ;;  %v2833_v17 = vadd.f32 %v2760_v48, %v6101_v30  ;;  %v2887_v30 = vld [vmem:[#allocation2 + $0x142] sm:$0xff] }
 0x349   : > { %v3396_v32 = vpack.c.bf16 %v3364_v34, %v3364_v34  ;;  %v3464_v56 = vsel %vm3460_vm6, %v3364_v34, 0.0  ;;  %v3536_v0 = vmul.f32 %v3364_v34, %v3364_v34  ;;  %v3062_v10 = vadd.f32 %v2988_v31, %v2832_v52  ;;  %v2886_v52 = vld [vmem:[#allocation2 + $0x13a] sm:$0xff] }
 0x34a   : > { %v3465_v29 = vadd.f32 %v3464_v56, %v3463_v57  ;;  %v3063_v56 = vadd.f32 %v2990_v41, %v2833_v17 }
 0x34b   : > { %3429 = vst.msk [vmem:[%s4315_s16 + $0x8] sm:$0xf] %vm3426_vm5, %v3396_v32  ;;  %v3569_v60 = vsel %vm3460_vm6, %v3536_v0, 0.0  ;;  %v3196_v2 = vadd.f32 %v3122_v1, %v3062_v10  ;;  %v6300_v34 = vpop.f32.mrf.mxu1  ;;  %3938 = vmatmul.msk.bf16.gmra.mxu2 %vm1850_vm1, %v2908_v27 }
 0x34c   : > { %v3124_v62 = vpop.f32.mrf.mxu3  ;;  %v3570_v22 = vadd.f32 %v3569_v60, %v3568_v40  ;;  %v3253_v44 = vpop.f32.mrf.mxu0 }
 0x34d   : > { %v3329_v38 = vadd.f32 %v3253_v44, %v3195_v24  ;;  %v3197_v7 = vadd.f32 %v3124_v62, %v3063_v56  ;;  %3917 = vmatmul.msk.bf16.gmra.mxu1 %vm1850_vm1, %v6144_v6  ;;  %v2834_v44 = vadd.f32 %v6280_v5, %v6106_v42  ;;  %v2909_v62 = vpack.c.bf16 %v2887_v30, %v2886_v52  ;;  %v2888_v52 = vld [vmem:[#allocation2 + $0x152] sm:$0xff] }
 0x34e   : > { %v2998_v0 = vpop.f32.mrf.mxu2  ;;  %v2835_v5 = vadd.f32 %v2765_v59, %v6117_v43  ;;  %v2889_v43 = vld [vmem:[#allocation2 + $0x15a] sm:$0xff] }
 0x34f   : > { %v3365_v57 = vadd.f32 %v6265_v9, %v3329_v38 }
 0x350   : > { %v3065_v56 = vadd.f32 %v2995_v21, %v2835_v5 }
 0x351   : > { %3959 = vmatmul.msk.bf16.gmra.mxu3 %vm1850_vm1, %v2908_v27  ;;  %v3397_v36 = vpack.c.bf16 %v3365_v57, %v3365_v57  ;;  %v3466_v47 = vsel %vm3460_vm6, %v3365_v57, 0.0  ;;  %v3537_v13 = vmul.f32 %v3365_v57, %v3365_v57  ;;  %v3064_v57 = vadd.f32 %v2993_v3, %v2834_v44 }
 0x352   : > { %v3467_v58 = vadd.f32 %v3466_v47, %v3465_v29 }
 0x353   : > { %3430 = vst.msk [vmem:[%s4315_s16 + $0xc] sm:$0xf] %vm3426_vm5, %v3397_v36  ;;  %v3571_v16 = vsel %vm3460_vm6, %v3537_v13, 0.0 }
 0x354   : > { %v3127_v49 = vpop.f32.mrf.mxu3  ;;  %v3572_v31 = vadd.f32 %v3571_v16, %v3570_v22  ;;  %v3256_v40 = vpop.f32.mrf.mxu0 }
 0x355   : > { %v3330_v32 = vadd.f32 %v3256_v40, %v3196_v2  ;;  %v2770_v22 = vpop.f32.mrf.mxu1 }
 0x356   : > { %v3000_v47 = vpop.f32.mrf.mxu2 }
 0x357   : > { %3980 = vmatmul.msk.bf16.gmra.mxu0 %vm1850_vm1, %v2908_v27  ;;  %v3366_v1 = vadd.f32 %v6265_v9, %v3330_v32 }
 0x359   : > { %v3398_v24 = vpack.c.bf16 %v3366_v1, %v3366_v1  ;;  %v3468_v29 = vsel %vm3460_vm6, %v3366_v1, 0.0  ;;  %v3538_v26 = vmul.f32 %v3366_v1, %v3366_v1 }
 0x35a   : > { %v3469_v60 = vadd.f32 %v3468_v29, %v3467_v58  ;;  %v3198_v58 = vadd.f32 %v3127_v49, %v3064_v57 }
 0x35b   : > { %3431 = vst.msk [vmem:[%s4315_s16 + $0x10] sm:$0xf] %vm3426_vm5, %v3398_v24  ;;  %v3573_v41 = vsel %vm3460_vm6, %v3538_v26, 0.0  ;;  %3939 = vmatmul.msk.bf16.gmra.mxu2 %vm1850_vm1, %v2909_v62 }
 0x35c   : > { %v3129_v48 = vpop.f32.mrf.mxu3  ;;  %v3574_v38 = vadd.f32 %v3573_v41, %v3572_v31  ;;  %v3258_v27 = vpop.f32.mrf.mxu0  ;;  %v2836_v41 = vadd.f32 %v6300_v34, %v6122_v25  ;;  %v2837_v34 = vadd.f32 %v2770_v22, %v6131_v28  ;;  %v2891_v28 = vld [vmem:[#allocation2 + $0x172] sm:$0xff] }
 0x35d   : > { %v3331_v10 = vadd.f32 %v3258_v27, %v3197_v7  ;;  %v2773_v40 = vpop.f32.mrf.mxu1  ;;  %v3199_v7 = vadd.f32 %v3129_v48, %v3065_v56  ;;  %3918 = vmatmul.msk.bf16.gmra.mxu1 %vm1850_vm1, %v6163_v39  ;;  %v2910_v48 = vpack.c.bf16 %v2889_v43, %v2888_v52 }
 0x35e   : > { %v3003_v1 = vpop.f32.mrf.mxu2 }
 0x35f   : > { %v3367_v36 = vadd.f32 %v6265_v9, %v3331_v10  ;;  %v3066_v10 = vadd.f32 %v2998_v0, %v2836_v41 }
 0x361   : > { %3960 = vmatmul.msk.bf16.gmra.mxu3 %vm1850_vm1, %v2909_v62  ;;  %v3399_v13 = vpack.c.bf16 %v3367_v36, %v3367_v36  ;;  %v3470_v6 = vsel %vm3460_vm6, %v3367_v36, 0.0  ;;  %v3539_v2 = vmul.f32 %v3367_v36, %v3367_v36 }
 0x362   : > { %v3471_v16 = vadd.f32 %v3470_v6, %v3469_v60 }
 0x363   : > { %3432 = vst.msk [vmem:[%s4315_s16 + $0x14] sm:$0xf] %vm3426_vm5, %v3399_v13  ;;  %v3575_v42 = vsel %vm3460_vm6, %v3539_v2, 0.0 }
 0x364   : > { %v3132_v17 = vpop.f32.mrf.mxu3  ;;  %v3576_v3 = vadd.f32 %v3575_v42, %v3574_v38  ;;  %v3261_v31 = vpop.f32.mrf.mxu0 }
 0x365   : > { %v3332_v32 = vadd.f32 %v3261_v31, %v3198_v58  ;;  %v2775_v30 = vpop.f32.mrf.mxu1  ;;  %v3200_v6 = vadd.f32 %v3132_v17, %v3066_v10 }
 0x366   : > { %v3005_v57 = vpop.f32.mrf.mxu2 }
 0x367   : > { %3981 = vmatmul.msk.bf16.gmra.mxu0 %vm1850_vm1, %v2909_v62  ;;  %v3368_v49 = vadd.f32 %v6265_v9, %v3332_v32 }
 0x369   : > { %v3400_v24 = vpack.c.bf16 %v3368_v49, %v3368_v49  ;;  %v3472_v29 = vsel %vm3460_vm6, %v3368_v49, 0.0  ;;  %v3540_v26 = vmul.f32 %v3368_v49, %v3368_v49 }
 0x36a   : > { %v3473_v60 = vadd.f32 %v3472_v29, %v3471_v16 }
 0x36b   : > { %3433 = vst.msk [vmem:[%s4315_s16 + $0x18] sm:$0xf] %vm3426_vm5, %v3400_v24  ;;  %v3577_v21 = vsel %vm3460_vm6, %v3540_v26, 0.0  ;;  %3940 = vmatmul.msk.bf16.gmra.mxu2 %vm1850_vm1, %v2910_v48  ;;  %v2890_v26 = vld [vmem:[#allocation2 + $0x16a] sm:$0xff] }
 0x36c   : > { %v3134_v59 = vpop.f32.mrf.mxu3  ;;  %v3578_v44 = vadd.f32 %v3577_v21, %v3576_v3  ;;  %v3263_v38 = vpop.f32.mrf.mxu0  ;;  %v3067_v3 = vadd.f32 %v3000_v47, %v2837_v34  ;;  %v2911_v41 = vpack.c.bf16 %v2891_v28, %v2890_v26 }
 0x36d   : > { %v3333_v27 = vadd.f32 %v3263_v38, %v3199_v7  ;;  %v6338_v16 = vpop.f32.mrf.mxu1 }
 0x36e   : > { %v3008_v31 = vpop.f32.mrf.mxu2  ;;  %v3201_v24 = vadd.f32 %v3134_v59, %v3067_v3  ;;  %v2840_v26 = vadd.f32 %v6338_v16, %v6152_v51 }
 0x36f   : > { %v3369_v62 = vadd.f32 %v6265_v9, %v3333_v27 }
 0x371   : > { %3961 = vmatmul.msk.bf16.gmra.mxu3 %vm1850_vm1, %v2910_v48  ;;  %v3401_v36 = vpack.c.bf16 %v3369_v62, %v3369_v62  ;;  %v3474_v39 = vsel %vm3460_vm6, %v3369_v62, 0.0  ;;  %v3541_v13 = vmul.f32 %v3369_v62, %v3369_v62 }
 0x372   : > { %v3475_v2 = vadd.f32 %v3474_v39, %v3473_v60  ;;  %v2838_v60 = vadd.f32 %v2773_v40, %v6137_v19  ;;  %v2396_v19 = vld [vmem:[#allocation2 + $0x199] sm:$0xff]  ;;  %v2397_v40 = vld [vmem:[#allocation2 + $0x1a1] sm:$0xff] }
 0x373   : > { %3434 = vst.msk [vmem:[%s4315_s16 + $0x1c] sm:$0xf] %vm3426_vm5, %v3401_v36  ;;  %v3579_v25 = vsel %vm3460_vm6, %v3541_v13, 0.0 }
 0x374   : > { %v3137_v58 = vpop.f32.mrf.mxu3  ;;  %v3580_v0 = vadd.f32 %v3579_v25, %v3578_v44  ;;  %v3266_v42 = vpop.f32.mrf.mxu0  ;;  %v3068_v44 = vadd.f32 %v3003_v1, %v2838_v60  ;;  %v2839_v1 = vadd.f32 %v2775_v30, %v6146_v20 }
 0x375   : > { %v3334_v5 = vadd.f32 %v3266_v42, %v3200_v6  ;;  %v6348_v7 = vpop.f32.mrf.mxu1 }
 0x376   : > { %v3010_v38 = vpop.f32.mrf.mxu2  ;;  %v3202_v62 = vadd.f32 %v3137_v58, %v3068_v44  ;;  %v3069_v42 = vadd.f32 %v3005_v57, %v2839_v1  ;;  %v2841_v16 = vadd.f32 %v6348_v7, %v6159_v33 }
 0x377   : > { %3982 = vmatmul.msk.bf16.gmra.mxu0 %vm1850_vm1, %v2910_v48  ;;  %v3370_v17 = vadd.f32 %v6265_v9, %v3334_v5 }
 0x379   : > { %v3402_v32 = vpack.c.bf16 %v3370_v17, %v3370_v17  ;;  %v3476_v56 = vsel %vm3460_vm6, %v3370_v17, 0.0  ;;  %v3542_v49 = vmul.f32 %v3370_v17, %v3370_v17 }
 0x37a   : > { %v3477_v29 = vadd.f32 %v3476_v56, %v3475_v2  ;;  %v2726_v2 = vpack.c.bf16 %v2397_v40, %v2396_v19  ;;  %v2892_v56 = vld [vmem:[#allocation2 + $0x182] sm:$0xff]  ;;  %v3071_v40 = vadd.f32 %v3010_v38, %v2841_v16 }
 0x37b   : > { %3435 = vst.msk [vmem:[%s4315_s16 + $0x20] sm:$0xf] %vm3426_vm5, %v3402_v32  ;;  %v3581_v47 = vsel %vm3460_vm6, %v3542_v49, 0.0  ;;  %3941 = vmatmul.msk.bf16.gmra.mxu2 %vm1850_vm1, %v2911_v41  ;;  %v2893_v49 = vld [vmem:[#allocation2 + $0x18a] sm:$0xff] }
 0x37c   : > { %v3139_v22 = vpop.f32.mrf.mxu3  ;;  %v3582_v52 = vadd.f32 %v3581_v47, %v3580_v0  ;;  %v3268_v43 = vpop.f32.mrf.mxu0  ;;  %3919 = vmatmul.msk.bf16.gmra.mxu1 %vm1850_vm1, %v2726_v2 }
 0x37d   : > { %v3335_v21 = vadd.f32 %v3268_v43, %v3201_v24  ;;  %v2783_v13 = vpop.f32.mrf.mxu1  ;;  %v3203_v20 = vadd.f32 %v3139_v22, %v3069_v42  ;;  %v3070_v43 = vadd.f32 %v3008_v31, %v2840_v26 }
 0x37e   : > { %v3013_v5 = vpop.f32.mrf.mxu2  ;;  %v2842_v7 = vadd.f32 %v2783_v13, %v6166_v53 }
 0x37f   : > { %v3371_v59 = vadd.f32 %v6265_v9, %v3335_v21 }
 0x381   : > { %3962 = vmatmul.msk.bf16.gmra.mxu3 %vm1850_vm1, %v2911_v41  ;;  %v3403_v27 = vpack.c.bf16 %v3371_v59, %v3371_v59  ;;  %v3478_v48 = vsel %vm3460_vm6, %v3371_v59, 0.0  ;;  %v3543_v10 = vmul.f32 %v3371_v59, %v3371_v59 }
 0x382   : > { %v3479_v36 = vadd.f32 %v3478_v48, %v3477_v29 }
 0x383   : > { %3436 = vst.msk [vmem:[%s4315_s16 + $0x24] sm:$0xf] %vm3426_vm5, %v3403_v27  ;;  %v3583_v6 = vsel %vm3460_vm6, %v3543_v10, 0.0 }
 0x384   : > { %v3142_v39 = vpop.f32.mrf.mxu3  ;;  %v3584_v25 = vadd.f32 %v3583_v6, %v3582_v52  ;;  %v3271_v34 = vpop.f32.mrf.mxu0  ;;  %v3090_v52 = vpack.c.bf16 %v2893_v49, %v2892_v56  ;;  %v2895_v56 = vld [vmem:[#allocation2 + $0x1a2] sm:$0xff] }
 0x385   : > { %v3336_v0 = vadd.f32 %v3271_v34, %v3202_v62  ;;  %v2785_v29 = vpop.f32.mrf.mxu1  ;;  %v3204_v27 = vadd.f32 %v3142_v39, %v3070_v43 }
 0x386   : > { %v3015_v21 = vpop.f32.mrf.mxu2 }
 0x387   : > { %3983 = vmatmul.msk.bf16.gmra.mxu0 %vm1850_vm1, %v2911_v41  ;;  %v3372_v58 = vadd.f32 %v6265_v9, %v3336_v0 }
 0x389   : > { %v3404_v3 = vpack.c.bf16 %v3372_v58, %v3372_v58  ;;  %v3480_v17 = vsel %vm3460_vm6, %v3372_v58, 0.0  ;;  %v3544_v32 = vmul.f32 %v3372_v58, %v3372_v58 }
 0x38a   : > { %v3481_v30 = vadd.f32 %v3480_v17, %v3479_v36 }
 0x38b   : > { %3437 = vst.msk [vmem:[%s4315_s16 + $0x28] sm:$0xf] %vm3426_vm5, %v3404_v3  ;;  %v3585_v57 = vsel %vm3460_vm6, %v3544_v32, 0.0  ;;  %v3072_v32 = vadd.f32 %v3013_v5, %v2842_v7  ;;  %v2843_v5 = vadd.f32 %v2785_v29, %v6173_v37 }
 0x38c   : > { %v3144_v24 = vpop.f32.mrf.mxu3  ;;  %v3586_v28 = vadd.f32 %v3585_v57, %v3584_v25  ;;  %v3273_v47 = vpop.f32.mrf.mxu0 }
 0x38d   : > { %v3337_v60 = vadd.f32 %v3273_v47, %v3203_v20  ;;  %v2788_v62 = vpop.f32.mrf.mxu1  ;;  %v3205_v34 = vadd.f32 %v3144_v24, %v3071_v40 }
 0x38e   : > { %v3018_v39 = vpop.f32.mrf.mxu2  ;;  %v2844_v29 = vadd.f32 %v2788_v62, %v6178_v15 }
 0x38f   : > { %v3373_v22 = vadd.f32 %v6265_v9, %v3337_v60 }
 0x391   : > { %3963 = vmatmul.msk.bf16.gmra.mxu3 %vm1850_vm1, %v3090_v52  ;;  %v3405_v41 = vpack.c.bf16 %v3373_v22, %v3373_v22  ;;  %v3482_v44 = vsel %vm3460_vm6, %v3373_v22, 0.0  ;;  %v3545_v59 = vmul.f32 %v3373_v22, %v3373_v22 }
 0x392   : > { %v3483_v48 = vadd.f32 %v3482_v44, %v3481_v30  ;;  %v2894_v30 = vld [vmem:[#allocation2 + $0x19a] sm:$0xff]  ;;  %v3073_v44 = vadd.f32 %v3015_v21, %v2843_v5 }
 0x393   : > { %3438 = vst.msk [vmem:[%s4315_s16 + $0x2c] sm:$0xf] %vm3426_vm5, %v3405_v41  ;;  %v3587_v51 = vsel %vm3460_vm6, %v3545_v59, 0.0  ;;  %v3224_v13 = vpack.c.bf16 %v2895_v56, %v2894_v30 }
 0x394   : > { %v3147_v10 = vpop.f32.mrf.mxu3  ;;  %v3588_v31 = vadd.f32 %v3587_v51, %v3586_v28  ;;  %v3276_v36 = vpop.f32.mrf.mxu0 }
 0x395   : > { %v3338_v19 = vadd.f32 %v3276_v36, %v3204_v27  ;;  %v2790_v58 = vpop.f32.mrf.mxu1  ;;  %v3206_v28 = vadd.f32 %v3147_v10, %v3072_v32 }
 0x396   : > { %v3020_v49 = vpop.f32.mrf.mxu2  ;;  %v2845_v62 = vadd.f32 %v2790_v58, %v6184_v45 }
 0x397   : > { %3984 = vmatmul.msk.bf16.gmra.mxu0 %vm1850_vm1, %v3090_v52  ;;  %v3374_v6 = vadd.f32 %v6265_v9, %v3338_v19 }
 0x399   : > { %v3406_v1 = vpack.c.bf16 %v3374_v6, %v3374_v6  ;;  %v3484_v2 = vsel %vm3460_vm6, %v3374_v6, 0.0  ;;  %v3546_v25 = vmul.f32 %v3374_v6, %v3374_v6 }
 0x39a   : > { %v3485_v0 = vadd.f32 %v3484_v2, %v3483_v48 }
 0x39b   : > { %3439 = vst.msk [vmem:[%s4315_s16 + $0x30] sm:$0xf] %vm3426_vm5, %v3406_v1  ;;  %v3589_v33 = vsel %vm3460_vm6, %v3546_v25, 0.0  ;;  %v3074_v1 = vadd.f32 %v3018_v39, %v2844_v29 }
 0x39c   : > { %v3149_v42 = vpop.f32.mrf.mxu3  ;;  %v3590_v38 = vadd.f32 %v3589_v33, %v3588_v31  ;;  %v3278_v3 = vpop.f32.mrf.mxu0 }
 0x39d   : > { %v3339_v17 = vadd.f32 %v3278_v3, %v3205_v34  ;;  %v2793_v52 = vpop.f32.mrf.mxu1  ;;  %v3207_v16 = vadd.f32 %v3149_v42, %v3073_v44 }
 0x39e   : > { %v3023_v27 = vpop.f32.mrf.mxu2  ;;  %v2846_v45 = vadd.f32 %v2793_v52, %v6189_v50 }
 0x39f   : > { %v3375_v20 = vadd.f32 %v6265_v9, %v3339_v17 }
 0x3a1   : > { %v3407_v24 = vpack.c.bf16 %v3375_v20, %v3375_v20  ;;  %v3486_v57 = vsel %vm3460_vm6, %v3375_v20, 0.0  ;;  %v3547_v26 = vmul.f32 %v3375_v20, %v3375_v20  ;;  %v3075_v20 = vadd.f32 %v3020_v49, %v2845_v62 }
 0x3a2   : > { %v3487_v47 = vadd.f32 %v3486_v57, %v3485_v0 }
 0x3a3   : > { %3440 = vst.msk [vmem:[%s4315_s16 + $0x34] sm:$0xf] %vm3426_vm5, %v3407_v24  ;;  %v3591_v53 = vsel %vm3460_vm6, %v3547_v26, 0.0 }
 0x3a4   : > { %v3152_v60 = vpop.f32.mrf.mxu3  ;;  %v3592_v43 = vadd.f32 %v3591_v53, %v3590_v38  ;;  %v3281_v22 = vpop.f32.mrf.mxu0 }
 0x3a5   : > { %v3340_v41 = vadd.f32 %v3281_v22, %v3206_v28  ;;  %v2795_v19 = vpop.f32.mrf.mxu1  ;;  %v3208_v33 = vadd.f32 %v3152_v60, %v3074_v1 }
 0x3a6   : > { %v3025_v25 = vpop.f32.mrf.mxu2  ;;  %v2847_v52 = vadd.f32 %v2795_v19, %v6195_v12 }
 0x3a7   : > { %3985 = vmatmul.msk.bf16.gmra.mxu0 %vm1850_vm1, %v3224_v13  ;;  %v3376_v59 = vadd.f32 %v6265_v9, %v3340_v41  ;;  %vm3531_vm1 = vcmask 253952  }
 0x3a9   : > { %v3408_v48 = vpack.c.bf16 %v3376_v59, %v3376_v59  ;;  %v3488_v10 = vsel %vm3460_vm6, %v3376_v59, 0.0  ;;  %v3548_v51 = vmul.f32 %v3376_v59, %v3376_v59 }
 0x3aa   : > { %v3489_v31 = vadd.f32 %v3488_v10, %v3487_v47 }
 0x3ab   : > { %3441 = vst.msk [vmem:[%s4315_s16 + $0x38] sm:$0xf] %vm3426_vm5, %v3408_v48  ;;  %v3593_v37 = vsel %vm3460_vm6, %v3548_v51, 0.0 }
 0x3ac   : > { %v3154_v36 = vpop.f32.mrf.mxu3  ;;  %v3594_v21 = vadd.f32 %v3593_v37, %v3592_v43  ;;  %v3283_v40 = vpop.f32.mrf.mxu0  ;;  %v3076_v43 = vadd.f32 %v3023_v27, %v2846_v45  ;;  %v3077_v37 = vadd.f32 %v3025_v25, %v2847_v52 }
 0x3ad   : > { %v3341_v6 = vadd.f32 %v3283_v40, %v3207_v16  ;;  %v2798_v3 = vpop.f32.mrf.mxu1  ;;  %v3209_v28 = vadd.f32 %v3154_v36, %v3075_v20 }
 0x3ae   : > { %v3028_v56 = vpop.f32.mrf.mxu2  ;;  %v2848_v19 = vadd.f32 %v2798_v3, %v6200_v54 }
 0x3af   : > { %v3377_v2 = vadd.f32 %v6265_v9, %v3341_v6 }
 0x3b1   : > { %v3409_v34 = vpack.c.bf16 %v3377_v2, %v3377_v2  ;;  %v3490_v0 = vsel %vm3460_vm6, %v3377_v2, 0.0  ;;  %v3549_v42 = vmul.f32 %v3377_v2, %v3377_v2 }
 0x3b2   : > { %v3491_v7 = vadd.f32 %v3490_v0, %v3489_v31 }
 0x3b3   : > { %3442 = vst.msk [vmem:[%s4315_s16 + $0x3c] sm:$0xf] %vm3426_vm5, %v3409_v34  ;;  %v3595_v15 = vsel %vm3460_vm6, %v3549_v42, 0.0 }
 0x3b4   : > { %v3157_v38 = vpop.f32.mrf.mxu3  ;;  %v3596_v17 = vadd.f32 %v3595_v15, %v3594_v21  ;;  %v3286_v39 = vpop.f32.mrf.mxu0 }
 0x3b5   : > { %v3342_v32 = vadd.f32 %v3286_v39, %v3208_v33  ;;  %v2800_v49 = vpop.f32.mrf.mxu1  ;;  %v3210_v10 = vadd.f32 %v3157_v38, %v3076_v43  ;;  %v3078_v38 = vadd.f32 %v3028_v56, %v2848_v19 }
 0x3b6   : > { %v3030_v41 = vpop.f32.mrf.mxu2  ;;  %v2849_v3 = vadd.f32 %v2800_v49, %v6206_v18 }
 0x3b7   : > { %v3378_v30 = vadd.f32 %v6265_v9, %v3342_v32 }
 0x3b9   : > { %v3410_v24 = vpack.c.bf16 %v3378_v30, %v3378_v30  ;;  %v3492_v57 = vsel %vm3460_vm6, %v3378_v30, 0.0  ;;  %v3550_v26 = vmul.f32 %v3378_v30, %v3378_v30 }
 0x3ba   : > { %v3493_v47 = vadd.f32 %v3492_v57, %v3491_v7 }
 0x3bb   : > { %3443 = vst.msk [vmem:[%s4315_s16 + $0x40] sm:$0xf] %vm3426_vm5, %v3410_v24  ;;  %v3597_v53 = vsel %vm3460_vm6, %v3550_v26, 0.0 }
 0x3bc   : > { %v3159_v60 = vpop.f32.mrf.mxu3  ;;  %v3598_v58 = vadd.f32 %v3597_v53, %v3596_v17  ;;  %v3288_v13 = vpop.f32.mrf.mxu0 }
 0x3bd   : > { %v3343_v5 = vadd.f32 %v3288_v13, %v3209_v28  ;;  %v2803_v29 = vpop.f32.mrf.mxu1  ;;  %v3211_v34 = vadd.f32 %v3159_v60, %v3077_v37 }
 0x3be   : > { %v3033_v40 = vpop.f32.mrf.mxu2  ;;  %v2850_v18 = vadd.f32 %v2803_v29, %v6211_v55 }
 0x3bf   : > { %v3379_v22 = vadd.f32 %v6265_v9, %v3343_v5 }
 0x3c1   : > { %v3411_v44 = vpack.c.bf16 %v3379_v22, %v3379_v22  ;;  %v3494_v59 = vsel %vm3460_vm6, %v3379_v22, 0.0  ;;  %v3551_v48 = vmul.f32 %v3379_v22, %v3379_v22 }
 0x3c2   : > { %v3495_v51 = vadd.f32 %v3494_v59, %v3493_v47  ;;  %v3079_v47 = vadd.f32 %v3030_v41, %v2849_v3 }
 0x3c3   : > { %3444 = vst.msk [vmem:[%s4315_s16 + $0x44] sm:$0xf] %vm3426_vm5, %v3411_v44  ;;  %v3599_v50 = vsel %vm3460_vm6, %v3551_v48, 0.0 }
 0x3c4   : > { %v3162_v16 = vpop.f32.mrf.mxu3  ;;  %v3600_v31 = vadd.f32 %v3599_v50, %v3598_v58  ;;  %v3291_v36 = vpop.f32.mrf.mxu0 }
 0x3c5   : > { %v3344_v27 = vadd.f32 %v3291_v36, %v3210_v10  ;;  %v2805_v62 = vpop.f32.mrf.mxu1  ;;  %v3212_v20 = vadd.f32 %v3162_v16, %v3078_v38  ;;  %v3080_v10 = vadd.f32 %v3033_v40, %v2850_v18 }
 0x3c6   : > { %v3035_v57 = vpop.f32.mrf.mxu2  ;;  %v2851_v55 = vadd.f32 %v2805_v62, %v6217_v4 }
 0x3c7   : > { %v3380_v21 = vadd.f32 %v6265_v9, %v3344_v27 }
 0x3c9   : > { %v3412_v6 = vpack.c.bf16 %v3380_v21, %v3380_v21  ;;  %v3496_v1 = vsel %vm3460_vm6, %v3380_v21, 0.0  ;;  %v3552_v2 = vmul.f32 %v3380_v21, %v3380_v21 }
 0x3ca   : > { %v3497_v0 = vadd.f32 %v3496_v1, %v3495_v51  ;;  %v3081_v1 = vadd.f32 %v3035_v57, %v2851_v55 }
 0x3cb   : > { %3445 = vst.msk [vmem:[%s4315_s16 + $0x48] sm:$0xf] %vm3426_vm5, %v3412_v6  ;;  %v3601_v12 = vsel %vm3460_vm6, %v3552_v2, 0.0 }
 0x3cc   : > { %v3164_v42 = vpop.f32.mrf.mxu3  ;;  %v3602_v33 = vadd.f32 %v3601_v12, %v3600_v31  ;;  %v3293_v25 = vpop.f32.mrf.mxu0 }
 0x3cd   : > { %v3345_v7 = vadd.f32 %v3293_v25, %v3211_v34  ;;  %v3213_v13 = vadd.f32 %v3164_v42, %v3079_v47  ;;  %v2808_v22 = vpop.f32.mrf.mxu1 }
 0x3ce   : > { %v3038_v41 = vpop.f32.mrf.mxu2  ;;  %v2852_v4 = vadd.f32 %v2808_v22, %v6222_v14 }
 0x3cf   : > { %v3381_v15 = vadd.f32 %v6265_v9, %v3345_v7 }
 0x3d1   : > { %v3413_v17 = vpack.c.bf16 %v3381_v15, %v3381_v15  ;;  %v3498_v39 = vsel %vm3460_vm6, %v3381_v15, 0.0  ;;  %v3553_v32 = vmul.f32 %v3381_v15, %v3381_v15 }
 0x3d2   : > { %v3499_v30 = vadd.f32 %v3498_v39, %v3497_v0 }
 0x3d3   : > { %3446 = vst.msk [vmem:[%s4315_s16 + $0x4c] sm:$0xf] %vm3426_vm5, %v3413_v17  ;;  %v3603_v54 = vsel %vm3460_vm6, %v3553_v32, 0.0  ;;  %v3082_v17 = vadd.f32 %v3038_v41, %v2852_v4 }
 0x3d4   : > { %v3167_v24 = vpop.f32.mrf.mxu3  ;;  %v3604_v26 = vadd.f32 %v3603_v54, %v3602_v33  ;;  %v3296_v56 = vpop.f32.mrf.mxu0 }
 0x3d5   : > { %v3346_v28 = vadd.f32 %v3296_v56, %v3212_v20  ;;  %v3214_v31 = vadd.f32 %v3167_v24, %v3080_v10  ;;  %v2810_v6 = vpop.f32.mrf.mxu1 }
 0x3d6   : > { %v3040_v2 = vpop.f32.mrf.mxu2 }
 0x3d7   : > { %v3382_v60 = vadd.f32 %v6265_v9, %v3346_v28 }
 0x3d9   : > { %v3414_v53 = vpack.c.bf16 %v3382_v60, %v3382_v60  ;;  %v3500_v45 = vsel %vm3460_vm6, %v3382_v60, 0.0  ;;  %v3554_v58 = vmul.f32 %v3382_v60, %v3382_v60 }
 0x3da   : > { %v3501_v5 = vadd.f32 %v3500_v45, %v3499_v30 }
 0x3db   : > { %3447 = vst.msk [vmem:[%s4315_s16 + $0x50] sm:$0xf] %vm3426_vm5, %v3414_v53  ;;  %v3605_v44 = vsel %vm3460_vm6, %v3554_v58, 0.0 }
 0x3dc   : > { %v3169_v43 = vpop.f32.mrf.mxu3  ;;  %v3606_v49 = vadd.f32 %v3605_v44, %v3604_v26  ;;  %v3298_v59 = vpop.f32.mrf.mxu0  ;;  %v2853_v26 = vadd.f32 %v2810_v6, %v6228_v8 }
 0x3dd   : > { %v3347_v48 = vadd.f32 %v3298_v59, %v3213_v13  ;;  %v3215_v19 = vadd.f32 %v3169_v43, %v3081_v1  ;;  %v2813_v39 = vpop.f32.mrf.mxu1 }
 0x3de   : > { %v3043_v20 = vpop.f32.mrf.mxu2  ;;  %v3083_v60 = vadd.f32 %v3040_v2, %v2853_v26 }
 0x3df   : > { %v3383_v51 = vadd.f32 %v6265_v9, %v3347_v48 }
 0x3e1   : > { %v3415_v16 = vpack.c.bf16 %v3383_v51, %v3383_v51  ;;  %v3502_v50 = vsel %vm3460_vm6, %v3383_v51, 0.0  ;;  %v3555_v52 = vmul.f32 %v3383_v51, %v3383_v51 }
 0x3e2   : > { %v3503_v36 = vadd.f32 %v3502_v50, %v3501_v5 }
 0x3e3   : > { %3448 = vst.msk [vmem:[%s4315_s16 + $0x54] sm:$0xf] %vm3426_vm5, %v3415_v16  ;;  %v3607_v37 = vsel %vm3460_vm6, %v3555_v52, 0.0 }
 0x3e4   : > { %v3172_v27 = vpop.f32.mrf.mxu3  ;;  %v3608_v29 = vadd.f32 %v3607_v37, %v3606_v49  ;;  %v3301_v21 = vpop.f32.mrf.mxu0  ;;  %v2854_v49 = vadd.f32 %v2813_v39, %v6233_v23 }
 0x3e5   : > { %v3348_v40 = vadd.f32 %v3301_v21, %v3214_v31  ;;  %v3216_v54 = vadd.f32 %v3172_v27, %v3082_v17  ;;  %v2815_v58 = vpop.f32.mrf.mxu1 }
 0x3e6   : > { %v3045_v18 = vpop.f32.mrf.mxu2  ;;  %v3084_v10 = vadd.f32 %v3043_v20, %v2854_v49  ;;  %v2855_v23 = vadd.f32 %v2815_v58, %v6239_v35 }
 0x3e7   : > { %v3384_v34 = vadd.f32 %v6265_v9, %v3348_v40 }
 0x3e8   : > { %v3085_v1 = vadd.f32 %v3045_v18, %v2855_v23 }
 0x3e9   : > { %v3416_v0 = vpack.c.bf16 %v3384_v34, %v3384_v34  ;;  %v3504_v42 = vsel %vm3460_vm6, %v3384_v34, 0.0  ;;  %v3556_v12 = vmul.f32 %v3384_v34, %v3384_v34 }
 0x3ea   : > { %v3505_v33 = vadd.f32 %v3504_v42, %v3503_v36 }
 0x3eb   : > { %3449 = vst.msk [vmem:[%s4315_s16 + $0x58] sm:$0xf] %vm3426_vm5, %v3416_v0  ;;  %v3609_v25 = vsel %vm3460_vm6, %v3556_v12, 0.0 }
 0x3ec   : > { %v3610_v7 = vadd.f32 %v3609_v25, %v3608_v29  ;;  %v3303_v38 = vpop.f32.mrf.mxu0  ;;  %v3174_v15 = vpop.f32.mrf.mxu3 }
 0x3ed   : > { %v3349_v62 = vadd.f32 %v3303_v38, %v3215_v19  ;;  %v3217_v22 = vadd.f32 %v3174_v15, %v3083_v60  ;;  %v2818_v37 = vpop.f32.mrf.mxu1 }
 0x3ee   : > { %v3048_v6 = vpop.f32.mrf.mxu2  ;;  %v2856_v35 = vadd.f32 %v2818_v37, %v6244_v46 }
 0x3ef   : > { %v3385_v32 = vadd.f32 %v6265_v9, %v3349_v62 }
 0x3f0   : > { %v3086_v62 = vadd.f32 %v3048_v6, %v2856_v35 }
 0x3f1   : > { %v3417_v30 = vpack.c.bf16 %v3385_v32, %v3385_v32  ;;  %v3506_v24 = vsel %vm3460_vm6, %v3385_v32, 0.0  ;;  %v3557_v57 = vmul.f32 %v3385_v32, %v3385_v32 }
 0x3f2   : > { %v3507_v3 = vadd.f32 %v3506_v24, %v3505_v33 }
 0x3f3   : > { %3450 = vst.msk [vmem:[%s4315_s16 + $0x5c] sm:$0xf] %vm3426_vm5, %v3417_v30  ;;  %v3611_v14 = vsel %vm3460_vm6, %v3557_v57, 0.0 }
 0x3f4   : > { %v3612_v56 = vadd.f32 %v3611_v14, %v3610_v7  ;;  %v3306_v28 = vpop.f32.mrf.mxu0  ;;  %v3177_v53 = vpop.f32.mrf.mxu3 }
 0x3f5   : > { %v3350_v47 = vadd.f32 %v3306_v28, %v3216_v54  ;;  %v3218_v36 = vadd.f32 %v3177_v53, %v3084_v10  ;;  %v2820_v38 = vpop.f32.mrf.mxu1 }
 0x3f6   : > { %v3050_v17 = vpop.f32.mrf.mxu2  ;;  %v2857_v46 = vadd.f32 %v2820_v38, %v6249_v11 }
 0x3f7   : > { %v3386_v45 = vadd.f32 %v6265_v9, %v3350_v47 }
 0x3f8   : > { %v3087_v28 = vadd.f32 %v3050_v17, %v2857_v46 }
 0x3f9   : > { %v3418_v13 = vpack.c.bf16 %v3386_v45, %v3386_v45  ;;  %v3508_v5 = vsel %vm3460_vm6, %v3386_v45, 0.0  ;;  %v3558_v43 = vmul.f32 %v3386_v45, %v3386_v45 }
 0x3fa   : > { %v3509_v44 = vadd.f32 %v3508_v5, %v3507_v3 }
 0x3fb   : > { %3451 = vst.msk [vmem:[%s4315_s16 + $0x60] sm:$0xf] %vm3426_vm5, %v3418_v13  ;;  %v3613_v8 = vsel %vm3460_vm6, %v3558_v43, 0.0 }
 0x3fc   : > { %v3614_v59 = vadd.f32 %v3613_v8, %v3612_v56  ;;  %v3308_v41 = vpop.f32.mrf.mxu0  ;;  %v3179_v16 = vpop.f32.mrf.mxu3 }
 0x3fd   : > { %v3351_v48 = vadd.f32 %v3308_v41, %v3217_v22  ;;  %v3219_v12 = vadd.f32 %v3179_v16, %v3085_v1  ;;  %v2823_v47 = vpop.f32.mrf.mxu1 }
 0x3fe   : > { %v3053_v53 = vpop.f32.mrf.mxu2  ;;  %v2858_v11 = vadd.f32 %v2823_v47, %v6253_v61 }
 0x3ff   : > { %v3387_v51 = vadd.f32 %v6265_v9, %v3351_v48 }
 0x400   : > { %v3088_v49 = vadd.f32 %v3053_v53, %v2858_v11 }
 0x401   : > { %v3419_v50 = vpack.c.bf16 %v3387_v51, %v3387_v51  ;;  %v3510_v52 = vsel %vm3460_vm6, %v3387_v51, 0.0  ;;  %v3559_v31 = vmul.f32 %v3387_v51, %v3387_v51 }
 0x402   : > { %v3511_v27 = vadd.f32 %v3510_v52, %v3509_v44 }
 0x403   : > { %3452 = vst.msk [vmem:[%s4315_s16 + $0x64] sm:$0xf] %vm3426_vm5, %v3419_v50  ;;  %v3615_v55 = vsel %vm3460_vm6, %v3559_v31, 0.0 }
 0x404   : > { %v3616_v29 = vadd.f32 %v3615_v55, %v3614_v59  ;;  %v3311_v21 = vpop.f32.mrf.mxu0  ;;  %v3182_v33 = vpop.f32.mrf.mxu3 }
 0x405   : > { %v3352_v40 = vadd.f32 %v3311_v21, %v3218_v36  ;;  %v3220_v24 = vadd.f32 %v3182_v33, %v3086_v62  ;;  %v2825_v48 = vpop.f32.mrf.mxu1 }
 0x406   : > { %v3055_v31 = vpop.f32.mrf.mxu2  ;;  %v2859_v36 = vadd.f32 %v2825_v48, %v6259_v63 }
 0x407   : > { %v3388_v2 = vadd.f32 %v6265_v9, %v3352_v40 }
 0x408   : > { %v3089_v23 = vadd.f32 %v3055_v31, %v2859_v36 }
 0x409   : > { %v3420_v34 = vpack.c.bf16 %v3388_v2, %v3388_v2  ;;  %v3512_v0 = vsel %vm3460_vm6, %v3388_v2, 0.0  ;;  %v3560_v42 = vmul.f32 %v3388_v2, %v3388_v2 }
 0x40a   : > { %v3513_v19 = vadd.f32 %v3512_v0, %v3511_v27 }
 0x40b   : > { %3453 = vst.msk [vmem:[%s4315_s16 + $0x68] sm:$0xf] %vm3426_vm5, %v3420_v34  ;;  %v3617_v25 = vsel %vm3460_vm6, %v3560_v42, 0.0 }
 0x40c   : > { %v3618_v4 = vadd.f32 %v3617_v25, %v3616_v29  ;;  %v3313_v7 = vpop.f32.mrf.mxu0  ;;  %v3184_v26 = vpop.f32.mrf.mxu3 }
 0x40d   : > { %v3353_v15 = vadd.f32 %v3313_v7, %v3219_v12  ;;  %v3221_v5 = vadd.f32 %v3184_v26, %v3087_v28 }
 0x40f   : > { %v3389_v39 = vadd.f32 %v6265_v9, %v3353_v15 }
 0x411   : > { %v3421_v32 = vpack.c.bf16 %v3389_v39, %v3389_v39  ;;  %v3514_v20 = vsel %vm3460_vm6, %v3389_v39, 0.0  ;;  %v3561_v30 = vmul.f32 %v3389_v39, %v3389_v39 }
 0x412   : > { %v3515_v57 = vadd.f32 %v3514_v20, %v3513_v19 }
 0x413   : > { %3454 = vst.msk [vmem:[%s4315_s16 + $0x6c] sm:$0xf] %vm3426_vm5, %v3421_v32  ;;  %v3619_v54 = vsel %vm3460_vm6, %v3561_v30, 0.0 }
 0x414   : > { %v3620_v3 = vadd.f32 %v3619_v54, %v3618_v4  ;;  %v3316_v14 = vpop.f32.mrf.mxu0  ;;  %v3187_v59 = vpop.f32.mrf.mxu3  ;;  %v3459_v54 = vld [vmem:[%s4305_s10] sm:$0x1] }
 0x415   : > { %v3354_v56 = vadd.f32 %v3316_v14, %v3220_v24  ;;  %v3222_v50 = vadd.f32 %v3187_v59, %v3088_v49  ;;  %v3533_v14 = vld [vmem:[%s4305_s10 + $0x1] sm:$0x1] }
 0x417   : > { %v3390_v60 = vadd.f32 %v6265_v9, %v3354_v56  ;;  %v4194_v9 = vld [vmem:[%s6522_s4] ss:$0 sm:$0xff] }
 0x419   : > { %v3422_v45 = vpack.c.bf16 %v3390_v60, %v3390_v60  ;;  %v3516_v58 = vsel %vm3460_vm6, %v3390_v60, 0.0  ;;  %v3562_v13 = vmul.f32 %v3390_v60, %v3390_v60 }
 0x41a   : > { %v3517_v43 = vadd.f32 %v3516_v58, %v3515_v57 }
 0x41b   : > { %3455 = vst.msk [vmem:[%s4315_s16 + $0x70] sm:$0xf] %vm3426_vm5, %v3422_v45  ;;  %v3621_v22 = vsel %vm3460_vm6, %v3562_v13, 0.0 }
 0x41c   : > { %v3622_v44 = vadd.f32 %v3621_v22, %v3620_v3  ;;  %v3318_v18 = vpop.f32.mrf.mxu0  ;;  %v3189_v21 = vpop.f32.mrf.mxu3 }
 0x41d   : > { %v3355_v8 = vadd.f32 %v3318_v18, %v3221_v5  ;;  %v3223_v2 = vadd.f32 %v3189_v21, %v3089_v23 }
 0x41f   : > { %v3391_v41 = vadd.f32 %v4194_v9, %v3355_v8 }
 0x421   : > { %v3423_v10 = vpack.c.bf16 %v3391_v41, %v3391_v41  ;;  %v3518_v51 = vsel %vm3460_vm6, %v3391_v41, 0.0  ;;  %v3563_v16 = vmul.f32 %v3391_v41, %v3391_v41 }
 0x422   : > { %v3519_v52 = vadd.f32 %v3518_v51, %v3517_v43 }
 0x423   : > { %3456 = vst.msk [vmem:[%s4315_s16 + $0x74] sm:$0xf] %vm3426_vm5, %v3423_v10  ;;  %v3623_v61 = vsel %vm3460_vm6, %v3563_v16, 0.0 }
 0x424   : > { %v3624_v27 = vadd.f32 %v3623_v61, %v3622_v44  ;;  %v3321_v37 = vpop.f32.mrf.mxu0 }
 0x425   : > { %v3356_v55 = vadd.f32 %v3321_v37, %v3222_v50 }
 0x427   : > { %v3392_v29 = vadd.f32 %v4194_v9, %v3356_v55 }
 0x429   : > { %v3424_v6 = vpack.c.bf16 %v3392_v29, %v3392_v29  ;;  %v3520_v40 = vsel %vm3460_vm6, %v3392_v29, 0.0  ;;  %v3564_v1 = vmul.f32 %v3392_v29, %v3392_v29 }
 0x42a   : > { %v3521_v34 = vadd.f32 %v3520_v40, %v3519_v52 }
 0x42b   : > { %3457 = vst.msk [vmem:[%s4315_s16 + $0x78] sm:$0xf] %vm3426_vm5, %v3424_v6  ;;  %v3625_v0 = vsel %vm3460_vm6, %v3564_v1, 0.0 }
 0x42c   : > { %v3626_v42 = vadd.f32 %v3625_v0, %v3624_v27  ;;  %v3323_v12 = vpop.f32.mrf.mxu0 }
 0x42d   : > { %v3357_v63 = vadd.f32 %v3323_v12, %v3223_v2 }
 0x42f   : > { %v3393_v19 = vadd.f32 %v4194_v9, %v3357_v63 }
 0x431   : > { %v3425_v33 = vpack.c.bf16 %v3393_v19, %v3393_v19  ;;  %v3522_v25 = vsel %vm3460_vm6, %v3393_v19, 0.0  ;;  %v3565_v35 = vmul.f32 %v3393_v19, %v3393_v19 }
 0x432   : > { %v3523_v4 = vadd.f32 %v3522_v25, %v3521_v34 }
 0x433   : > { %3458 = vst.msk [vmem:[%s4315_s16 + $0x7c] sm:$0xf] %vm3426_vm5, %v3425_v33  ;;  %v3627_v7 = vsel %vm3460_vm6, %v3565_v35, 0.0 }
 0x434   : > { %v3524_v38 = vrot.slane %v3523_v4, 4  ;;  %v3628_v15 = vadd.f32 %v3627_v7, %v3626_v42 }
 0x436   : > { %v3525_v62 = vadd.f32 %v3524_v38, %v3523_v4  ;;  %v3629_v17 = vrot.slane %v3628_v15, 4 }
 0x438   : > { %v3526_v39 = vrot.slane %v3525_v62, 2  ;;  %v3630_v32 = vadd.f32 %v3629_v17, %v3628_v15 }
 0x43a   : > { %v3527_v20 = vadd.f32 %v3526_v39, %v3525_v62  ;;  %v3631_v30 = vrot.slane %v3630_v32, 2 }
 0x43c   : > { %v3528_v24 = vrot.slane %v3527_v20, 1  ;;  %v3632_v57 = vadd.f32 %v3631_v30, %v3630_v32 }
 0x43e   : > { %v3529_v46 = vadd.f32 %v3528_v24, %v3527_v20  ;;  %v3633_v3 = vrot.slane %v3632_v57, 1 }
 0x440   : > { %v3530_v26 = vadd.f32 %v3529_v46, %v3459_v54  ;;  %v3634_v56 = vadd.f32 %v3633_v3, %v3632_v57 }
 0x442   : > { %3532 = vst.msk [vmem:[%s4305_s10] sm:$0x1] %vm3531_vm1, %v3530_v26  ;;  %v3635_v28 = vadd.f32 %v3634_v56, %v3533_v14 }
 0x444   : > { %3636 = vst.msk [vmem:[%s4305_s10 + $0x1] sm:$0x1] %vm3531_vm1, %v3635_v28 }
 0x445 PF: > { %s17_s25 = sadd.s32 1, %s4233_s25   ;;  %s6635_s21 = smov %s4225_s23 }
 0x446   : > { %p14_p8 = scmp.ge.s32.totalorder %s17_s25, 10   ;;  %s6636_s22 = smov %s4229_s24 }
 0x447   : > { %s6637_s23 = smov %s6640_s26  ;;  %s6638_s24 = smov %s6644_s27 }
 0x448   :  { %16 = sbr.rel (!%p14_p8) target bundleno = 3 (0x3), region = 96 }

</bundles_post_ra>
